<compile_context>
chip_gen: v7x
topology: tpu7x:2x2x1
jax: 0.10.0
libtpu: 0.0.40
codegen_flags: <defaults>
</compile_context>

<pallas_src>
import functools
import math

import jax
import jax.numpy as jnp
from jax import lax
from jax.experimental import pallas as pl
from jax.experimental.pallas import tpu as pltpu


def _round_up(x, m):
    return (x + m - 1) // m * m


def _conv_bn_relu_kernel(x_ref, w_ref, sb_ref, o_ref, p_ref, *,
                         KH, KW, stride, TH, Wo, Cin, num_row_tiles):
    """One grid step: TH output rows (full Wo width) x TN output channels.

    x_ref : (1, Hp, Wp, Cin) bf16 -- whole padded image (revisited across j, r)
    w_ref : (K, TN)          bf16 -- im2col-ordered weight tile, K = KH*KW*Cin
    sb_ref: (2, TN)          f32  -- row 0 = folded BN scale, row 1 = folded bias
    o_ref : (TM, TN)         bf16 -- output tile, TM = TH*Wo (lane-dense TN)
    p_ref : (TM, K)          bf16 -- VMEM scratch: im2col patch slab
    """
    # First padded-input row of this row tile (static 0 when there is a single
    # row tile -> fully static addressing in the common small-image case).
    if num_row_tiles == 1:
        row0 = 0
    else:
        row0 = pl.program_id(2) * (TH * stride)

    def build_row(oh):
        # In-kernel im2col for output row `oh` of this tile: KH*KW small
        # VMEM->VMEM copies into the patch slab (no HBM traffic).
        m0 = oh * Wo
        for kh in range(KH):
            irow = row0 + oh * stride + kh
            for kw in range(KW):
                c0 = (kh * KW + kw) * Cin
                cs = pl.ds(kw, Wo) if stride == 1 else pl.ds(kw, Wo, stride)
                p_ref[pl.ds(m0, Wo), c0:c0 + Cin] = x_ref[0, irow, cs, :]

    if TH <= 32:                      # small tile: unroll statically
        for oh in range(TH):
            build_row(oh)
    else:                             # big tile: keep code size bounded
        def body(oh, carry):
            build_row(oh)
            return carry
        lax.fori_loop(0, TH, body, 0)

    # One fat MXU matmul per grid step, f32 accumulation.
    acc = jnp.dot(p_ref[...], w_ref[...], preferred_element_type=jnp.float32)
    # Folded BatchNorm (eval) + ReLU epilogue in f32, bf16 store.
    y = acc * sb_ref[0:1, :] + sb_ref[1:2, :]
    o_ref[...] = jnp.maximum(y, 0.0).astype(o_ref.dtype)


def conv_block_forward(x, weight_oihw, gamma, beta, running_mean, running_var,
                       *, eps=1e-5, stride=1, padding=1,
                       data_format="NCHW", out_dtype=jnp.bfloat16):
    """ConvBlock forward: conv(no bias) -> BN(eval, folded) -> ReLU.

    data_format="NCHW" matches the PyTorch module (input & output NCHW);
    data_format="NHWC" skips both layout transposes for chained ConvBlocks.
    """
    if data_format == "NCHW":
        N, Cin, H, W = x.shape
        x_nhwc = jnp.transpose(x, (0, 2, 3, 1))
    elif data_format == "NHWC":
        N, H, W, Cin = x.shape
        x_nhwc = x
    else:
        raise ValueError(f"unknown data_format {data_format}")

    Cout, Cin_w, KH, KW = weight_oihw.shape
    assert Cin_w == Cin, "weight Cin mismatch"

    Ho = (H + 2 * padding - KH) // stride + 1
    Wo = (W + 2 * padding - KW) // stride + 1
    K = KH * KW * Cin                     # NOT padded (review item 2)

    # ---- tiling ---------------------------------------------------------------
    Coutp = _round_up(Cout, 128)
    TN = 256 if Coutp % 256 == 0 else 128   # 256-wide MXU on v6e/v7x, else 128
    J = Coutp // TN

    # Row-tile height so that TM = TH*Wo is a multiple of 16 (bf16 sublane pack)
    # and targets ~512 rows per matmul (review items 3 & 9).
    m_unit = 16 // math.gcd(Wo, 16)
    TH = max(m_unit, (512 // max(Wo, 1)) // m_unit * m_unit)
    TH = min(TH, _round_up(Ho, m_unit))
    Ho_pad = _round_up(Ho, TH)
    R = Ho_pad // TH
    TM = TH * Wo

    # ---- activation: single NHWC spatial pad + bf16 cast (no HBM im2col) ------
    rows_needed = (Ho_pad - 1) * stride + KH
    extra_bottom = max(0, rows_needed - (H + 2 * padding))   # keep halo in-bounds
    x_pad = jnp.pad(x_nhwc.astype(jnp.bfloat16),
                    ((0, 0),
                     (padding, padding + extra_bottom),
                     (padding, padding),
                     (0, 0)))
    Hp = H + 2 * padding + extra_bottom
    Wp = W + 2 * padding

    # Weight OIHW -> (K, Coutp) bf16; K ordered (kh, kw, cin) to match the slab.
    w2d = jnp.transpose(weight_oihw, (2, 3, 1, 0)).reshape(K, Cout)
    w2d = jnp.pad(w2d.astype(jnp.bfloat16), ((0, 0), (0, Coutp - Cout)))

    # Fold BatchNorm (eval / running stats) into packed (2, Coutp) scale/bias.
    scale = (gamma / jnp.sqrt(running_var + eps)).astype(jnp.float32)
    bias = (beta - running_mean * scale).astype(jnp.float32)
    sb = jnp.stack([jnp.pad(scale, (0, Coutp - Cout)),
                    jnp.pad(bias, (0, Coutp - Cout))], axis=0)

    # ---- VMEM budgeting (generation-aware; only raise the limit when needed) --
    img_vmem = Hp * _round_up(Wp, 16) * _round_up(Cin, 128) * 2   # lane/sublane pad
    w_vmem = _round_up(K, 16) * TN * 2
    out_vmem = TM * TN * 2
    p_vmem = TM * _round_up(K, 128) * 2
    est = 2 * (img_vmem + w_vmem + out_vmem + 2 * TN * 4) + p_vmem + TM * TN * 4
    cp = dict(dimension_semantics=("parallel", "parallel", "parallel"))
    if est > 12 * (1 << 20):
        limit = int(est * 1.25) + (4 << 20)
        try:
            cap = pltpu.get_tpu_info().vmem_capacity_bytes
            limit = min(limit, cap - (8 << 20))
        except Exception:
            limit = min(limit, 100 << 20)
        cp["vmem_limit_bytes"] = limit

    kernel = functools.partial(_conv_bn_relu_kernel,
                               KH=KH, KW=KW, stride=stride,
                               TH=TH, Wo=Wo, Cin=Cin, num_row_tiles=R)

    # Grid order (image, cout-tile, row-tile): the image block is DMA'd once per
    # image (index constant across j, r) and each weight tile once per (n, j).
    out2d = pl.pallas_call(
        kernel,
        out_shape=jax.ShapeDtypeStruct((N * R * TM, Coutp), out_dtype),
        grid_spec=pltpu.PrefetchScalarGridSpec(
            num_scalar_prefetch=0,
            grid=(N, J, R),
            in_specs=[
                pl.BlockSpec((1, Hp, Wp, Cin), lambda n, j, r: (n, 0, 0, 0)),
                pl.BlockSpec((K, TN), lambda n, j, r: (0, j)),
                pl.BlockSpec((2, TN), lambda n, j, r: (0, j)),
            ],
            out_specs=pl.BlockSpec((TM, TN), lambda n, j, r: (n * R + r, j)),
            scratch_shapes=[pltpu.VMEM((TM, K), jnp.bfloat16)],
        ),
        compiler_params=pltpu.CompilerParams(**cp),
    )(x_pad, w2d, sb)

    # (N*R*TM, Coutp) -> (N, Ho_pad, Wo, Coutp) is a free row-major reshape.
    out = out2d.reshape(N, Ho_pad, Wo, Coutp)[:, :Ho, :, :Cout]
    if data_format == "NCHW":
        out = jnp.transpose(out, (0, 3, 1, 2))
    return out


def _reference_forward(x_nchw, weight_oihw, gamma, beta, running_mean, running_var,
                       eps=1e-5, stride=1, padding=1):
    # Reference with the same bf16 input/weight quantization as the kernel so the
    # comparison isolates accumulation-order / output-quantization differences.
    x = x_nchw.astype(jnp.bfloat16).astype(jnp.float32)
    w = weight_oihw.astype(jnp.bfloat16).astype(jnp.float32)
    y = lax.conv_general_dilated(
        x, w, window_strides=(stride, stride),
        padding=((padding, padding), (padding, padding)),
        dimension_numbers=("NCHW", "OIHW", "NCHW"))
    scale = gamma / jnp.sqrt(running_var + eps)
    bias = beta - running_mean * scale
    y = y * scale[None, :, None, None] + bias[None, :, None, None]
    return jnp.maximum(y, 0.0)


if __name__ == "__main__":
    key = jax.random.PRNGKey(0)
    k_x, k_w, k_g, k_b, k_m, k_v = jax.random.split(key, 6)

    N, Cin, H, W = 2, 4, 16, 16
    Cout, KH, KW = 8, 3, 3

    x = jax.random.normal(k_x, (N, Cin, H, W), dtype=jnp.float32)
    fan_in = Cin * KH * KW
    weight = jax.random.normal(k_w, (Cout, Cin, KH, KW), dtype=jnp.float32) * (2.0 / fan_in) ** 0.5
    gamma = 1.0 + 0.1 * jax.random.normal(k_g, (Cout,), dtype=jnp.float32)
    beta = 0.1 * jax.random.normal(k_b, (Cout,), dtype=jnp.float32)
    running_mean = 0.1 * jax.random.normal(k_m, (Cout,), dtype=jnp.float32)
    running_var = 1.0 + 0.1 * jax.random.uniform(k_v, (Cout,), dtype=jnp.float32)

    out = conv_block_forward(x, weight, gamma, beta, running_mean, running_var)
    out = jax.block_until_ready(out)
    assert out.shape == (N, Cout, H, W), out.shape

    ref = _reference_forward(x, weight, gamma, beta, running_mean, running_var)
    err = float(jnp.max(jnp.abs(out.astype(jnp.float32) - ref)))
    # bf16 output quantization + bf16 inputs -> loose-but-meaningful tolerance.
    assert err < 5e-2, err

    print("KERNEL_OK")
</pallas_src>

<mosaic_0001>
module attributes {stable_mosaic.version = 11 : i64} {
  func.func @_conv_bn_relu_kernel(%arg0: i32, %arg1: i32, %arg2: i32, %arg3: memref<1x18x18x4xbf16, #tpu.memory_space<vmem>>, %arg4: memref<36x128xbf16, #tpu.memory_space<vmem>>, %arg5: memref<2x128xf32, #tpu.memory_space<vmem>>, %arg6: memref<256x128xbf16, #tpu.memory_space<vmem>>, %arg7: memref<256x36xbf16, #tpu.memory_space<vmem>>) attributes {dimension_semantics = [#tpu.dimension_semantics<parallel>, #tpu.dimension_semantics<parallel>, #tpu.dimension_semantics<parallel>], iteration_bounds = array<i64: 2, 1, 1>, scalar_prefetch = 0 : i64, scratch_operands = 1 : i64, tpu.core_type = #tpu.core_type<tc>, window_params = [{transform_indices = @transform_0, window_bounds = array<i64: 1, 18, 18, 4>}, {transform_indices = @transform_1, window_bounds = array<i64: 36, 128>}, {transform_indices = @transform_2, window_bounds = array<i64: 2, 128>}, {transform_indices = @transform_3, window_bounds = array<i64: 256, 128>}]} {
    %c0 = arith.constant 0 : index
    %c0_0 = arith.constant 0 : index
    %c0_1 = arith.constant 0 : index
    %c0_2 = arith.constant 0 : index
    %0 = vector.load %arg3[%c0, %c0_0, %c0_1, %c0_2] : memref<1x18x18x4xbf16, #tpu.memory_space<vmem>>, vector<1x1x16x4xbf16>
    %1 = vector.shape_cast %0 : vector<1x1x16x4xbf16> to vector<16x4xbf16>
    %c0_3 = arith.constant 0 : index
    %c0_4 = arith.constant 0 : index
    %2 = vector.load %arg7[%c0_3, %c0_4] : memref<256x36xbf16, #tpu.memory_space<vmem>>, vector<16x4xbf16>
    tpu.vector_store %arg7[%c0_3, %c0_4], %1 {strides = array<i32>} : memref<256x36xbf16, #tpu.memory_space<vmem>>, vector<16x4xbf16>,
    %c0_5 = arith.constant 0 : index
    %c0_6 = arith.constant 0 : index
    %c1 = arith.constant 1 : index
    %c0_7 = arith.constant 0 : index
    %3 = vector.load %arg3[%c0_5, %c0_6, %c1, %c0_7] : memref<1x18x18x4xbf16, #tpu.memory_space<vmem>>, vector<1x1x16x4xbf16>
    %4 = vector.shape_cast %3 : vector<1x1x16x4xbf16> to vector<16x4xbf16>
    %c0_8 = arith.constant 0 : index
    %c4 = arith.constant 4 : index
    %5 = vector.load %arg7[%c0_8, %c4] : memref<256x36xbf16, #tpu.memory_space<vmem>>, vector<16x4xbf16>
    tpu.vector_store %arg7[%c0_8, %c4], %4 {strides = array<i32>} : memref<256x36xbf16, #tpu.memory_space<vmem>>, vector<16x4xbf16>,
    %c0_9 = arith.constant 0 : index
    %c0_10 = arith.constant 0 : index
    %c2 = arith.constant 2 : index
    %c0_11 = arith.constant 0 : index
    %6 = vector.load %arg3[%c0_9, %c0_10, %c2, %c0_11] : memref<1x18x18x4xbf16, #tpu.memory_space<vmem>>, vector<1x1x16x4xbf16>
    %7 = vector.shape_cast %6 : vector<1x1x16x4xbf16> to vector<16x4xbf16>
    %c0_12 = arith.constant 0 : index
    %c8 = arith.constant 8 : index
    %8 = vector.load %arg7[%c0_12, %c8] : memref<256x36xbf16, #tpu.memory_space<vmem>>, vector<16x4xbf16>
    tpu.vector_store %arg7[%c0_12, %c8], %7 {strides = array<i32>} : memref<256x36xbf16, #tpu.memory_space<vmem>>, vector<16x4xbf16>,
    %c0_13 = arith.constant 0 : index
    %c1_14 = arith.constant 1 : index
    %c0_15 = arith.constant 0 : index
    %c0_16 = arith.constant 0 : index
    %9 = vector.load %arg3[%c0_13, %c1_14, %c0_15, %c0_16] : memref<1x18x18x4xbf16, #tpu.memory_space<vmem>>, vector<1x1x16x4xbf16>
    %10 = vector.shape_cast %9 : vector<1x1x16x4xbf16> to vector<16x4xbf16>
    %c0_17 = arith.constant 0 : index
    %c12 = arith.constant 12 : index
    %11 = vector.load %arg7[%c0_17, %c12] : memref<256x36xbf16, #tpu.memory_space<vmem>>, vector<16x4xbf16>
    tpu.vector_store %arg7[%c0_17, %c12], %10 {strides = array<i32>} : memref<256x36xbf16, #tpu.memory_space<vmem>>, vector<16x4xbf16>,
    %c0_18 = arith.constant 0 : index
    %c1_19 = arith.constant 1 : index
    %c1_20 = arith.constant 1 : index
    %c0_21 = arith.constant 0 : index
    %12 = vector.load %arg3[%c0_18, %c1_19, %c1_20, %c0_21] : memref<1x18x18x4xbf16, #tpu.memory_space<vmem>>, vector<1x1x16x4xbf16>
    %13 = vector.shape_cast %12 : vector<1x1x16x4xbf16> to vector<16x4xbf16>
    %c0_22 = arith.constant 0 : index
    %c16 = arith.constant 16 : index
    %14 = vector.load %arg7[%c0_22, %c16] : memref<256x36xbf16, #tpu.memory_space<vmem>>, vector<16x4xbf16>
    tpu.vector_store %arg7[%c0_22, %c16], %13 {strides = array<i32>} : memref<256x36xbf16, #tpu.memory_space<vmem>>, vector<16x4xbf16>,
    %c0_23 = arith.constant 0 : index
    %c1_24 = arith.constant 1 : index
    %c2_25 = arith.constant 2 : index
    %c0_26 = arith.constant 0 : index
    %15 = vector.load %arg3[%c0_23, %c1_24, %c2_25, %c0_26] : memref<1x18x18x4xbf16, #tpu.memory_space<vmem>>, vector<1x1x16x4xbf16>
    %16 = vector.shape_cast %15 : vector<1x1x16x4xbf16> to vector<16x4xbf16>
    %c0_27 = arith.constant 0 : index
    %c20 = arith.constant 20 : index
    %17 = vector.load %arg7[%c0_27, %c20] : memref<256x36xbf16, #tpu.memory_space<vmem>>, vector<16x4xbf16>
    tpu.vector_store %arg7[%c0_27, %c20], %16 {strides = array<i32>} : memref<256x36xbf16, #tpu.memory_space<vmem>>, vector<16x4xbf16>,
    %c0_28 = arith.constant 0 : index
    %c2_29 = arith.constant 2 : index
    %c0_30 = arith.constant 0 : index
    %c0_31 = arith.constant 0 : index
    %18 = vector.load %arg3[%c0_28, %c2_29, %c0_30, %c0_31] : memref<1x18x18x4xbf16, #tpu.memory_space<vmem>>, vector<1x1x16x4xbf16>
    %19 = vector.shape_cast %18 : vector<1x1x16x4xbf16> to vector<16x4xbf16>
    %c0_32 = arith.constant 0 : index
    %c24 = arith.constant 24 : index
    %20 = vector.load %arg7[%c0_32, %c24] : memref<256x36xbf16, #tpu.memory_space<vmem>>, vector<16x4xbf16>
    tpu.vector_store %arg7[%c0_32, %c24], %19 {strides = array<i32>} : memref<256x36xbf16, #tpu.memory_space<vmem>>, vector<16x4xbf16>,
    %c0_33 = arith.constant 0 : index
    %c2_34 = arith.constant 2 : index
    %c1_35 = arith.constant 1 : index
    %c0_36 = arith.constant 0 : index
    %21 = vector.load %arg3[%c0_33, %c2_34, %c1_35, %c0_36] : memref<1x18x18x4xbf16, #tpu.memory_space<vmem>>, vector<1x1x16x4xbf16>
    %22 = vector.shape_cast %21 : vector<1x1x16x4xbf16> to vector<16x4xbf16>
    %c0_37 = arith.constant 0 : index
    %c28 = arith.constant 28 : index
    %23 = vector.load %arg7[%c0_37, %c28] : memref<256x36xbf16, #tpu.memory_space<vmem>>, vector<16x4xbf16>
    tpu.vector_store %arg7[%c0_37, %c28], %22 {strides = array<i32>} : memref<256x36xbf16, #tpu.memory_space<vmem>>, vector<16x4xbf16>,
    %c0_38 = arith.constant 0 : index
    %c2_39 = arith.constant 2 : index
    %c2_40 = arith.constant 2 : index
    %c0_41 = arith.constant 0 : index
    %24 = vector.load %arg3[%c0_38, %c2_39, %c2_40, %c0_41] : memref<1x18x18x4xbf16, #tpu.memory_space<vmem>>, vector<1x1x16x4xbf16>
    %25 = vector.shape_cast %24 : vector<1x1x16x4xbf16> to vector<16x4xbf16>
    %c0_42 = arith.constant 0 : index
    %c32 = arith.constant 32 : index
    %26 = vector.load %arg7[%c0_42, %c32] : memref<256x36xbf16, #tpu.memory_space<vmem>>, vector<16x4xbf16>
    tpu.vector_store %arg7[%c0_42, %c32], %25 {strides = array<i32>} : memref<256x36xbf16, #tpu.memory_space<vmem>>, vector<16x4xbf16>,
    %c0_43 = arith.constant 0 : index
    %c1_44 = arith.constant 1 : index
    %c0_45 = arith.constant 0 : index
    %c0_46 = arith.constant 0 : index
    %27 = vector.load %arg3[%c0_43, %c1_44, %c0_45, %c0_46] : memref<1x18x18x4xbf16, #tpu.memory_space<vmem>>, vector<1x1x16x4xbf16>
    %28 = vector.shape_cast %27 : vector<1x1x16x4xbf16> to vector<16x4xbf16>
    %c16_47 = arith.constant 16 : index
    %c0_48 = arith.constant 0 : index
    %29 = vector.load %arg7[%c16_47, %c0_48] : memref<256x36xbf16, #tpu.memory_space<vmem>>, vector<16x4xbf16>
    tpu.vector_store %arg7[%c16_47, %c0_48], %28 {strides = array<i32>} : memref<256x36xbf16, #tpu.memory_space<vmem>>, vector<16x4xbf16>,
    %c0_49 = arith.constant 0 : index
    %c1_50 = arith.constant 1 : index
    %c1_51 = arith.constant 1 : index
    %c0_52 = arith.constant 0 : index
    %30 = vector.load %arg3[%c0_49, %c1_50, %c1_51, %c0_52] : memref<1x18x18x4xbf16, #tpu.memory_space<vmem>>, vector<1x1x16x4xbf16>
    %31 = vector.shape_cast %30 : vector<1x1x16x4xbf16> to vector<16x4xbf16>
    %c16_53 = arith.constant 16 : index
    %c4_54 = arith.constant 4 : index
    %32 = vector.load %arg7[%c16_53, %c4_54] : memref<256x36xbf16, #tpu.memory_space<vmem>>, vector<16x4xbf16>
    tpu.vector_store %arg7[%c16_53, %c4_54], %31 {strides = array<i32>} : memref<256x36xbf16, #tpu.memory_space<vmem>>, vector<16x4xbf16>,
    %c0_55 = arith.constant 0 : index
    %c1_56 = arith.constant 1 : index
    %c2_57 = arith.constant 2 : index
    %c0_58 = arith.constant 0 : index
    %33 = vector.load %arg3[%c0_55, %c1_56, %c2_57, %c0_58] : memref<1x18x18x4xbf16, #tpu.memory_space<vmem>>, vector<1x1x16x4xbf16>
    %34 = vector.shape_cast %33 : vector<1x1x16x4xbf16> to vector<16x4xbf16>
    %c16_59 = arith.constant 16 : index
    %c8_60 = arith.constant 8 : index
    %35 = vector.load %arg7[%c16_59, %c8_60] : memref<256x36xbf16, #tpu.memory_space<vmem>>, vector<16x4xbf16>
    tpu.vector_store %arg7[%c16_59, %c8_60], %34 {strides = array<i32>} : memref<256x36xbf16, #tpu.memory_space<vmem>>, vector<16x4xbf16>,
    %c0_61 = arith.constant 0 : index
    %c2_62 = arith.constant 2 : index
    %c0_63 = arith.constant 0 : index
    %c0_64 = arith.constant 0 : index
    %36 = vector.load %arg3[%c0_61, %c2_62, %c0_63, %c0_64] : memref<1x18x18x4xbf16, #tpu.memory_space<vmem>>, vector<1x1x16x4xbf16>
    %37 = vector.shape_cast %36 : vector<1x1x16x4xbf16> to vector<16x4xbf16>
    %c16_65 = arith.constant 16 : index
    %c12_66 = arith.constant 12 : index
    %38 = vector.load %arg7[%c16_65, %c12_66] : memref<256x36xbf16, #tpu.memory_space<vmem>>, vector<16x4xbf16>
    tpu.vector_store %arg7[%c16_65, %c12_66], %37 {strides = array<i32>} : memref<256x36xbf16, #tpu.memory_space<vmem>>, vector<16x4xbf16>,
    %c0_67 = arith.constant 0 : index
    %c2_68 = arith.constant 2 : index
    %c1_69 = arith.constant 1 : index
    %c0_70 = arith.constant 0 : index
    %39 = vector.load %arg3[%c0_67, %c2_68, %c1_69, %c0_70] : memref<1x18x18x4xbf16, #tpu.memory_space<vmem>>, vector<1x1x16x4xbf16>
    %40 = vector.shape_cast %39 : vector<1x1x16x4xbf16> to vector<16x4xbf16>
    %c16_71 = arith.constant 16 : index
    %c16_72 = arith.constant 16 : index
    %41 = vector.load %arg7[%c16_71, %c16_72] : memref<256x36xbf16, #tpu.memory_space<vmem>>, vector<16x4xbf16>
    tpu.vector_store %arg7[%c16_71, %c16_72], %40 {strides = array<i32>} : memref<256x36xbf16, #tpu.memory_space<vmem>>, vector<16x4xbf16>,
    %c0_73 = arith.constant 0 : index
    %c2_74 = arith.constant 2 : index
    %c2_75 = arith.constant 2 : index
    %c0_76 = arith.constant 0 : index
    %42 = vector.load %arg3[%c0_73, %c2_74, %c2_75, %c0_76] : memref<1x18x18x4xbf16, #tpu.memory_space<vmem>>, vector<1x1x16x4xbf16>
    %43 = vector.shape_cast %42 : vector<1x1x16x4xbf16> to vector<16x4xbf16>
    %c16_77 = arith.constant 16 : index
    %c20_78 = arith.constant 20 : index
    %44 = vector.load %arg7[%c16_77, %c20_78] : memref<256x36xbf16, #tpu.memory_space<vmem>>, vector<16x4xbf16>
    tpu.vector_store %arg7[%c16_77, %c20_78], %43 {strides = array<i32>} : memref<256x36xbf16, #tpu.memory_space<vmem>>, vector<16x4xbf16>,
    %c0_79 = arith.constant 0 : index
    %c3 = arith.constant 3 : index
    %c0_80 = arith.constant 0 : index
    %c0_81 = arith.constant 0 : index
    %45 = vector.load %arg3[%c0_79, %c3, %c0_80, %c0_81] : memref<1x18x18x4xbf16, #tpu.memory_space<vmem>>, vector<1x1x16x4xbf16>
    %46 = vector.shape_cast %45 : vector<1x1x16x4xbf16> to vector<16x4xbf16>
    %c16_82 = arith.constant 16 : index
    %c24_83 = arith.constant 24 : index
    %47 = vector.load %arg7[%c16_82, %c24_83] : memref<256x36xbf16, #tpu.memory_space<vmem>>, vector<16x4xbf16>
    tpu.vector_store %arg7[%c16_82, %c24_83], %46 {strides = array<i32>} : memref<256x36xbf16, #tpu.memory_space<vmem>>, vector<16x4xbf16>,
    %c0_84 = arith.constant 0 : index
    %c3_85 = arith.constant 3 : index
    %c1_86 = arith.constant 1 : index
    %c0_87 = arith.constant 0 : index
    %48 = vector.load %arg3[%c0_84, %c3_85, %c1_86, %c0_87] : memref<1x18x18x4xbf16, #tpu.memory_space<vmem>>, vector<1x1x16x4xbf16>
    %49 = vector.shape_cast %48 : vector<1x1x16x4xbf16> to vector<16x4xbf16>
    %c16_88 = arith.constant 16 : index
    %c28_89 = arith.constant 28 : index
    %50 = vector.load %arg7[%c16_88, %c28_89] : memref<256x36xbf16, #tpu.memory_space<vmem>>, vector<16x4xbf16>
    tpu.vector_store %arg7[%c16_88, %c28_89], %49 {strides = array<i32>} : memref<256x36xbf16, #tpu.memory_space<vmem>>, vector<16x4xbf16>,
    %c0_90 = arith.constant 0 : index
    %c3_91 = arith.constant 3 : index
    %c2_92 = arith.constant 2 : index
    %c0_93 = arith.constant 0 : index
    %51 = vector.load %arg3[%c0_90, %c3_91, %c2_92, %c0_93] : memref<1x18x18x4xbf16, #tpu.memory_space<vmem>>, vector<1x1x16x4xbf16>
    %52 = vector.shape_cast %51 : vector<1x1x16x4xbf16> to vector<16x4xbf16>
    %c16_94 = arith.constant 16 : index
    %c32_95 = arith.constant 32 : index
    %53 = vector.load %arg7[%c16_94, %c32_95] : memref<256x36xbf16, #tpu.memory_space<vmem>>, vector<16x4xbf16>
    tpu.vector_store %arg7[%c16_94, %c32_95], %52 {strides = array<i32>} : memref<256x36xbf16, #tpu.memory_space<vmem>>, vector<16x4xbf16>,
    %c0_96 = arith.constant 0 : index
    %c2_97 = arith.constant 2 : index
    %c0_98 = arith.constant 0 : index
    %c0_99 = arith.constant 0 : index
    %54 = vector.load %arg3[%c0_96, %c2_97, %c0_98, %c0_99] : memref<1x18x18x4xbf16, #tpu.memory_space<vmem>>, vector<1x1x16x4xbf16>
    %55 = vector.shape_cast %54 : vector<1x1x16x4xbf16> to vector<16x4xbf16>
    %c32_100 = arith.constant 32 : index
    %c0_101 = arith.constant 0 : index
    %56 = vector.load %arg7[%c32_100, %c0_101] : memref<256x36xbf16, #tpu.memory_space<vmem>>, vector<16x4xbf16>
    tpu.vector_store %arg7[%c32_100, %c0_101], %55 {strides = array<i32>} : memref<256x36xbf16, #tpu.memory_space<vmem>>, vector<16x4xbf16>,
    %c0_102 = arith.constant 0 : index
    %c2_103 = arith.constant 2 : index
    %c1_104 = arith.constant 1 : index
    %c0_105 = arith.constant 0 : index
    %57 = vector.load %arg3[%c0_102, %c2_103, %c1_104, %c0_105] : memref<1x18x18x4xbf16, #tpu.memory_space<vmem>>, vector<1x1x16x4xbf16>
    %58 = vector.shape_cast %57 : vector<1x1x16x4xbf16> to vector<16x4xbf16>
    %c32_106 = arith.constant 32 : index
    %c4_107 = arith.constant 4 : index
    %59 = vector.load %arg7[%c32_106, %c4_107] : memref<256x36xbf16, #tpu.memory_space<vmem>>, vector<16x4xbf16>
    tpu.vector_store %arg7[%c32_106, %c4_107], %58 {strides = array<i32>} : memref<256x36xbf16, #tpu.memory_space<vmem>>, vector<16x4xbf16>,
    %c0_108 = arith.constant 0 : index
    %c2_109 = arith.constant 2 : index
    %c2_110 = arith.constant 2 : index
    %c0_111 = arith.constant 0 : index
    %60 = vector.load %arg3[%c0_108, %c2_109, %c2_110, %c0_111] : memref<1x18x18x4xbf16, #tpu.memory_space<vmem>>, vector<1x1x16x4xbf16>
    %61 = vector.shape_cast %60 : vector<1x1x16x4xbf16> to vector<16x4xbf16>
    %c32_112 = arith.constant 32 : index
    %c8_113 = arith.constant 8 : index
    %62 = vector.load %arg7[%c32_112, %c8_113] : memref<256x36xbf16, #tpu.memory_space<vmem>>, vector<16x4xbf16>
    tpu.vector_store %arg7[%c32_112, %c8_113], %61 {strides = array<i32>} : memref<256x36xbf16, #tpu.memory_space<vmem>>, vector<16x4xbf16>,
    %c0_114 = arith.constant 0 : index
    %c3_115 = arith.constant 3 : index
    %c0_116 = arith.constant 0 : index
    %c0_117 = arith.constant 0 : index
    %63 = vector.load %arg3[%c0_114, %c3_115, %c0_116, %c0_117] : memref<1x18x18x4xbf16, #tpu.memory_space<vmem>>, vector<1x1x16x4xbf16>
    %64 = vector.shape_cast %63 : vector<1x1x16x4xbf16> to vector<16x4xbf16>
    %c32_118 = arith.constant 32 : index
    %c12_119 = arith.constant 12 : index
    %65 = vector.load %arg7[%c32_118, %c12_119] : memref<256x36xbf16, #tpu.memory_space<vmem>>, vector<16x4xbf16>
    tpu.vector_store %arg7[%c32_118, %c12_119], %64 {strides = array<i32>} : memref<256x36xbf16, #tpu.memory_space<vmem>>, vector<16x4xbf16>,
    %c0_120 = arith.constant 0 : index
    %c3_121 = arith.constant 3 : index
    %c1_122 = arith.constant 1 : index
    %c0_123 = arith.constant 0 : index
    %66 = vector.load %arg3[%c0_120, %c3_121, %c1_122, %c0_123] : memref<1x18x18x4xbf16, #tpu.memory_space<vmem>>, vector<1x1x16x4xbf16>
    %67 = vector.shape_cast %66 : vector<1x1x16x4xbf16> to vector<16x4xbf16>
    %c32_124 = arith.constant 32 : index
    %c16_125 = arith.constant 16 : index
    %68 = vector.load %arg7[%c32_124, %c16_125] : memref<256x36xbf16, #tpu.memory_space<vmem>>, vector<16x4xbf16>
    tpu.vector_store %arg7[%c32_124, %c16_125], %67 {strides = array<i32>} : memref<256x36xbf16, #tpu.memory_space<vmem>>, vector<16x4xbf16>,
    %c0_126 = arith.constant 0 : index
    %c3_127 = arith.constant 3 : index
    %c2_128 = arith.constant 2 : index
    %c0_129 = arith.constant 0 : index
    %69 = vector.load %arg3[%c0_126, %c3_127, %c2_128, %c0_129] : memref<1x18x18x4xbf16, #tpu.memory_space<vmem>>, vector<1x1x16x4xbf16>
    %70 = vector.shape_cast %69 : vector<1x1x16x4xbf16> to vector<16x4xbf16>
    %c32_130 = arith.constant 32 : index
    %c20_131 = arith.constant 20 : index
    %71 = vector.load %arg7[%c32_130, %c20_131] : memref<256x36xbf16, #tpu.memory_space<vmem>>, vector<16x4xbf16>
    tpu.vector_store %arg7[%c32_130, %c20_131], %70 {strides = array<i32>} : memref<256x36xbf16, #tpu.memory_space<vmem>>, vector<16x4xbf16>,
    %c0_132 = arith.constant 0 : index
    %c4_133 = arith.constant 4 : index
    %c0_134 = arith.constant 0 : index
    %c0_135 = arith.constant 0 : index
    %72 = vector.load %arg3[%c0_132, %c4_133, %c0_134, %c0_135] : memref<1x18x18x4xbf16, #tpu.memory_space<vmem>>, vector<1x1x16x4xbf16>
    %73 = vector.shape_cast %72 : vector<1x1x16x4xbf16> to vector<16x4xbf16>
    %c32_136 = arith.constant 32 : index
    %c24_137 = arith.constant 24 : index
    %74 = vector.load %arg7[%c32_136, %c24_137] : memref<256x36xbf16, #tpu.memory_space<vmem>>, vector<16x4xbf16>
    tpu.vector_store %arg7[%c32_136, %c24_137], %73 {strides = array<i32>} : memref<256x36xbf16, #tpu.memory_space<vmem>>, vector<16x4xbf16>,
    %c0_138 = arith.constant 0 : index
    %c4_139 = arith.constant 4 : index
    %c1_140 = arith.constant 1 : index
    %c0_141 = arith.constant 0 : index
    %75 = vector.load %arg3[%c0_138, %c4_139, %c1_140, %c0_141] : memref<1x18x18x4xbf16, #tpu.memory_space<vmem>>, vector<1x1x16x4xbf16>
    %76 = vector.shape_cast %75 : vector<1x1x16x4xbf16> to vector<16x4xbf16>
    %c32_142 = arith.constant 32 : index
    %c28_143 = arith.constant 28 : index
    %77 = vector.load %arg7[%c32_142, %c28_143] : memref<256x36xbf16, #tpu.memory_space<vmem>>, vector<16x4xbf16>
    tpu.vector_store %arg7[%c32_142, %c28_143], %76 {strides = array<i32>} : memref<256x36xbf16, #tpu.memory_space<vmem>>, vector<16x4xbf16>,
    %c0_144 = arith.constant 0 : index
    %c4_145 = arith.constant 4 : index
    %c2_146 = arith.constant 2 : index
    %c0_147 = arith.constant 0 : index
    %78 = vector.load %arg3[%c0_144, %c4_145, %c2_146, %c0_147] : memref<1x18x18x4xbf16, #tpu.memory_space<vmem>>, vector<1x1x16x4xbf16>
    %79 = vector.shape_cast %78 : vector<1x1x16x4xbf16> to vector<16x4xbf16>
    %c32_148 = arith.constant 32 : index
    %c32_149 = arith.constant 32 : index
    %80 = vector.load %arg7[%c32_148, %c32_149] : memref<256x36xbf16, #tpu.memory_space<vmem>>, vector<16x4xbf16>
    tpu.vector_store %arg7[%c32_148, %c32_149], %79 {strides = array<i32>} : memref<256x36xbf16, #tpu.memory_space<vmem>>, vector<16x4xbf16>,
    %c0_150 = arith.constant 0 : index
    %c3_151 = arith.constant 3 : index
    %c0_152 = arith.constant 0 : index
    %c0_153 = arith.constant 0 : index
    %81 = vector.load %arg3[%c0_150, %c3_151, %c0_152, %c0_153] : memref<1x18x18x4xbf16, #tpu.memory_space<vmem>>, vector<1x1x16x4xbf16>
    %82 = vector.shape_cast %81 : vector<1x1x16x4xbf16> to vector<16x4xbf16>
    %c48 = arith.constant 48 : index
    %c0_154 = arith.constant 0 : index
    %83 = vector.load %arg7[%c48, %c0_154] : memref<256x36xbf16, #tpu.memory_space<vmem>>, vector<16x4xbf16>
    tpu.vector_store %arg7[%c48, %c0_154], %82 {strides = array<i32>} : memref<256x36xbf16, #tpu.memory_space<vmem>>, vector<16x4xbf16>,
    %c0_155 = arith.constant 0 : index
    %c3_156 = arith.constant 3 : index
    %c1_157 = arith.constant 1 : index
    %c0_158 = arith.constant 0 : index
    %84 = vector.load %arg3[%c0_155, %c3_156, %c1_157, %c0_158] : memref<1x18x18x4xbf16, #tpu.memory_space<vmem>>, vector<1x1x16x4xbf16>
    %85 = vector.shape_cast %84 : vector<1x1x16x4xbf16> to vector<16x4xbf16>
    %c48_159 = arith.constant 48 : index
    %c4_160 = arith.constant 4 : index
    %86 = vector.load %arg7[%c48_159, %c4_160] : memref<256x36xbf16, #tpu.memory_space<vmem>>, vector<16x4xbf16>
    tpu.vector_store %arg7[%c48_159, %c4_160], %85 {strides = array<i32>} : memref<256x36xbf16, #tpu.memory_space<vmem>>, vector<16x4xbf16>,
    %c0_161 = arith.constant 0 : index
    %c3_162 = arith.constant 3 : index
    %c2_163 = arith.constant 2 : index
    %c0_164 = arith.constant 0 : index
    %87 = vector.load %arg3[%c0_161, %c3_162, %c2_163, %c0_164] : memref<1x18x18x4xbf16, #tpu.memory_space<vmem>>, vector<1x1x16x4xbf16>
    %88 = vector.shape_cast %87 : vector<1x1x16x4xbf16> to vector<16x4xbf16>
    %c48_165 = arith.constant 48 : index
    %c8_166 = arith.constant 8 : index
    %89 = vector.load %arg7[%c48_165, %c8_166] : memref<256x36xbf16, #tpu.memory_space<vmem>>, vector<16x4xbf16>
    tpu.vector_store %arg7[%c48_165, %c8_166], %88 {strides = array<i32>} : memref<256x36xbf16, #tpu.memory_space<vmem>>, vector<16x4xbf16>,
    %c0_167 = arith.constant 0 : index
    %c4_168 = arith.constant 4 : index
    %c0_169 = arith.constant 0 : index
    %c0_170 = arith.constant 0 : index
    %90 = vector.load %arg3[%c0_167, %c4_168, %c0_169, %c0_170] : memref<1x18x18x4xbf16, #tpu.memory_space<vmem>>, vector<1x1x16x4xbf16>
    %91 = vector.shape_cast %90 : vector<1x1x16x4xbf16> to vector<16x4xbf16>
    %c48_171 = arith.constant 48 : index
    %c12_172 = arith.constant 12 : index
    %92 = vector.load %arg7[%c48_171, %c12_172] : memref<256x36xbf16, #tpu.memory_space<vmem>>, vector<16x4xbf16>
    tpu.vector_store %arg7[%c48_171, %c12_172], %91 {strides = array<i32>} : memref<256x36xbf16, #tpu.memory_space<vmem>>, vector<16x4xbf16>,
    %c0_173 = arith.constant 0 : index
    %c4_174 = arith.constant 4 : index
    %c1_175 = arith.constant 1 : index
    %c0_176 = arith.constant 0 : index
    %93 = vector.load %arg3[%c0_173, %c4_174, %c1_175, %c0_176] : memref<1x18x18x4xbf16, #tpu.memory_space<vmem>>, vector<1x1x16x4xbf16>
    %94 = vector.shape_cast %93 : vector<1x1x16x4xbf16> to vector<16x4xbf16>
    %c48_177 = arith.constant 48 : index
    %c16_178 = arith.constant 16 : index
    %95 = vector.load %arg7[%c48_177, %c16_178] : memref<256x36xbf16, #tpu.memory_space<vmem>>, vector<16x4xbf16>
    tpu.vector_store %arg7[%c48_177, %c16_178], %94 {strides = array<i32>} : memref<256x36xbf16, #tpu.memory_space<vmem>>, vector<16x4xbf16>,
    %c0_179 = arith.constant 0 : index
    %c4_180 = arith.constant 4 : index
    %c2_181 = arith.constant 2 : index
    %c0_182 = arith.constant 0 : index
    %96 = vector.load %arg3[%c0_179, %c4_180, %c2_181, %c0_182] : memref<1x18x18x4xbf16, #tpu.memory_space<vmem>>, vector<1x1x16x4xbf16>
    %97 = vector.shape_cast %96 : vector<1x1x16x4xbf16> to vector<16x4xbf16>
    %c48_183 = arith.constant 48 : index
    %c20_184 = arith.constant 20 : index
    %98 = vector.load %arg7[%c48_183, %c20_184] : memref<256x36xbf16, #tpu.memory_space<vmem>>, vector<16x4xbf16>
    tpu.vector_store %arg7[%c48_183, %c20_184], %97 {strides = array<i32>} : memref<256x36xbf16, #tpu.memory_space<vmem>>, vector<16x4xbf16>,
    %c0_185 = arith.constant 0 : index
    %c5 = arith.constant 5 : index
    %c0_186 = arith.constant 0 : index
    %c0_187 = arith.constant 0 : index
    %99 = vector.load %arg3[%c0_185, %c5, %c0_186, %c0_187] : memref<1x18x18x4xbf16, #tpu.memory_space<vmem>>, vector<1x1x16x4xbf16>
    %100 = vector.shape_cast %99 : vector<1x1x16x4xbf16> to vector<16x4xbf16>
    %c48_188 = arith.constant 48 : index
    %c24_189 = arith.constant 24 : index
    %101 = vector.load %arg7[%c48_188, %c24_189] : memref<256x36xbf16, #tpu.memory_space<vmem>>, vector<16x4xbf16>
    tpu.vector_store %arg7[%c48_188, %c24_189], %100 {strides = array<i32>} : memref<256x36xbf16, #tpu.memory_space<vmem>>, vector<16x4xbf16>,
    %c0_190 = arith.constant 0 : index
    %c5_191 = arith.constant 5 : index
    %c1_192 = arith.constant 1 : index
    %c0_193 = arith.constant 0 : index
    %102 = vector.load %arg3[%c0_190, %c5_191, %c1_192, %c0_193] : memref<1x18x18x4xbf16, #tpu.memory_space<vmem>>, vector<1x1x16x4xbf16>
    %103 = vector.shape_cast %102 : vector<1x1x16x4xbf16> to vector<16x4xbf16>
    %c48_194 = arith.constant 48 : index
    %c28_195 = arith.constant 28 : index
    %104 = vector.load %arg7[%c48_194, %c28_195] : memref<256x36xbf16, #tpu.memory_space<vmem>>, vector<16x4xbf16>
    tpu.vector_store %arg7[%c48_194, %c28_195], %103 {strides = array<i32>} : memref<256x36xbf16, #tpu.memory_space<vmem>>, vector<16x4xbf16>,
    %c0_196 = arith.constant 0 : index
    %c5_197 = arith.constant 5 : index
    %c2_198 = arith.constant 2 : index
    %c0_199 = arith.constant 0 : index
    %105 = vector.load %arg3[%c0_196, %c5_197, %c2_198, %c0_199] : memref<1x18x18x4xbf16, #tpu.memory_space<vmem>>, vector<1x1x16x4xbf16>
    %106 = vector.shape_cast %105 : vector<1x1x16x4xbf16> to vector<16x4xbf16>
    %c48_200 = arith.constant 48 : index
    %c32_201 = arith.constant 32 : index
    %107 = vector.load %arg7[%c48_200, %c32_201] : memref<256x36xbf16, #tpu.memory_space<vmem>>, vector<16x4xbf16>
    tpu.vector_store %arg7[%c48_200, %c32_201], %106 {strides = array<i32>} : memref<256x36xbf16, #tpu.memory_space<vmem>>, vector<16x4xbf16>,
    %c0_202 = arith.constant 0 : index
    %c4_203 = arith.constant 4 : index
    %c0_204 = arith.constant 0 : index
    %c0_205 = arith.constant 0 : index
    %108 = vector.load %arg3[%c0_202, %c4_203, %c0_204, %c0_205] : memref<1x18x18x4xbf16, #tpu.memory_space<vmem>>, vector<1x1x16x4xbf16>
    %109 = vector.shape_cast %108 : vector<1x1x16x4xbf16> to vector<16x4xbf16>
    %c64 = arith.constant 64 : index
    %c0_206 = arith.constant 0 : index
    %110 = vector.load %arg7[%c64, %c0_206] : memref<256x36xbf16, #tpu.memory_space<vmem>>, vector<16x4xbf16>
    tpu.vector_store %arg7[%c64, %c0_206], %109 {strides = array<i32>} : memref<256x36xbf16, #tpu.memory_space<vmem>>, vector<16x4xbf16>,
    %c0_207 = arith.constant 0 : index
    %c4_208 = arith.constant 4 : index
    %c1_209 = arith.constant 1 : index
    %c0_210 = arith.constant 0 : index
    %111 = vector.load %arg3[%c0_207, %c4_208, %c1_209, %c0_210] : memref<1x18x18x4xbf16, #tpu.memory_space<vmem>>, vector<1x1x16x4xbf16>
    %112 = vector.shape_cast %111 : vector<1x1x16x4xbf16> to vector<16x4xbf16>
    %c64_211 = arith.constant 64 : index
    %c4_212 = arith.constant 4 : index
    %113 = vector.load %arg7[%c64_211, %c4_212] : memref<256x36xbf16, #tpu.memory_space<vmem>>, vector<16x4xbf16>
    tpu.vector_store %arg7[%c64_211, %c4_212], %112 {strides = array<i32>} : memref<256x36xbf16, #tpu.memory_space<vmem>>, vector<16x4xbf16>,
    %c0_213 = arith.constant 0 : index
    %c4_214 = arith.constant 4 : index
    %c2_215 = arith.constant 2 : index
    %c0_216 = arith.constant 0 : index
    %114 = vector.load %arg3[%c0_213, %c4_214, %c2_215, %c0_216] : memref<1x18x18x4xbf16, #tpu.memory_space<vmem>>, vector<1x1x16x4xbf16>
    %115 = vector.shape_cast %114 : vector<1x1x16x4xbf16> to vector<16x4xbf16>
    %c64_217 = arith.constant 64 : index
    %c8_218 = arith.constant 8 : index
    %116 = vector.load %arg7[%c64_217, %c8_218] : memref<256x36xbf16, #tpu.memory_space<vmem>>, vector<16x4xbf16>
    tpu.vector_store %arg7[%c64_217, %c8_218], %115 {strides = array<i32>} : memref<256x36xbf16, #tpu.memory_space<vmem>>, vector<16x4xbf16>,
    %c0_219 = arith.constant 0 : index
    %c5_220 = arith.constant 5 : index
    %c0_221 = arith.constant 0 : index
    %c0_222 = arith.constant 0 : index
    %117 = vector.load %arg3[%c0_219, %c5_220, %c0_221, %c0_222] : memref<1x18x18x4xbf16, #tpu.memory_space<vmem>>, vector<1x1x16x4xbf16>
    %118 = vector.shape_cast %117 : vector<1x1x16x4xbf16> to vector<16x4xbf16>
    %c64_223 = arith.constant 64 : index
    %c12_224 = arith.constant 12 : index
    %119 = vector.load %arg7[%c64_223, %c12_224] : memref<256x36xbf16, #tpu.memory_space<vmem>>, vector<16x4xbf16>
    tpu.vector_store %arg7[%c64_223, %c12_224], %118 {strides = array<i32>} : memref<256x36xbf16, #tpu.memory_space<vmem>>, vector<16x4xbf16>,
    %c0_225 = arith.constant 0 : index
    %c5_226 = arith.constant 5 : index
    %c1_227 = arith.constant 1 : index
    %c0_228 = arith.constant 0 : index
    %120 = vector.load %arg3[%c0_225, %c5_226, %c1_227, %c0_228] : memref<1x18x18x4xbf16, #tpu.memory_space<vmem>>, vector<1x1x16x4xbf16>
    %121 = vector.shape_cast %120 : vector<1x1x16x4xbf16> to vector<16x4xbf16>
    %c64_229 = arith.constant 64 : index
    %c16_230 = arith.constant 16 : index
    %122 = vector.load %arg7[%c64_229, %c16_230] : memref<256x36xbf16, #tpu.memory_space<vmem>>, vector<16x4xbf16>
    tpu.vector_store %arg7[%c64_229, %c16_230], %121 {strides = array<i32>} : memref<256x36xbf16, #tpu.memory_space<vmem>>, vector<16x4xbf16>,
    %c0_231 = arith.constant 0 : index
    %c5_232 = arith.constant 5 : index
    %c2_233 = arith.constant 2 : index
    %c0_234 = arith.constant 0 : index
    %123 = vector.load %arg3[%c0_231, %c5_232, %c2_233, %c0_234] : memref<1x18x18x4xbf16, #tpu.memory_space<vmem>>, vector<1x1x16x4xbf16>
    %124 = vector.shape_cast %123 : vector<1x1x16x4xbf16> to vector<16x4xbf16>
    %c64_235 = arith.constant 64 : index
    %c20_236 = arith.constant 20 : index
    %125 = vector.load %arg7[%c64_235, %c20_236] : memref<256x36xbf16, #tpu.memory_space<vmem>>, vector<16x4xbf16>
    tpu.vector_store %arg7[%c64_235, %c20_236], %124 {strides = array<i32>} : memref<256x36xbf16, #tpu.memory_space<vmem>>, vector<16x4xbf16>,
    %c0_237 = arith.constant 0 : index
    %c6 = arith.constant 6 : index
    %c0_238 = arith.constant 0 : index
    %c0_239 = arith.constant 0 : index
    %126 = vector.load %arg3[%c0_237, %c6, %c0_238, %c0_239] : memref<1x18x18x4xbf16, #tpu.memory_space<vmem>>, vector<1x1x16x4xbf16>
    %127 = vector.shape_cast %126 : vector<1x1x16x4xbf16> to vector<16x4xbf16>
    %c64_240 = arith.constant 64 : index
    %c24_241 = arith.constant 24 : index
    %128 = vector.load %arg7[%c64_240, %c24_241] : memref<256x36xbf16, #tpu.memory_space<vmem>>, vector<16x4xbf16>
    tpu.vector_store %arg7[%c64_240, %c24_241], %127 {strides = array<i32>} : memref<256x36xbf16, #tpu.memory_space<vmem>>, vector<16x4xbf16>,
    %c0_242 = arith.constant 0 : index
    %c6_243 = arith.constant 6 : index
    %c1_244 = arith.constant 1 : index
    %c0_245 = arith.constant 0 : index
    %129 = vector.load %arg3[%c0_242, %c6_243, %c1_244, %c0_245] : memref<1x18x18x4xbf16, #tpu.memory_space<vmem>>, vector<1x1x16x4xbf16>
    %130 = vector.shape_cast %129 : vector<1x1x16x4xbf16> to vector<16x4xbf16>
    %c64_246 = arith.constant 64 : index
    %c28_247 = arith.constant 28 : index
    %131 = vector.load %arg7[%c64_246, %c28_247] : memref<256x36xbf16, #tpu.memory_space<vmem>>, vector<16x4xbf16>
    tpu.vector_store %arg7[%c64_246, %c28_247], %130 {strides = array<i32>} : memref<256x36xbf16, #tpu.memory_space<vmem>>, vector<16x4xbf16>,
    %c0_248 = arith.constant 0 : index
    %c6_249 = arith.constant 6 : index
    %c2_250 = arith.constant 2 : index
    %c0_251 = arith.constant 0 : index
    %132 = vector.load %arg3[%c0_248, %c6_249, %c2_250, %c0_251] : memref<1x18x18x4xbf16, #tpu.memory_space<vmem>>, vector<1x1x16x4xbf16>
    %133 = vector.shape_cast %132 : vector<1x1x16x4xbf16> to vector<16x4xbf16>
    %c64_252 = arith.constant 64 : index
    %c32_253 = arith.constant 32 : index
    %134 = vector.load %arg7[%c64_252, %c32_253] : memref<256x36xbf16, #tpu.memory_space<vmem>>, vector<16x4xbf16>
    tpu.vector_store %arg7[%c64_252, %c32_253], %133 {strides = array<i32>} : memref<256x36xbf16, #tpu.memory_space<vmem>>, vector<16x4xbf16>,
    %c0_254 = arith.constant 0 : index
    %c5_255 = arith.constant 5 : index
    %c0_256 = arith.constant 0 : index
    %c0_257 = arith.constant 0 : index
    %135 = vector.load %arg3[%c0_254, %c5_255, %c0_256, %c0_257] : memref<1x18x18x4xbf16, #tpu.memory_space<vmem>>, vector<1x1x16x4xbf16>
    %136 = vector.shape_cast %135 : vector<1x1x16x4xbf16> to vector<16x4xbf16>
    %c80 = arith.constant 80 : index
    %c0_258 = arith.constant 0 : index
    %137 = vector.load %arg7[%c80, %c0_258] : memref<256x36xbf16, #tpu.memory_space<vmem>>, vector<16x4xbf16>
    tpu.vector_store %arg7[%c80, %c0_258], %136 {strides = array<i32>} : memref<256x36xbf16, #tpu.memory_space<vmem>>, vector<16x4xbf16>,
    %c0_259 = arith.constant 0 : index
    %c5_260 = arith.constant 5 : index
    %c1_261 = arith.constant 1 : index
    %c0_262 = arith.constant 0 : index
    %138 = vector.load %arg3[%c0_259, %c5_260, %c1_261, %c0_262] : memref<1x18x18x4xbf16, #tpu.memory_space<vmem>>, vector<1x1x16x4xbf16>
    %139 = vector.shape_cast %138 : vector<1x1x16x4xbf16> to vector<16x4xbf16>
    %c80_263 = arith.constant 80 : index
    %c4_264 = arith.constant 4 : index
    %140 = vector.load %arg7[%c80_263, %c4_264] : memref<256x36xbf16, #tpu.memory_space<vmem>>, vector<16x4xbf16>
    tpu.vector_store %arg7[%c80_263, %c4_264], %139 {strides = array<i32>} : memref<256x36xbf16, #tpu.memory_space<vmem>>, vector<16x4xbf16>,
    %c0_265 = arith.constant 0 : index
    %c5_266 = arith.constant 5 : index
    %c2_267 = arith.constant 2 : index
    %c0_268 = arith.constant 0 : index
    %141 = vector.load %arg3[%c0_265, %c5_266, %c2_267, %c0_268] : memref<1x18x18x4xbf16, #tpu.memory_space<vmem>>, vector<1x1x16x4xbf16>
    %142 = vector.shape_cast %141 : vector<1x1x16x4xbf16> to vector<16x4xbf16>
    %c80_269 = arith.constant 80 : index
    %c8_270 = arith.constant 8 : index
    %143 = vector.load %arg7[%c80_269, %c8_270] : memref<256x36xbf16, #tpu.memory_space<vmem>>, vector<16x4xbf16>
    tpu.vector_store %arg7[%c80_269, %c8_270], %142 {strides = array<i32>} : memref<256x36xbf16, #tpu.memory_space<vmem>>, vector<16x4xbf16>,
    %c0_271 = arith.constant 0 : index
    %c6_272 = arith.constant 6 : index
    %c0_273 = arith.constant 0 : index
    %c0_274 = arith.constant 0 : index
    %144 = vector.load %arg3[%c0_271, %c6_272, %c0_273, %c0_274] : memref<1x18x18x4xbf16, #tpu.memory_space<vmem>>, vector<1x1x16x4xbf16>
    %145 = vector.shape_cast %144 : vector<1x1x16x4xbf16> to vector<16x4xbf16>
    %c80_275 = arith.constant 80 : index
    %c12_276 = arith.constant 12 : index
    %146 = vector.load %arg7[%c80_275, %c12_276] : memref<256x36xbf16, #tpu.memory_space<vmem>>, vector<16x4xbf16>
    tpu.vector_store %arg7[%c80_275, %c12_276], %145 {strides = array<i32>} : memref<256x36xbf16, #tpu.memory_space<vmem>>, vector<16x4xbf16>,
    %c0_277 = arith.constant 0 : index
    %c6_278 = arith.constant 6 : index
    %c1_279 = arith.constant 1 : index
    %c0_280 = arith.constant 0 : index
    %147 = vector.load %arg3[%c0_277, %c6_278, %c1_279, %c0_280] : memref<1x18x18x4xbf16, #tpu.memory_space<vmem>>, vector<1x1x16x4xbf16>
    %148 = vector.shape_cast %147 : vector<1x1x16x4xbf16> to vector<16x4xbf16>
    %c80_281 = arith.constant 80 : index
    %c16_282 = arith.constant 16 : index
    %149 = vector.load %arg7[%c80_281, %c16_282] : memref<256x36xbf16, #tpu.memory_space<vmem>>, vector<16x4xbf16>
    tpu.vector_store %arg7[%c80_281, %c16_282], %148 {strides = array<i32>} : memref<256x36xbf16, #tpu.memory_space<vmem>>, vector<16x4xbf16>,
    %c0_283 = arith.constant 0 : index
    %c6_284 = arith.constant 6 : index
    %c2_285 = arith.constant 2 : index
    %c0_286 = arith.constant 0 : index
    %150 = vector.load %arg3[%c0_283, %c6_284, %c2_285, %c0_286] : memref<1x18x18x4xbf16, #tpu.memory_space<vmem>>, vector<1x1x16x4xbf16>
    %151 = vector.shape_cast %150 : vector<1x1x16x4xbf16> to vector<16x4xbf16>
    %c80_287 = arith.constant 80 : index
    %c20_288 = arith.constant 20 : index
    %152 = vector.load %arg7[%c80_287, %c20_288] : memref<256x36xbf16, #tpu.memory_space<vmem>>, vector<16x4xbf16>
    tpu.vector_store %arg7[%c80_287, %c20_288], %151 {strides = array<i32>} : memref<256x36xbf16, #tpu.memory_space<vmem>>, vector<16x4xbf16>,
    %c0_289 = arith.constant 0 : index
    %c7 = arith.constant 7 : index
    %c0_290 = arith.constant 0 : index
    %c0_291 = arith.constant 0 : index
    %153 = vector.load %arg3[%c0_289, %c7, %c0_290, %c0_291] : memref<1x18x18x4xbf16, #tpu.memory_space<vmem>>, vector<1x1x16x4xbf16>
    %154 = vector.shape_cast %153 : vector<1x1x16x4xbf16> to vector<16x4xbf16>
    %c80_292 = arith.constant 80 : index
    %c24_293 = arith.constant 24 : index
    %155 = vector.load %arg7[%c80_292, %c24_293] : memref<256x36xbf16, #tpu.memory_space<vmem>>, vector<16x4xbf16>
    tpu.vector_store %arg7[%c80_292, %c24_293], %154 {strides = array<i32>} : memref<256x36xbf16, #tpu.memory_space<vmem>>, vector<16x4xbf16>,
    %c0_294 = arith.constant 0 : index
    %c7_295 = arith.constant 7 : index
    %c1_296 = arith.constant 1 : index
    %c0_297 = arith.constant 0 : index
    %156 = vector.load %arg3[%c0_294, %c7_295, %c1_296, %c0_297] : memref<1x18x18x4xbf16, #tpu.memory_space<vmem>>, vector<1x1x16x4xbf16>
    %157 = vector.shape_cast %156 : vector<1x1x16x4xbf16> to vector<16x4xbf16>
    %c80_298 = arith.constant 80 : index
    %c28_299 = arith.constant 28 : index
    %158 = vector.load %arg7[%c80_298, %c28_299] : memref<256x36xbf16, #tpu.memory_space<vmem>>, vector<16x4xbf16>
    tpu.vector_store %arg7[%c80_298, %c28_299], %157 {strides = array<i32>} : memref<256x36xbf16, #tpu.memory_space<vmem>>, vector<16x4xbf16>,
    %c0_300 = arith.constant 0 : index
    %c7_301 = arith.constant 7 : index
    %c2_302 = arith.constant 2 : index
    %c0_303 = arith.constant 0 : index
    %159 = vector.load %arg3[%c0_300, %c7_301, %c2_302, %c0_303] : memref<1x18x18x4xbf16, #tpu.memory_space<vmem>>, vector<1x1x16x4xbf16>
    %160 = vector.shape_cast %159 : vector<1x1x16x4xbf16> to vector<16x4xbf16>
    %c80_304 = arith.constant 80 : index
    %c32_305 = arith.constant 32 : index
    %161 = vector.load %arg7[%c80_304, %c32_305] : memref<256x36xbf16, #tpu.memory_space<vmem>>, vector<16x4xbf16>
    tpu.vector_store %arg7[%c80_304, %c32_305], %160 {strides = array<i32>} : memref<256x36xbf16, #tpu.memory_space<vmem>>, vector<16x4xbf16>,
    %c0_306 = arith.constant 0 : index
    %c6_307 = arith.constant 6 : index
    %c0_308 = arith.constant 0 : index
    %c0_309 = arith.constant 0 : index
    %162 = vector.load %arg3[%c0_306, %c6_307, %c0_308, %c0_309] : memref<1x18x18x4xbf16, #tpu.memory_space<vmem>>, vector<1x1x16x4xbf16>
    %163 = vector.shape_cast %162 : vector<1x1x16x4xbf16> to vector<16x4xbf16>
    %c96 = arith.constant 96 : index
    %c0_310 = arith.constant 0 : index
    %164 = vector.load %arg7[%c96, %c0_310] : memref<256x36xbf16, #tpu.memory_space<vmem>>, vector<16x4xbf16>
    tpu.vector_store %arg7[%c96, %c0_310], %163 {strides = array<i32>} : memref<256x36xbf16, #tpu.memory_space<vmem>>, vector<16x4xbf16>,
    %c0_311 = arith.constant 0 : index
    %c6_312 = arith.constant 6 : index
    %c1_313 = arith.constant 1 : index
    %c0_314 = arith.constant 0 : index
    %165 = vector.load %arg3[%c0_311, %c6_312, %c1_313, %c0_314] : memref<1x18x18x4xbf16, #tpu.memory_space<vmem>>, vector<1x1x16x4xbf16>
    %166 = vector.shape_cast %165 : vector<1x1x16x4xbf16> to vector<16x4xbf16>
    %c96_315 = arith.constant 96 : index
    %c4_316 = arith.constant 4 : index
    %167 = vector.load %arg7[%c96_315, %c4_316] : memref<256x36xbf16, #tpu.memory_space<vmem>>, vector<16x4xbf16>
    tpu.vector_store %arg7[%c96_315, %c4_316], %166 {strides = array<i32>} : memref<256x36xbf16, #tpu.memory_space<vmem>>, vector<16x4xbf16>,
    %c0_317 = arith.constant 0 : index
    %c6_318 = arith.constant 6 : index
    %c2_319 = arith.constant 2 : index
    %c0_320 = arith.constant 0 : index
    %168 = vector.load %arg3[%c0_317, %c6_318, %c2_319, %c0_320] : memref<1x18x18x4xbf16, #tpu.memory_space<vmem>>, vector<1x1x16x4xbf16>
    %169 = vector.shape_cast %168 : vector<1x1x16x4xbf16> to vector<16x4xbf16>
    %c96_321 = arith.constant 96 : index
    %c8_322 = arith.constant 8 : index
    %170 = vector.load %arg7[%c96_321, %c8_322] : memref<256x36xbf16, #tpu.memory_space<vmem>>, vector<16x4xbf16>
    tpu.vector_store %arg7[%c96_321, %c8_322], %169 {strides = array<i32>} : memref<256x36xbf16, #tpu.memory_space<vmem>>, vector<16x4xbf16>,
    %c0_323 = arith.constant 0 : index
    %c7_324 = arith.constant 7 : index
    %c0_325 = arith.constant 0 : index
    %c0_326 = arith.constant 0 : index
    %171 = vector.load %arg3[%c0_323, %c7_324, %c0_325, %c0_326] : memref<1x18x18x4xbf16, #tpu.memory_space<vmem>>, vector<1x1x16x4xbf16>
    %172 = vector.shape_cast %171 : vector<1x1x16x4xbf16> to vector<16x4xbf16>
    %c96_327 = arith.constant 96 : index
    %c12_328 = arith.constant 12 : index
    %173 = vector.load %arg7[%c96_327, %c12_328] : memref<256x36xbf16, #tpu.memory_space<vmem>>, vector<16x4xbf16>
    tpu.vector_store %arg7[%c96_327, %c12_328], %172 {strides = array<i32>} : memref<256x36xbf16, #tpu.memory_space<vmem>>, vector<16x4xbf16>,
    %c0_329 = arith.constant 0 : index
    %c7_330 = arith.constant 7 : index
    %c1_331 = arith.constant 1 : index
    %c0_332 = arith.constant 0 : index
    %174 = vector.load %arg3[%c0_329, %c7_330, %c1_331, %c0_332] : memref<1x18x18x4xbf16, #tpu.memory_space<vmem>>, vector<1x1x16x4xbf16>
    %175 = vector.shape_cast %174 : vector<1x1x16x4xbf16> to vector<16x4xbf16>
    %c96_333 = arith.constant 96 : index
    %c16_334 = arith.constant 16 : index
    %176 = vector.load %arg7[%c96_333, %c16_334] : memref<256x36xbf16, #tpu.memory_space<vmem>>, vector<16x4xbf16>
    tpu.vector_store %arg7[%c96_333, %c16_334], %175 {strides = array<i32>} : memref<256x36xbf16, #tpu.memory_space<vmem>>, vector<16x4xbf16>,
    %c0_335 = arith.constant 0 : index
    %c7_336 = arith.constant 7 : index
    %c2_337 = arith.constant 2 : index
    %c0_338 = arith.constant 0 : index
    %177 = vector.load %arg3[%c0_335, %c7_336, %c2_337, %c0_338] : memref<1x18x18x4xbf16, #tpu.memory_space<vmem>>, vector<1x1x16x4xbf16>
    %178 = vector.shape_cast %177 : vector<1x1x16x4xbf16> to vector<16x4xbf16>
    %c96_339 = arith.constant 96 : index
    %c20_340 = arith.constant 20 : index
    %179 = vector.load %arg7[%c96_339, %c20_340] : memref<256x36xbf16, #tpu.memory_space<vmem>>, vector<16x4xbf16>
    tpu.vector_store %arg7[%c96_339, %c20_340], %178 {strides = array<i32>} : memref<256x36xbf16, #tpu.memory_space<vmem>>, vector<16x4xbf16>,
    %c0_341 = arith.constant 0 : index
    %c8_342 = arith.constant 8 : index
    %c0_343 = arith.constant 0 : index
    %c0_344 = arith.constant 0 : index
    %180 = vector.load %arg3[%c0_341, %c8_342, %c0_343, %c0_344] : memref<1x18x18x4xbf16, #tpu.memory_space<vmem>>, vector<1x1x16x4xbf16>
    %181 = vector.shape_cast %180 : vector<1x1x16x4xbf16> to vector<16x4xbf16>
    %c96_345 = arith.constant 96 : index
    %c24_346 = arith.constant 24 : index
    %182 = vector.load %arg7[%c96_345, %c24_346] : memref<256x36xbf16, #tpu.memory_space<vmem>>, vector<16x4xbf16>
    tpu.vector_store %arg7[%c96_345, %c24_346], %181 {strides = array<i32>} : memref<256x36xbf16, #tpu.memory_space<vmem>>, vector<16x4xbf16>,
    %c0_347 = arith.constant 0 : index
    %c8_348 = arith.constant 8 : index
    %c1_349 = arith.constant 1 : index
    %c0_350 = arith.constant 0 : index
    %183 = vector.load %arg3[%c0_347, %c8_348, %c1_349, %c0_350] : memref<1x18x18x4xbf16, #tpu.memory_space<vmem>>, vector<1x1x16x4xbf16>
    %184 = vector.shape_cast %183 : vector<1x1x16x4xbf16> to vector<16x4xbf16>
    %c96_351 = arith.constant 96 : index
    %c28_352 = arith.constant 28 : index
    %185 = vector.load %arg7[%c96_351, %c28_352] : memref<256x36xbf16, #tpu.memory_space<vmem>>, vector<16x4xbf16>
    tpu.vector_store %arg7[%c96_351, %c28_352], %184 {strides = array<i32>} : memref<256x36xbf16, #tpu.memory_space<vmem>>, vector<16x4xbf16>,
    %c0_353 = arith.constant 0 : index
    %c8_354 = arith.constant 8 : index
    %c2_355 = arith.constant 2 : index
    %c0_356 = arith.constant 0 : index
    %186 = vector.load %arg3[%c0_353, %c8_354, %c2_355, %c0_356] : memref<1x18x18x4xbf16, #tpu.memory_space<vmem>>, vector<1x1x16x4xbf16>
    %187 = vector.shape_cast %186 : vector<1x1x16x4xbf16> to vector<16x4xbf16>
    %c96_357 = arith.constant 96 : index
    %c32_358 = arith.constant 32 : index
    %188 = vector.load %arg7[%c96_357, %c32_358] : memref<256x36xbf16, #tpu.memory_space<vmem>>, vector<16x4xbf16>
    tpu.vector_store %arg7[%c96_357, %c32_358], %187 {strides = array<i32>} : memref<256x36xbf16, #tpu.memory_space<vmem>>, vector<16x4xbf16>,
    %c0_359 = arith.constant 0 : index
    %c7_360 = arith.constant 7 : index
    %c0_361 = arith.constant 0 : index
    %c0_362 = arith.constant 0 : index
    %189 = vector.load %arg3[%c0_359, %c7_360, %c0_361, %c0_362] : memref<1x18x18x4xbf16, #tpu.memory_space<vmem>>, vector<1x1x16x4xbf16>
    %190 = vector.shape_cast %189 : vector<1x1x16x4xbf16> to vector<16x4xbf16>
    %c112 = arith.constant 112 : index
    %c0_363 = arith.constant 0 : index
    %191 = vector.load %arg7[%c112, %c0_363] : memref<256x36xbf16, #tpu.memory_space<vmem>>, vector<16x4xbf16>
    tpu.vector_store %arg7[%c112, %c0_363], %190 {strides = array<i32>} : memref<256x36xbf16, #tpu.memory_space<vmem>>, vector<16x4xbf16>,
    %c0_364 = arith.constant 0 : index
    %c7_365 = arith.constant 7 : index
    %c1_366 = arith.constant 1 : index
    %c0_367 = arith.constant 0 : index
    %192 = vector.load %arg3[%c0_364, %c7_365, %c1_366, %c0_367] : memref<1x18x18x4xbf16, #tpu.memory_space<vmem>>, vector<1x1x16x4xbf16>
    %193 = vector.shape_cast %192 : vector<1x1x16x4xbf16> to vector<16x4xbf16>
    %c112_368 = arith.constant 112 : index
    %c4_369 = arith.constant 4 : index
    %194 = vector.load %arg7[%c112_368, %c4_369] : memref<256x36xbf16, #tpu.memory_space<vmem>>, vector<16x4xbf16>
    tpu.vector_store %arg7[%c112_368, %c4_369], %193 {strides = array<i32>} : memref<256x36xbf16, #tpu.memory_space<vmem>>, vector<16x4xbf16>,
    %c0_370 = arith.constant 0 : index
    %c7_371 = arith.constant 7 : index
    %c2_372 = arith.constant 2 : index
    %c0_373 = arith.constant 0 : index
    %195 = vector.load %arg3[%c0_370, %c7_371, %c2_372, %c0_373] : memref<1x18x18x4xbf16, #tpu.memory_space<vmem>>, vector<1x1x16x4xbf16>
    %196 = vector.shape_cast %195 : vector<1x1x16x4xbf16> to vector<16x4xbf16>
    %c112_374 = arith.constant 112 : index
    %c8_375 = arith.constant 8 : index
    %197 = vector.load %arg7[%c112_374, %c8_375] : memref<256x36xbf16, #tpu.memory_space<vmem>>, vector<16x4xbf16>
    tpu.vector_store %arg7[%c112_374, %c8_375], %196 {strides = array<i32>} : memref<256x36xbf16, #tpu.memory_space<vmem>>, vector<16x4xbf16>,
    %c0_376 = arith.constant 0 : index
    %c8_377 = arith.constant 8 : index
    %c0_378 = arith.constant 0 : index
    %c0_379 = arith.constant 0 : index
    %198 = vector.load %arg3[%c0_376, %c8_377, %c0_378, %c0_379] : memref<1x18x18x4xbf16, #tpu.memory_space<vmem>>, vector<1x1x16x4xbf16>
    %199 = vector.shape_cast %198 : vector<1x1x16x4xbf16> to vector<16x4xbf16>
    %c112_380 = arith.constant 112 : index
    %c12_381 = arith.constant 12 : index
    %200 = vector.load %arg7[%c112_380, %c12_381] : memref<256x36xbf16, #tpu.memory_space<vmem>>, vector<16x4xbf16>
    tpu.vector_store %arg7[%c112_380, %c12_381], %199 {strides = array<i32>} : memref<256x36xbf16, #tpu.memory_space<vmem>>, vector<16x4xbf16>,
    %c0_382 = arith.constant 0 : index
    %c8_383 = arith.constant 8 : index
    %c1_384 = arith.constant 1 : index
    %c0_385 = arith.constant 0 : index
    %201 = vector.load %arg3[%c0_382, %c8_383, %c1_384, %c0_385] : memref<1x18x18x4xbf16, #tpu.memory_space<vmem>>, vector<1x1x16x4xbf16>
    %202 = vector.shape_cast %201 : vector<1x1x16x4xbf16> to vector<16x4xbf16>
    %c112_386 = arith.constant 112 : index
    %c16_387 = arith.constant 16 : index
    %203 = vector.load %arg7[%c112_386, %c16_387] : memref<256x36xbf16, #tpu.memory_space<vmem>>, vector<16x4xbf16>
    tpu.vector_store %arg7[%c112_386, %c16_387], %202 {strides = array<i32>} : memref<256x36xbf16, #tpu.memory_space<vmem>>, vector<16x4xbf16>,
    %c0_388 = arith.constant 0 : index
    %c8_389 = arith.constant 8 : index
    %c2_390 = arith.constant 2 : index
    %c0_391 = arith.constant 0 : index
    %204 = vector.load %arg3[%c0_388, %c8_389, %c2_390, %c0_391] : memref<1x18x18x4xbf16, #tpu.memory_space<vmem>>, vector<1x1x16x4xbf16>
    %205 = vector.shape_cast %204 : vector<1x1x16x4xbf16> to vector<16x4xbf16>
    %c112_392 = arith.constant 112 : index
    %c20_393 = arith.constant 20 : index
    %206 = vector.load %arg7[%c112_392, %c20_393] : memref<256x36xbf16, #tpu.memory_space<vmem>>, vector<16x4xbf16>
    tpu.vector_store %arg7[%c112_392, %c20_393], %205 {strides = array<i32>} : memref<256x36xbf16, #tpu.memory_space<vmem>>, vector<16x4xbf16>,
    %c0_394 = arith.constant 0 : index
    %c9 = arith.constant 9 : index
    %c0_395 = arith.constant 0 : index
    %c0_396 = arith.constant 0 : index
    %207 = vector.load %arg3[%c0_394, %c9, %c0_395, %c0_396] : memref<1x18x18x4xbf16, #tpu.memory_space<vmem>>, vector<1x1x16x4xbf16>
    %208 = vector.shape_cast %207 : vector<1x1x16x4xbf16> to vector<16x4xbf16>
    %c112_397 = arith.constant 112 : index
    %c24_398 = arith.constant 24 : index
    %209 = vector.load %arg7[%c112_397, %c24_398] : memref<256x36xbf16, #tpu.memory_space<vmem>>, vector<16x4xbf16>
    tpu.vector_store %arg7[%c112_397, %c24_398], %208 {strides = array<i32>} : memref<256x36xbf16, #tpu.memory_space<vmem>>, vector<16x4xbf16>,
    %c0_399 = arith.constant 0 : index
    %c9_400 = arith.constant 9 : index
    %c1_401 = arith.constant 1 : index
    %c0_402 = arith.constant 0 : index
    %210 = vector.load %arg3[%c0_399, %c9_400, %c1_401, %c0_402] : memref<1x18x18x4xbf16, #tpu.memory_space<vmem>>, vector<1x1x16x4xbf16>
    %211 = vector.shape_cast %210 : vector<1x1x16x4xbf16> to vector<16x4xbf16>
    %c112_403 = arith.constant 112 : index
    %c28_404 = arith.constant 28 : index
    %212 = vector.load %arg7[%c112_403, %c28_404] : memref<256x36xbf16, #tpu.memory_space<vmem>>, vector<16x4xbf16>
    tpu.vector_store %arg7[%c112_403, %c28_404], %211 {strides = array<i32>} : memref<256x36xbf16, #tpu.memory_space<vmem>>, vector<16x4xbf16>,
    %c0_405 = arith.constant 0 : index
    %c9_406 = arith.constant 9 : index
    %c2_407 = arith.constant 2 : index
    %c0_408 = arith.constant 0 : index
    %213 = vector.load %arg3[%c0_405, %c9_406, %c2_407, %c0_408] : memref<1x18x18x4xbf16, #tpu.memory_space<vmem>>, vector<1x1x16x4xbf16>
    %214 = vector.shape_cast %213 : vector<1x1x16x4xbf16> to vector<16x4xbf16>
    %c112_409 = arith.constant 112 : index
    %c32_410 = arith.constant 32 : index
    %215 = vector.load %arg7[%c112_409, %c32_410] : memref<256x36xbf16, #tpu.memory_space<vmem>>, vector<16x4xbf16>
    tpu.vector_store %arg7[%c112_409, %c32_410], %214 {strides = array<i32>} : memref<256x36xbf16, #tpu.memory_space<vmem>>, vector<16x4xbf16>,
    %c0_411 = arith.constant 0 : index
    %c8_412 = arith.constant 8 : index
    %c0_413 = arith.constant 0 : index
    %c0_414 = arith.constant 0 : index
    %216 = vector.load %arg3[%c0_411, %c8_412, %c0_413, %c0_414] : memref<1x18x18x4xbf16, #tpu.memory_space<vmem>>, vector<1x1x16x4xbf16>
    %217 = vector.shape_cast %216 : vector<1x1x16x4xbf16> to vector<16x4xbf16>
    %c128 = arith.constant 128 : index
    %c0_415 = arith.constant 0 : index
    %218 = vector.load %arg7[%c128, %c0_415] : memref<256x36xbf16, #tpu.memory_space<vmem>>, vector<16x4xbf16>
    tpu.vector_store %arg7[%c128, %c0_415], %217 {strides = array<i32>} : memref<256x36xbf16, #tpu.memory_space<vmem>>, vector<16x4xbf16>,
    %c0_416 = arith.constant 0 : index
    %c8_417 = arith.constant 8 : index
    %c1_418 = arith.constant 1 : index
    %c0_419 = arith.constant 0 : index
    %219 = vector.load %arg3[%c0_416, %c8_417, %c1_418, %c0_419] : memref<1x18x18x4xbf16, #tpu.memory_space<vmem>>, vector<1x1x16x4xbf16>
    %220 = vector.shape_cast %219 : vector<1x1x16x4xbf16> to vector<16x4xbf16>
    %c128_420 = arith.constant 128 : index
    %c4_421 = arith.constant 4 : index
    %221 = vector.load %arg7[%c128_420, %c4_421] : memref<256x36xbf16, #tpu.memory_space<vmem>>, vector<16x4xbf16>
    tpu.vector_store %arg7[%c128_420, %c4_421], %220 {strides = array<i32>} : memref<256x36xbf16, #tpu.memory_space<vmem>>, vector<16x4xbf16>,
    %c0_422 = arith.constant 0 : index
    %c8_423 = arith.constant 8 : index
    %c2_424 = arith.constant 2 : index
    %c0_425 = arith.constant 0 : index
    %222 = vector.load %arg3[%c0_422, %c8_423, %c2_424, %c0_425] : memref<1x18x18x4xbf16, #tpu.memory_space<vmem>>, vector<1x1x16x4xbf16>
    %223 = vector.shape_cast %222 : vector<1x1x16x4xbf16> to vector<16x4xbf16>
    %c128_426 = arith.constant 128 : index
    %c8_427 = arith.constant 8 : index
    %224 = vector.load %arg7[%c128_426, %c8_427] : memref<256x36xbf16, #tpu.memory_space<vmem>>, vector<16x4xbf16>
    tpu.vector_store %arg7[%c128_426, %c8_427], %223 {strides = array<i32>} : memref<256x36xbf16, #tpu.memory_space<vmem>>, vector<16x4xbf16>,
    %c0_428 = arith.constant 0 : index
    %c9_429 = arith.constant 9 : index
    %c0_430 = arith.constant 0 : index
    %c0_431 = arith.constant 0 : index
    %225 = vector.load %arg3[%c0_428, %c9_429, %c0_430, %c0_431] : memref<1x18x18x4xbf16, #tpu.memory_space<vmem>>, vector<1x1x16x4xbf16>
    %226 = vector.shape_cast %225 : vector<1x1x16x4xbf16> to vector<16x4xbf16>
    %c128_432 = arith.constant 128 : index
    %c12_433 = arith.constant 12 : index
    %227 = vector.load %arg7[%c128_432, %c12_433] : memref<256x36xbf16, #tpu.memory_space<vmem>>, vector<16x4xbf16>
    tpu.vector_store %arg7[%c128_432, %c12_433], %226 {strides = array<i32>} : memref<256x36xbf16, #tpu.memory_space<vmem>>, vector<16x4xbf16>,
    %c0_434 = arith.constant 0 : index
    %c9_435 = arith.constant 9 : index
    %c1_436 = arith.constant 1 : index
    %c0_437 = arith.constant 0 : index
    %228 = vector.load %arg3[%c0_434, %c9_435, %c1_436, %c0_437] : memref<1x18x18x4xbf16, #tpu.memory_space<vmem>>, vector<1x1x16x4xbf16>
    %229 = vector.shape_cast %228 : vector<1x1x16x4xbf16> to vector<16x4xbf16>
    %c128_438 = arith.constant 128 : index
    %c16_439 = arith.constant 16 : index
    %230 = vector.load %arg7[%c128_438, %c16_439] : memref<256x36xbf16, #tpu.memory_space<vmem>>, vector<16x4xbf16>
    tpu.vector_store %arg7[%c128_438, %c16_439], %229 {strides = array<i32>} : memref<256x36xbf16, #tpu.memory_space<vmem>>, vector<16x4xbf16>,
    %c0_440 = arith.constant 0 : index
    %c9_441 = arith.constant 9 : index
    %c2_442 = arith.constant 2 : index
    %c0_443 = arith.constant 0 : index
    %231 = vector.load %arg3[%c0_440, %c9_441, %c2_442, %c0_443] : memref<1x18x18x4xbf16, #tpu.memory_space<vmem>>, vector<1x1x16x4xbf16>
    %232 = vector.shape_cast %231 : vector<1x1x16x4xbf16> to vector<16x4xbf16>
    %c128_444 = arith.constant 128 : index
    %c20_445 = arith.constant 20 : index
    %233 = vector.load %arg7[%c128_444, %c20_445] : memref<256x36xbf16, #tpu.memory_space<vmem>>, vector<16x4xbf16>
    tpu.vector_store %arg7[%c128_444, %c20_445], %232 {strides = array<i32>} : memref<256x36xbf16, #tpu.memory_space<vmem>>, vector<16x4xbf16>,
    %c0_446 = arith.constant 0 : index
    %c10 = arith.constant 10 : index
    %c0_447 = arith.constant 0 : index
    %c0_448 = arith.constant 0 : index
    %234 = vector.load %arg3[%c0_446, %c10, %c0_447, %c0_448] : memref<1x18x18x4xbf16, #tpu.memory_space<vmem>>, vector<1x1x16x4xbf16>
    %235 = vector.shape_cast %234 : vector<1x1x16x4xbf16> to vector<16x4xbf16>
    %c128_449 = arith.constant 128 : index
    %c24_450 = arith.constant 24 : index
    %236 = vector.load %arg7[%c128_449, %c24_450] : memref<256x36xbf16, #tpu.memory_space<vmem>>, vector<16x4xbf16>
    tpu.vector_store %arg7[%c128_449, %c24_450], %235 {strides = array<i32>} : memref<256x36xbf16, #tpu.memory_space<vmem>>, vector<16x4xbf16>,
    %c0_451 = arith.constant 0 : index
    %c10_452 = arith.constant 10 : index
    %c1_453 = arith.constant 1 : index
    %c0_454 = arith.constant 0 : index
    %237 = vector.load %arg3[%c0_451, %c10_452, %c1_453, %c0_454] : memref<1x18x18x4xbf16, #tpu.memory_space<vmem>>, vector<1x1x16x4xbf16>
    %238 = vector.shape_cast %237 : vector<1x1x16x4xbf16> to vector<16x4xbf16>
    %c128_455 = arith.constant 128 : index
    %c28_456 = arith.constant 28 : index
    %239 = vector.load %arg7[%c128_455, %c28_456] : memref<256x36xbf16, #tpu.memory_space<vmem>>, vector<16x4xbf16>
    tpu.vector_store %arg7[%c128_455, %c28_456], %238 {strides = array<i32>} : memref<256x36xbf16, #tpu.memory_space<vmem>>, vector<16x4xbf16>,
    %c0_457 = arith.constant 0 : index
    %c10_458 = arith.constant 10 : index
    %c2_459 = arith.constant 2 : index
    %c0_460 = arith.constant 0 : index
    %240 = vector.load %arg3[%c0_457, %c10_458, %c2_459, %c0_460] : memref<1x18x18x4xbf16, #tpu.memory_space<vmem>>, vector<1x1x16x4xbf16>
    %241 = vector.shape_cast %240 : vector<1x1x16x4xbf16> to vector<16x4xbf16>
    %c128_461 = arith.constant 128 : index
    %c32_462 = arith.constant 32 : index
    %242 = vector.load %arg7[%c128_461, %c32_462] : memref<256x36xbf16, #tpu.memory_space<vmem>>, vector<16x4xbf16>
    tpu.vector_store %arg7[%c128_461, %c32_462], %241 {strides = array<i32>} : memref<256x36xbf16, #tpu.memory_space<vmem>>, vector<16x4xbf16>,
    %c0_463 = arith.constant 0 : index
    %c9_464 = arith.constant 9 : index
    %c0_465 = arith.constant 0 : index
    %c0_466 = arith.constant 0 : index
    %243 = vector.load %arg3[%c0_463, %c9_464, %c0_465, %c0_466] : memref<1x18x18x4xbf16, #tpu.memory_space<vmem>>, vector<1x1x16x4xbf16>
    %244 = vector.shape_cast %243 : vector<1x1x16x4xbf16> to vector<16x4xbf16>
    %c144 = arith.constant 144 : index
    %c0_467 = arith.constant 0 : index
    %245 = vector.load %arg7[%c144, %c0_467] : memref<256x36xbf16, #tpu.memory_space<vmem>>, vector<16x4xbf16>
    tpu.vector_store %arg7[%c144, %c0_467], %244 {strides = array<i32>} : memref<256x36xbf16, #tpu.memory_space<vmem>>, vector<16x4xbf16>,
    %c0_468 = arith.constant 0 : index
    %c9_469 = arith.constant 9 : index
    %c1_470 = arith.constant 1 : index
    %c0_471 = arith.constant 0 : index
    %246 = vector.load %arg3[%c0_468, %c9_469, %c1_470, %c0_471] : memref<1x18x18x4xbf16, #tpu.memory_space<vmem>>, vector<1x1x16x4xbf16>
    %247 = vector.shape_cast %246 : vector<1x1x16x4xbf16> to vector<16x4xbf16>
    %c144_472 = arith.constant 144 : index
    %c4_473 = arith.constant 4 : index
    %248 = vector.load %arg7[%c144_472, %c4_473] : memref<256x36xbf16, #tpu.memory_space<vmem>>, vector<16x4xbf16>
    tpu.vector_store %arg7[%c144_472, %c4_473], %247 {strides = array<i32>} : memref<256x36xbf16, #tpu.memory_space<vmem>>, vector<16x4xbf16>,
    %c0_474 = arith.constant 0 : index
    %c9_475 = arith.constant 9 : index
    %c2_476 = arith.constant 2 : index
    %c0_477 = arith.constant 0 : index
    %249 = vector.load %arg3[%c0_474, %c9_475, %c2_476, %c0_477] : memref<1x18x18x4xbf16, #tpu.memory_space<vmem>>, vector<1x1x16x4xbf16>
    %250 = vector.shape_cast %249 : vector<1x1x16x4xbf16> to vector<16x4xbf16>
    %c144_478 = arith.constant 144 : index
    %c8_479 = arith.constant 8 : index
    %251 = vector.load %arg7[%c144_478, %c8_479] : memref<256x36xbf16, #tpu.memory_space<vmem>>, vector<16x4xbf16>
    tpu.vector_store %arg7[%c144_478, %c8_479], %250 {strides = array<i32>} : memref<256x36xbf16, #tpu.memory_space<vmem>>, vector<16x4xbf16>,
    %c0_480 = arith.constant 0 : index
    %c10_481 = arith.constant 10 : index
    %c0_482 = arith.constant 0 : index
    %c0_483 = arith.constant 0 : index
    %252 = vector.load %arg3[%c0_480, %c10_481, %c0_482, %c0_483] : memref<1x18x18x4xbf16, #tpu.memory_space<vmem>>, vector<1x1x16x4xbf16>
    %253 = vector.shape_cast %252 : vector<1x1x16x4xbf16> to vector<16x4xbf16>
    %c144_484 = arith.constant 144 : index
    %c12_485 = arith.constant 12 : index
    %254 = vector.load %arg7[%c144_484, %c12_485] : memref<256x36xbf16, #tpu.memory_space<vmem>>, vector<16x4xbf16>
    tpu.vector_store %arg7[%c144_484, %c12_485], %253 {strides = array<i32>} : memref<256x36xbf16, #tpu.memory_space<vmem>>, vector<16x4xbf16>,
    %c0_486 = arith.constant 0 : index
    %c10_487 = arith.constant 10 : index
    %c1_488 = arith.constant 1 : index
    %c0_489 = arith.constant 0 : index
    %255 = vector.load %arg3[%c0_486, %c10_487, %c1_488, %c0_489] : memref<1x18x18x4xbf16, #tpu.memory_space<vmem>>, vector<1x1x16x4xbf16>
    %256 = vector.shape_cast %255 : vector<1x1x16x4xbf16> to vector<16x4xbf16>
    %c144_490 = arith.constant 144 : index
    %c16_491 = arith.constant 16 : index
    %257 = vector.load %arg7[%c144_490, %c16_491] : memref<256x36xbf16, #tpu.memory_space<vmem>>, vector<16x4xbf16>
    tpu.vector_store %arg7[%c144_490, %c16_491], %256 {strides = array<i32>} : memref<256x36xbf16, #tpu.memory_space<vmem>>, vector<16x4xbf16>,
    %c0_492 = arith.constant 0 : index
    %c10_493 = arith.constant 10 : index
    %c2_494 = arith.constant 2 : index
    %c0_495 = arith.constant 0 : index
    %258 = vector.load %arg3[%c0_492, %c10_493, %c2_494, %c0_495] : memref<1x18x18x4xbf16, #tpu.memory_space<vmem>>, vector<1x1x16x4xbf16>
    %259 = vector.shape_cast %258 : vector<1x1x16x4xbf16> to vector<16x4xbf16>
    %c144_496 = arith.constant 144 : index
    %c20_497 = arith.constant 20 : index
    %260 = vector.load %arg7[%c144_496, %c20_497] : memref<256x36xbf16, #tpu.memory_space<vmem>>, vector<16x4xbf16>
    tpu.vector_store %arg7[%c144_496, %c20_497], %259 {strides = array<i32>} : memref<256x36xbf16, #tpu.memory_space<vmem>>, vector<16x4xbf16>,
    %c0_498 = arith.constant 0 : index
    %c11 = arith.constant 11 : index
    %c0_499 = arith.constant 0 : index
    %c0_500 = arith.constant 0 : index
    %261 = vector.load %arg3[%c0_498, %c11, %c0_499, %c0_500] : memref<1x18x18x4xbf16, #tpu.memory_space<vmem>>, vector<1x1x16x4xbf16>
    %262 = vector.shape_cast %261 : vector<1x1x16x4xbf16> to vector<16x4xbf16>
    %c144_501 = arith.constant 144 : index
    %c24_502 = arith.constant 24 : index
    %263 = vector.load %arg7[%c144_501, %c24_502] : memref<256x36xbf16, #tpu.memory_space<vmem>>, vector<16x4xbf16>
    tpu.vector_store %arg7[%c144_501, %c24_502], %262 {strides = array<i32>} : memref<256x36xbf16, #tpu.memory_space<vmem>>, vector<16x4xbf16>,
    %c0_503 = arith.constant 0 : index
    %c11_504 = arith.constant 11 : index
    %c1_505 = arith.constant 1 : index
    %c0_506 = arith.constant 0 : index
    %264 = vector.load %arg3[%c0_503, %c11_504, %c1_505, %c0_506] : memref<1x18x18x4xbf16, #tpu.memory_space<vmem>>, vector<1x1x16x4xbf16>
    %265 = vector.shape_cast %264 : vector<1x1x16x4xbf16> to vector<16x4xbf16>
    %c144_507 = arith.constant 144 : index
    %c28_508 = arith.constant 28 : index
    %266 = vector.load %arg7[%c144_507, %c28_508] : memref<256x36xbf16, #tpu.memory_space<vmem>>, vector<16x4xbf16>
    tpu.vector_store %arg7[%c144_507, %c28_508], %265 {strides = array<i32>} : memref<256x36xbf16, #tpu.memory_space<vmem>>, vector<16x4xbf16>,
    %c0_509 = arith.constant 0 : index
    %c11_510 = arith.constant 11 : index
    %c2_511 = arith.constant 2 : index
    %c0_512 = arith.constant 0 : index
    %267 = vector.load %arg3[%c0_509, %c11_510, %c2_511, %c0_512] : memref<1x18x18x4xbf16, #tpu.memory_space<vmem>>, vector<1x1x16x4xbf16>
    %268 = vector.shape_cast %267 : vector<1x1x16x4xbf16> to vector<16x4xbf16>
    %c144_513 = arith.constant 144 : index
    %c32_514 = arith.constant 32 : index
    %269 = vector.load %arg7[%c144_513, %c32_514] : memref<256x36xbf16, #tpu.memory_space<vmem>>, vector<16x4xbf16>
    tpu.vector_store %arg7[%c144_513, %c32_514], %268 {strides = array<i32>} : memref<256x36xbf16, #tpu.memory_space<vmem>>, vector<16x4xbf16>,
    %c0_515 = arith.constant 0 : index
    %c10_516 = arith.constant 10 : index
    %c0_517 = arith.constant 0 : index
    %c0_518 = arith.constant 0 : index
    %270 = vector.load %arg3[%c0_515, %c10_516, %c0_517, %c0_518] : memref<1x18x18x4xbf16, #tpu.memory_space<vmem>>, vector<1x1x16x4xbf16>
    %271 = vector.shape_cast %270 : vector<1x1x16x4xbf16> to vector<16x4xbf16>
    %c160 = arith.constant 160 : index
    %c0_519 = arith.constant 0 : index
    %272 = vector.load %arg7[%c160, %c0_519] : memref<256x36xbf16, #tpu.memory_space<vmem>>, vector<16x4xbf16>
    tpu.vector_store %arg7[%c160, %c0_519], %271 {strides = array<i32>} : memref<256x36xbf16, #tpu.memory_space<vmem>>, vector<16x4xbf16>,
    %c0_520 = arith.constant 0 : index
    %c10_521 = arith.constant 10 : index
    %c1_522 = arith.constant 1 : index
    %c0_523 = arith.constant 0 : index
    %273 = vector.load %arg3[%c0_520, %c10_521, %c1_522, %c0_523] : memref<1x18x18x4xbf16, #tpu.memory_space<vmem>>, vector<1x1x16x4xbf16>
    %274 = vector.shape_cast %273 : vector<1x1x16x4xbf16> to vector<16x4xbf16>
    %c160_524 = arith.constant 160 : index
    %c4_525 = arith.constant 4 : index
    %275 = vector.load %arg7[%c160_524, %c4_525] : memref<256x36xbf16, #tpu.memory_space<vmem>>, vector<16x4xbf16>
    tpu.vector_store %arg7[%c160_524, %c4_525], %274 {strides = array<i32>} : memref<256x36xbf16, #tpu.memory_space<vmem>>, vector<16x4xbf16>,
    %c0_526 = arith.constant 0 : index
    %c10_527 = arith.constant 10 : index
    %c2_528 = arith.constant 2 : index
    %c0_529 = arith.constant 0 : index
    %276 = vector.load %arg3[%c0_526, %c10_527, %c2_528, %c0_529] : memref<1x18x18x4xbf16, #tpu.memory_space<vmem>>, vector<1x1x16x4xbf16>
    %277 = vector.shape_cast %276 : vector<1x1x16x4xbf16> to vector<16x4xbf16>
    %c160_530 = arith.constant 160 : index
    %c8_531 = arith.constant 8 : index
    %278 = vector.load %arg7[%c160_530, %c8_531] : memref<256x36xbf16, #tpu.memory_space<vmem>>, vector<16x4xbf16>
    tpu.vector_store %arg7[%c160_530, %c8_531], %277 {strides = array<i32>} : memref<256x36xbf16, #tpu.memory_space<vmem>>, vector<16x4xbf16>,
    %c0_532 = arith.constant 0 : index
    %c11_533 = arith.constant 11 : index
    %c0_534 = arith.constant 0 : index
    %c0_535 = arith.constant 0 : index
    %279 = vector.load %arg3[%c0_532, %c11_533, %c0_534, %c0_535] : memref<1x18x18x4xbf16, #tpu.memory_space<vmem>>, vector<1x1x16x4xbf16>
    %280 = vector.shape_cast %279 : vector<1x1x16x4xbf16> to vector<16x4xbf16>
    %c160_536 = arith.constant 160 : index
    %c12_537 = arith.constant 12 : index
    %281 = vector.load %arg7[%c160_536, %c12_537] : memref<256x36xbf16, #tpu.memory_space<vmem>>, vector<16x4xbf16>
    tpu.vector_store %arg7[%c160_536, %c12_537], %280 {strides = array<i32>} : memref<256x36xbf16, #tpu.memory_space<vmem>>, vector<16x4xbf16>,
    %c0_538 = arith.constant 0 : index
    %c11_539 = arith.constant 11 : index
    %c1_540 = arith.constant 1 : index
    %c0_541 = arith.constant 0 : index
    %282 = vector.load %arg3[%c0_538, %c11_539, %c1_540, %c0_541] : memref<1x18x18x4xbf16, #tpu.memory_space<vmem>>, vector<1x1x16x4xbf16>
    %283 = vector.shape_cast %282 : vector<1x1x16x4xbf16> to vector<16x4xbf16>
    %c160_542 = arith.constant 160 : index
    %c16_543 = arith.constant 16 : index
    %284 = vector.load %arg7[%c160_542, %c16_543] : memref<256x36xbf16, #tpu.memory_space<vmem>>, vector<16x4xbf16>
    tpu.vector_store %arg7[%c160_542, %c16_543], %283 {strides = array<i32>} : memref<256x36xbf16, #tpu.memory_space<vmem>>, vector<16x4xbf16>,
    %c0_544 = arith.constant 0 : index
    %c11_545 = arith.constant 11 : index
    %c2_546 = arith.constant 2 : index
    %c0_547 = arith.constant 0 : index
    %285 = vector.load %arg3[%c0_544, %c11_545, %c2_546, %c0_547] : memref<1x18x18x4xbf16, #tpu.memory_space<vmem>>, vector<1x1x16x4xbf16>
    %286 = vector.shape_cast %285 : vector<1x1x16x4xbf16> to vector<16x4xbf16>
    %c160_548 = arith.constant 160 : index
    %c20_549 = arith.constant 20 : index
    %287 = vector.load %arg7[%c160_548, %c20_549] : memref<256x36xbf16, #tpu.memory_space<vmem>>, vector<16x4xbf16>
    tpu.vector_store %arg7[%c160_548, %c20_549], %286 {strides = array<i32>} : memref<256x36xbf16, #tpu.memory_space<vmem>>, vector<16x4xbf16>,
    %c0_550 = arith.constant 0 : index
    %c12_551 = arith.constant 12 : index
    %c0_552 = arith.constant 0 : index
    %c0_553 = arith.constant 0 : index
    %288 = vector.load %arg3[%c0_550, %c12_551, %c0_552, %c0_553] : memref<1x18x18x4xbf16, #tpu.memory_space<vmem>>, vector<1x1x16x4xbf16>
    %289 = vector.shape_cast %288 : vector<1x1x16x4xbf16> to vector<16x4xbf16>
    %c160_554 = arith.constant 160 : index
    %c24_555 = arith.constant 24 : index
    %290 = vector.load %arg7[%c160_554, %c24_555] : memref<256x36xbf16, #tpu.memory_space<vmem>>, vector<16x4xbf16>
    tpu.vector_store %arg7[%c160_554, %c24_555], %289 {strides = array<i32>} : memref<256x36xbf16, #tpu.memory_space<vmem>>, vector<16x4xbf16>,
    %c0_556 = arith.constant 0 : index
    %c12_557 = arith.constant 12 : index
    %c1_558 = arith.constant 1 : index
    %c0_559 = arith.constant 0 : index
    %291 = vector.load %arg3[%c0_556, %c12_557, %c1_558, %c0_559] : memref<1x18x18x4xbf16, #tpu.memory_space<vmem>>, vector<1x1x16x4xbf16>
    %292 = vector.shape_cast %291 : vector<1x1x16x4xbf16> to vector<16x4xbf16>
    %c160_560 = arith.constant 160 : index
    %c28_561 = arith.constant 28 : index
    %293 = vector.load %arg7[%c160_560, %c28_561] : memref<256x36xbf16, #tpu.memory_space<vmem>>, vector<16x4xbf16>
    tpu.vector_store %arg7[%c160_560, %c28_561], %292 {strides = array<i32>} : memref<256x36xbf16, #tpu.memory_space<vmem>>, vector<16x4xbf16>,
    %c0_562 = arith.constant 0 : index
    %c12_563 = arith.constant 12 : index
    %c2_564 = arith.constant 2 : index
    %c0_565 = arith.constant 0 : index
    %294 = vector.load %arg3[%c0_562, %c12_563, %c2_564, %c0_565] : memref<1x18x18x4xbf16, #tpu.memory_space<vmem>>, vector<1x1x16x4xbf16>
    %295 = vector.shape_cast %294 : vector<1x1x16x4xbf16> to vector<16x4xbf16>
    %c160_566 = arith.constant 160 : index
    %c32_567 = arith.constant 32 : index
    %296 = vector.load %arg7[%c160_566, %c32_567] : memref<256x36xbf16, #tpu.memory_space<vmem>>, vector<16x4xbf16>
    tpu.vector_store %arg7[%c160_566, %c32_567], %295 {strides = array<i32>} : memref<256x36xbf16, #tpu.memory_space<vmem>>, vector<16x4xbf16>,
    %c0_568 = arith.constant 0 : index
    %c11_569 = arith.constant 11 : index
    %c0_570 = arith.constant 0 : index
    %c0_571 = arith.constant 0 : index
    %297 = vector.load %arg3[%c0_568, %c11_569, %c0_570, %c0_571] : memref<1x18x18x4xbf16, #tpu.memory_space<vmem>>, vector<1x1x16x4xbf16>
    %298 = vector.shape_cast %297 : vector<1x1x16x4xbf16> to vector<16x4xbf16>
    %c176 = arith.constant 176 : index
    %c0_572 = arith.constant 0 : index
    %299 = vector.load %arg7[%c176, %c0_572] : memref<256x36xbf16, #tpu.memory_space<vmem>>, vector<16x4xbf16>
    tpu.vector_store %arg7[%c176, %c0_572], %298 {strides = array<i32>} : memref<256x36xbf16, #tpu.memory_space<vmem>>, vector<16x4xbf16>,
    %c0_573 = arith.constant 0 : index
    %c11_574 = arith.constant 11 : index
    %c1_575 = arith.constant 1 : index
    %c0_576 = arith.constant 0 : index
    %300 = vector.load %arg3[%c0_573, %c11_574, %c1_575, %c0_576] : memref<1x18x18x4xbf16, #tpu.memory_space<vmem>>, vector<1x1x16x4xbf16>
    %301 = vector.shape_cast %300 : vector<1x1x16x4xbf16> to vector<16x4xbf16>
    %c176_577 = arith.constant 176 : index
    %c4_578 = arith.constant 4 : index
    %302 = vector.load %arg7[%c176_577, %c4_578] : memref<256x36xbf16, #tpu.memory_space<vmem>>, vector<16x4xbf16>
    tpu.vector_store %arg7[%c176_577, %c4_578], %301 {strides = array<i32>} : memref<256x36xbf16, #tpu.memory_space<vmem>>, vector<16x4xbf16>,
    %c0_579 = arith.constant 0 : index
    %c11_580 = arith.constant 11 : index
    %c2_581 = arith.constant 2 : index
    %c0_582 = arith.constant 0 : index
    %303 = vector.load %arg3[%c0_579, %c11_580, %c2_581, %c0_582] : memref<1x18x18x4xbf16, #tpu.memory_space<vmem>>, vector<1x1x16x4xbf16>
    %304 = vector.shape_cast %303 : vector<1x1x16x4xbf16> to vector<16x4xbf16>
    %c176_583 = arith.constant 176 : index
    %c8_584 = arith.constant 8 : index
    %305 = vector.load %arg7[%c176_583, %c8_584] : memref<256x36xbf16, #tpu.memory_space<vmem>>, vector<16x4xbf16>
    tpu.vector_store %arg7[%c176_583, %c8_584], %304 {strides = array<i32>} : memref<256x36xbf16, #tpu.memory_space<vmem>>, vector<16x4xbf16>,
    %c0_585 = arith.constant 0 : index
    %c12_586 = arith.constant 12 : index
    %c0_587 = arith.constant 0 : index
    %c0_588 = arith.constant 0 : index
    %306 = vector.load %arg3[%c0_585, %c12_586, %c0_587, %c0_588] : memref<1x18x18x4xbf16, #tpu.memory_space<vmem>>, vector<1x1x16x4xbf16>
    %307 = vector.shape_cast %306 : vector<1x1x16x4xbf16> to vector<16x4xbf16>
    %c176_589 = arith.constant 176 : index
    %c12_590 = arith.constant 12 : index
    %308 = vector.load %arg7[%c176_589, %c12_590] : memref<256x36xbf16, #tpu.memory_space<vmem>>, vector<16x4xbf16>
    tpu.vector_store %arg7[%c176_589, %c12_590], %307 {strides = array<i32>} : memref<256x36xbf16, #tpu.memory_space<vmem>>, vector<16x4xbf16>,
    %c0_591 = arith.constant 0 : index
    %c12_592 = arith.constant 12 : index
    %c1_593 = arith.constant 1 : index
    %c0_594 = arith.constant 0 : index
    %309 = vector.load %arg3[%c0_591, %c12_592, %c1_593, %c0_594] : memref<1x18x18x4xbf16, #tpu.memory_space<vmem>>, vector<1x1x16x4xbf16>
    %310 = vector.shape_cast %309 : vector<1x1x16x4xbf16> to vector<16x4xbf16>
    %c176_595 = arith.constant 176 : index
    %c16_596 = arith.constant 16 : index
    %311 = vector.load %arg7[%c176_595, %c16_596] : memref<256x36xbf16, #tpu.memory_space<vmem>>, vector<16x4xbf16>
    tpu.vector_store %arg7[%c176_595, %c16_596], %310 {strides = array<i32>} : memref<256x36xbf16, #tpu.memory_space<vmem>>, vector<16x4xbf16>,
    %c0_597 = arith.constant 0 : index
    %c12_598 = arith.constant 12 : index
    %c2_599 = arith.constant 2 : index
    %c0_600 = arith.constant 0 : index
    %312 = vector.load %arg3[%c0_597, %c12_598, %c2_599, %c0_600] : memref<1x18x18x4xbf16, #tpu.memory_space<vmem>>, vector<1x1x16x4xbf16>
    %313 = vector.shape_cast %312 : vector<1x1x16x4xbf16> to vector<16x4xbf16>
    %c176_601 = arith.constant 176 : index
    %c20_602 = arith.constant 20 : index
    %314 = vector.load %arg7[%c176_601, %c20_602] : memref<256x36xbf16, #tpu.memory_space<vmem>>, vector<16x4xbf16>
    tpu.vector_store %arg7[%c176_601, %c20_602], %313 {strides = array<i32>} : memref<256x36xbf16, #tpu.memory_space<vmem>>, vector<16x4xbf16>,
    %c0_603 = arith.constant 0 : index
    %c13 = arith.constant 13 : index
    %c0_604 = arith.constant 0 : index
    %c0_605 = arith.constant 0 : index
    %315 = vector.load %arg3[%c0_603, %c13, %c0_604, %c0_605] : memref<1x18x18x4xbf16, #tpu.memory_space<vmem>>, vector<1x1x16x4xbf16>
    %316 = vector.shape_cast %315 : vector<1x1x16x4xbf16> to vector<16x4xbf16>
    %c176_606 = arith.constant 176 : index
    %c24_607 = arith.constant 24 : index
    %317 = vector.load %arg7[%c176_606, %c24_607] : memref<256x36xbf16, #tpu.memory_space<vmem>>, vector<16x4xbf16>
    tpu.vector_store %arg7[%c176_606, %c24_607], %316 {strides = array<i32>} : memref<256x36xbf16, #tpu.memory_space<vmem>>, vector<16x4xbf16>,
    %c0_608 = arith.constant 0 : index
    %c13_609 = arith.constant 13 : index
    %c1_610 = arith.constant 1 : index
    %c0_611 = arith.constant 0 : index
    %318 = vector.load %arg3[%c0_608, %c13_609, %c1_610, %c0_611] : memref<1x18x18x4xbf16, #tpu.memory_space<vmem>>, vector<1x1x16x4xbf16>
    %319 = vector.shape_cast %318 : vector<1x1x16x4xbf16> to vector<16x4xbf16>
    %c176_612 = arith.constant 176 : index
    %c28_613 = arith.constant 28 : index
    %320 = vector.load %arg7[%c176_612, %c28_613] : memref<256x36xbf16, #tpu.memory_space<vmem>>, vector<16x4xbf16>
    tpu.vector_store %arg7[%c176_612, %c28_613], %319 {strides = array<i32>} : memref<256x36xbf16, #tpu.memory_space<vmem>>, vector<16x4xbf16>,
    %c0_614 = arith.constant 0 : index
    %c13_615 = arith.constant 13 : index
    %c2_616 = arith.constant 2 : index
    %c0_617 = arith.constant 0 : index
    %321 = vector.load %arg3[%c0_614, %c13_615, %c2_616, %c0_617] : memref<1x18x18x4xbf16, #tpu.memory_space<vmem>>, vector<1x1x16x4xbf16>
    %322 = vector.shape_cast %321 : vector<1x1x16x4xbf16> to vector<16x4xbf16>
    %c176_618 = arith.constant 176 : index
    %c32_619 = arith.constant 32 : index
    %323 = vector.load %arg7[%c176_618, %c32_619] : memref<256x36xbf16, #tpu.memory_space<vmem>>, vector<16x4xbf16>
    tpu.vector_store %arg7[%c176_618, %c32_619], %322 {strides = array<i32>} : memref<256x36xbf16, #tpu.memory_space<vmem>>, vector<16x4xbf16>,
    %c0_620 = arith.constant 0 : index
    %c12_621 = arith.constant 12 : index
    %c0_622 = arith.constant 0 : index
    %c0_623 = arith.constant 0 : index
    %324 = vector.load %arg3[%c0_620, %c12_621, %c0_622, %c0_623] : memref<1x18x18x4xbf16, #tpu.memory_space<vmem>>, vector<1x1x16x4xbf16>
    %325 = vector.shape_cast %324 : vector<1x1x16x4xbf16> to vector<16x4xbf16>
    %c192 = arith.constant 192 : index
    %c0_624 = arith.constant 0 : index
    %326 = vector.load %arg7[%c192, %c0_624] : memref<256x36xbf16, #tpu.memory_space<vmem>>, vector<16x4xbf16>
    tpu.vector_store %arg7[%c192, %c0_624], %325 {strides = array<i32>} : memref<256x36xbf16, #tpu.memory_space<vmem>>, vector<16x4xbf16>,
    %c0_625 = arith.constant 0 : index
    %c12_626 = arith.constant 12 : index
    %c1_627 = arith.constant 1 : index
    %c0_628 = arith.constant 0 : index
    %327 = vector.load %arg3[%c0_625, %c12_626, %c1_627, %c0_628] : memref<1x18x18x4xbf16, #tpu.memory_space<vmem>>, vector<1x1x16x4xbf16>
    %328 = vector.shape_cast %327 : vector<1x1x16x4xbf16> to vector<16x4xbf16>
    %c192_629 = arith.constant 192 : index
    %c4_630 = arith.constant 4 : index
    %329 = vector.load %arg7[%c192_629, %c4_630] : memref<256x36xbf16, #tpu.memory_space<vmem>>, vector<16x4xbf16>
    tpu.vector_store %arg7[%c192_629, %c4_630], %328 {strides = array<i32>} : memref<256x36xbf16, #tpu.memory_space<vmem>>, vector<16x4xbf16>,
    %c0_631 = arith.constant 0 : index
    %c12_632 = arith.constant 12 : index
    %c2_633 = arith.constant 2 : index
    %c0_634 = arith.constant 0 : index
    %330 = vector.load %arg3[%c0_631, %c12_632, %c2_633, %c0_634] : memref<1x18x18x4xbf16, #tpu.memory_space<vmem>>, vector<1x1x16x4xbf16>
    %331 = vector.shape_cast %330 : vector<1x1x16x4xbf16> to vector<16x4xbf16>
    %c192_635 = arith.constant 192 : index
    %c8_636 = arith.constant 8 : index
    %332 = vector.load %arg7[%c192_635, %c8_636] : memref<256x36xbf16, #tpu.memory_space<vmem>>, vector<16x4xbf16>
    tpu.vector_store %arg7[%c192_635, %c8_636], %331 {strides = array<i32>} : memref<256x36xbf16, #tpu.memory_space<vmem>>, vector<16x4xbf16>,
    %c0_637 = arith.constant 0 : index
    %c13_638 = arith.constant 13 : index
    %c0_639 = arith.constant 0 : index
    %c0_640 = arith.constant 0 : index
    %333 = vector.load %arg3[%c0_637, %c13_638, %c0_639, %c0_640] : memref<1x18x18x4xbf16, #tpu.memory_space<vmem>>, vector<1x1x16x4xbf16>
    %334 = vector.shape_cast %333 : vector<1x1x16x4xbf16> to vector<16x4xbf16>
    %c192_641 = arith.constant 192 : index
    %c12_642 = arith.constant 12 : index
    %335 = vector.load %arg7[%c192_641, %c12_642] : memref<256x36xbf16, #tpu.memory_space<vmem>>, vector<16x4xbf16>
    tpu.vector_store %arg7[%c192_641, %c12_642], %334 {strides = array<i32>} : memref<256x36xbf16, #tpu.memory_space<vmem>>, vector<16x4xbf16>,
    %c0_643 = arith.constant 0 : index
    %c13_644 = arith.constant 13 : index
    %c1_645 = arith.constant 1 : index
    %c0_646 = arith.constant 0 : index
    %336 = vector.load %arg3[%c0_643, %c13_644, %c1_645, %c0_646] : memref<1x18x18x4xbf16, #tpu.memory_space<vmem>>, vector<1x1x16x4xbf16>
    %337 = vector.shape_cast %336 : vector<1x1x16x4xbf16> to vector<16x4xbf16>
    %c192_647 = arith.constant 192 : index
    %c16_648 = arith.constant 16 : index
    %338 = vector.load %arg7[%c192_647, %c16_648] : memref<256x36xbf16, #tpu.memory_space<vmem>>, vector<16x4xbf16>
    tpu.vector_store %arg7[%c192_647, %c16_648], %337 {strides = array<i32>} : memref<256x36xbf16, #tpu.memory_space<vmem>>, vector<16x4xbf16>,
    %c0_649 = arith.constant 0 : index
    %c13_650 = arith.constant 13 : index
    %c2_651 = arith.constant 2 : index
    %c0_652 = arith.constant 0 : index
    %339 = vector.load %arg3[%c0_649, %c13_650, %c2_651, %c0_652] : memref<1x18x18x4xbf16, #tpu.memory_space<vmem>>, vector<1x1x16x4xbf16>
    %340 = vector.shape_cast %339 : vector<1x1x16x4xbf16> to vector<16x4xbf16>
    %c192_653 = arith.constant 192 : index
    %c20_654 = arith.constant 20 : index
    %341 = vector.load %arg7[%c192_653, %c20_654] : memref<256x36xbf16, #tpu.memory_space<vmem>>, vector<16x4xbf16>
    tpu.vector_store %arg7[%c192_653, %c20_654], %340 {strides = array<i32>} : memref<256x36xbf16, #tpu.memory_space<vmem>>, vector<16x4xbf16>,
    %c0_655 = arith.constant 0 : index
    %c14 = arith.constant 14 : index
    %c0_656 = arith.constant 0 : index
    %c0_657 = arith.constant 0 : index
    %342 = vector.load %arg3[%c0_655, %c14, %c0_656, %c0_657] : memref<1x18x18x4xbf16, #tpu.memory_space<vmem>>, vector<1x1x16x4xbf16>
    %343 = vector.shape_cast %342 : vector<1x1x16x4xbf16> to vector<16x4xbf16>
    %c192_658 = arith.constant 192 : index
    %c24_659 = arith.constant 24 : index
    %344 = vector.load %arg7[%c192_658, %c24_659] : memref<256x36xbf16, #tpu.memory_space<vmem>>, vector<16x4xbf16>
    tpu.vector_store %arg7[%c192_658, %c24_659], %343 {strides = array<i32>} : memref<256x36xbf16, #tpu.memory_space<vmem>>, vector<16x4xbf16>,
    %c0_660 = arith.constant 0 : index
    %c14_661 = arith.constant 14 : index
    %c1_662 = arith.constant 1 : index
    %c0_663 = arith.constant 0 : index
    %345 = vector.load %arg3[%c0_660, %c14_661, %c1_662, %c0_663] : memref<1x18x18x4xbf16, #tpu.memory_space<vmem>>, vector<1x1x16x4xbf16>
    %346 = vector.shape_cast %345 : vector<1x1x16x4xbf16> to vector<16x4xbf16>
    %c192_664 = arith.constant 192 : index
    %c28_665 = arith.constant 28 : index
    %347 = vector.load %arg7[%c192_664, %c28_665] : memref<256x36xbf16, #tpu.memory_space<vmem>>, vector<16x4xbf16>
    tpu.vector_store %arg7[%c192_664, %c28_665], %346 {strides = array<i32>} : memref<256x36xbf16, #tpu.memory_space<vmem>>, vector<16x4xbf16>,
    %c0_666 = arith.constant 0 : index
    %c14_667 = arith.constant 14 : index
    %c2_668 = arith.constant 2 : index
    %c0_669 = arith.constant 0 : index
    %348 = vector.load %arg3[%c0_666, %c14_667, %c2_668, %c0_669] : memref<1x18x18x4xbf16, #tpu.memory_space<vmem>>, vector<1x1x16x4xbf16>
    %349 = vector.shape_cast %348 : vector<1x1x16x4xbf16> to vector<16x4xbf16>
    %c192_670 = arith.constant 192 : index
    %c32_671 = arith.constant 32 : index
    %350 = vector.load %arg7[%c192_670, %c32_671] : memref<256x36xbf16, #tpu.memory_space<vmem>>, vector<16x4xbf16>
    tpu.vector_store %arg7[%c192_670, %c32_671], %349 {strides = array<i32>} : memref<256x36xbf16, #tpu.memory_space<vmem>>, vector<16x4xbf16>,
    %c0_672 = arith.constant 0 : index
    %c13_673 = arith.constant 13 : index
    %c0_674 = arith.constant 0 : index
    %c0_675 = arith.constant 0 : index
    %351 = vector.load %arg3[%c0_672, %c13_673, %c0_674, %c0_675] : memref<1x18x18x4xbf16, #tpu.memory_space<vmem>>, vector<1x1x16x4xbf16>
    %352 = vector.shape_cast %351 : vector<1x1x16x4xbf16> to vector<16x4xbf16>
    %c208 = arith.constant 208 : index
    %c0_676 = arith.constant 0 : index
    %353 = vector.load %arg7[%c208, %c0_676] : memref<256x36xbf16, #tpu.memory_space<vmem>>, vector<16x4xbf16>
    tpu.vector_store %arg7[%c208, %c0_676], %352 {strides = array<i32>} : memref<256x36xbf16, #tpu.memory_space<vmem>>, vector<16x4xbf16>,
    %c0_677 = arith.constant 0 : index
    %c13_678 = arith.constant 13 : index
    %c1_679 = arith.constant 1 : index
    %c0_680 = arith.constant 0 : index
    %354 = vector.load %arg3[%c0_677, %c13_678, %c1_679, %c0_680] : memref<1x18x18x4xbf16, #tpu.memory_space<vmem>>, vector<1x1x16x4xbf16>
    %355 = vector.shape_cast %354 : vector<1x1x16x4xbf16> to vector<16x4xbf16>
    %c208_681 = arith.constant 208 : index
    %c4_682 = arith.constant 4 : index
    %356 = vector.load %arg7[%c208_681, %c4_682] : memref<256x36xbf16, #tpu.memory_space<vmem>>, vector<16x4xbf16>
    tpu.vector_store %arg7[%c208_681, %c4_682], %355 {strides = array<i32>} : memref<256x36xbf16, #tpu.memory_space<vmem>>, vector<16x4xbf16>,
    %c0_683 = arith.constant 0 : index
    %c13_684 = arith.constant 13 : index
    %c2_685 = arith.constant 2 : index
    %c0_686 = arith.constant 0 : index
    %357 = vector.load %arg3[%c0_683, %c13_684, %c2_685, %c0_686] : memref<1x18x18x4xbf16, #tpu.memory_space<vmem>>, vector<1x1x16x4xbf16>
    %358 = vector.shape_cast %357 : vector<1x1x16x4xbf16> to vector<16x4xbf16>
    %c208_687 = arith.constant 208 : index
    %c8_688 = arith.constant 8 : index
    %359 = vector.load %arg7[%c208_687, %c8_688] : memref<256x36xbf16, #tpu.memory_space<vmem>>, vector<16x4xbf16>
    tpu.vector_store %arg7[%c208_687, %c8_688], %358 {strides = array<i32>} : memref<256x36xbf16, #tpu.memory_space<vmem>>, vector<16x4xbf16>,
    %c0_689 = arith.constant 0 : index
    %c14_690 = arith.constant 14 : index
    %c0_691 = arith.constant 0 : index
    %c0_692 = arith.constant 0 : index
    %360 = vector.load %arg3[%c0_689, %c14_690, %c0_691, %c0_692] : memref<1x18x18x4xbf16, #tpu.memory_space<vmem>>, vector<1x1x16x4xbf16>
    %361 = vector.shape_cast %360 : vector<1x1x16x4xbf16> to vector<16x4xbf16>
    %c208_693 = arith.constant 208 : index
    %c12_694 = arith.constant 12 : index
    %362 = vector.load %arg7[%c208_693, %c12_694] : memref<256x36xbf16, #tpu.memory_space<vmem>>, vector<16x4xbf16>
    tpu.vector_store %arg7[%c208_693, %c12_694], %361 {strides = array<i32>} : memref<256x36xbf16, #tpu.memory_space<vmem>>, vector<16x4xbf16>,
    %c0_695 = arith.constant 0 : index
    %c14_696 = arith.constant 14 : index
    %c1_697 = arith.constant 1 : index
    %c0_698 = arith.constant 0 : index
    %363 = vector.load %arg3[%c0_695, %c14_696, %c1_697, %c0_698] : memref<1x18x18x4xbf16, #tpu.memory_space<vmem>>, vector<1x1x16x4xbf16>
    %364 = vector.shape_cast %363 : vector<1x1x16x4xbf16> to vector<16x4xbf16>
    %c208_699 = arith.constant 208 : index
    %c16_700 = arith.constant 16 : index
    %365 = vector.load %arg7[%c208_699, %c16_700] : memref<256x36xbf16, #tpu.memory_space<vmem>>, vector<16x4xbf16>
    tpu.vector_store %arg7[%c208_699, %c16_700], %364 {strides = array<i32>} : memref<256x36xbf16, #tpu.memory_space<vmem>>, vector<16x4xbf16>,
    %c0_701 = arith.constant 0 : index
    %c14_702 = arith.constant 14 : index
    %c2_703 = arith.constant 2 : index
    %c0_704 = arith.constant 0 : index
    %366 = vector.load %arg3[%c0_701, %c14_702, %c2_703, %c0_704] : memref<1x18x18x4xbf16, #tpu.memory_space<vmem>>, vector<1x1x16x4xbf16>
    %367 = vector.shape_cast %366 : vector<1x1x16x4xbf16> to vector<16x4xbf16>
    %c208_705 = arith.constant 208 : index
    %c20_706 = arith.constant 20 : index
    %368 = vector.load %arg7[%c208_705, %c20_706] : memref<256x36xbf16, #tpu.memory_space<vmem>>, vector<16x4xbf16>
    tpu.vector_store %arg7[%c208_705, %c20_706], %367 {strides = array<i32>} : memref<256x36xbf16, #tpu.memory_space<vmem>>, vector<16x4xbf16>,
    %c0_707 = arith.constant 0 : index
    %c15 = arith.constant 15 : index
    %c0_708 = arith.constant 0 : index
    %c0_709 = arith.constant 0 : index
    %369 = vector.load %arg3[%c0_707, %c15, %c0_708, %c0_709] : memref<1x18x18x4xbf16, #tpu.memory_space<vmem>>, vector<1x1x16x4xbf16>
    %370 = vector.shape_cast %369 : vector<1x1x16x4xbf16> to vector<16x4xbf16>
    %c208_710 = arith.constant 208 : index
    %c24_711 = arith.constant 24 : index
    %371 = vector.load %arg7[%c208_710, %c24_711] : memref<256x36xbf16, #tpu.memory_space<vmem>>, vector<16x4xbf16>
    tpu.vector_store %arg7[%c208_710, %c24_711], %370 {strides = array<i32>} : memref<256x36xbf16, #tpu.memory_space<vmem>>, vector<16x4xbf16>,
    %c0_712 = arith.constant 0 : index
    %c15_713 = arith.constant 15 : index
    %c1_714 = arith.constant 1 : index
    %c0_715 = arith.constant 0 : index
    %372 = vector.load %arg3[%c0_712, %c15_713, %c1_714, %c0_715] : memref<1x18x18x4xbf16, #tpu.memory_space<vmem>>, vector<1x1x16x4xbf16>
    %373 = vector.shape_cast %372 : vector<1x1x16x4xbf16> to vector<16x4xbf16>
    %c208_716 = arith.constant 208 : index
    %c28_717 = arith.constant 28 : index
    %374 = vector.load %arg7[%c208_716, %c28_717] : memref<256x36xbf16, #tpu.memory_space<vmem>>, vector<16x4xbf16>
    tpu.vector_store %arg7[%c208_716, %c28_717], %373 {strides = array<i32>} : memref<256x36xbf16, #tpu.memory_space<vmem>>, vector<16x4xbf16>,
    %c0_718 = arith.constant 0 : index
    %c15_719 = arith.constant 15 : index
    %c2_720 = arith.constant 2 : index
    %c0_721 = arith.constant 0 : index
    %375 = vector.load %arg3[%c0_718, %c15_719, %c2_720, %c0_721] : memref<1x18x18x4xbf16, #tpu.memory_space<vmem>>, vector<1x1x16x4xbf16>
    %376 = vector.shape_cast %375 : vector<1x1x16x4xbf16> to vector<16x4xbf16>
    %c208_722 = arith.constant 208 : index
    %c32_723 = arith.constant 32 : index
    %377 = vector.load %arg7[%c208_722, %c32_723] : memref<256x36xbf16, #tpu.memory_space<vmem>>, vector<16x4xbf16>
    tpu.vector_store %arg7[%c208_722, %c32_723], %376 {strides = array<i32>} : memref<256x36xbf16, #tpu.memory_space<vmem>>, vector<16x4xbf16>,
    %c0_724 = arith.constant 0 : index
    %c14_725 = arith.constant 14 : index
    %c0_726 = arith.constant 0 : index
    %c0_727 = arith.constant 0 : index
    %378 = vector.load %arg3[%c0_724, %c14_725, %c0_726, %c0_727] : memref<1x18x18x4xbf16, #tpu.memory_space<vmem>>, vector<1x1x16x4xbf16>
    %379 = vector.shape_cast %378 : vector<1x1x16x4xbf16> to vector<16x4xbf16>
    %c224 = arith.constant 224 : index
    %c0_728 = arith.constant 0 : index
    %380 = vector.load %arg7[%c224, %c0_728] : memref<256x36xbf16, #tpu.memory_space<vmem>>, vector<16x4xbf16>
    tpu.vector_store %arg7[%c224, %c0_728], %379 {strides = array<i32>} : memref<256x36xbf16, #tpu.memory_space<vmem>>, vector<16x4xbf16>,
    %c0_729 = arith.constant 0 : index
    %c14_730 = arith.constant 14 : index
    %c1_731 = arith.constant 1 : index
    %c0_732 = arith.constant 0 : index
    %381 = vector.load %arg3[%c0_729, %c14_730, %c1_731, %c0_732] : memref<1x18x18x4xbf16, #tpu.memory_space<vmem>>, vector<1x1x16x4xbf16>
    %382 = vector.shape_cast %381 : vector<1x1x16x4xbf16> to vector<16x4xbf16>
    %c224_733 = arith.constant 224 : index
    %c4_734 = arith.constant 4 : index
    %383 = vector.load %arg7[%c224_733, %c4_734] : memref<256x36xbf16, #tpu.memory_space<vmem>>, vector<16x4xbf16>
    tpu.vector_store %arg7[%c224_733, %c4_734], %382 {strides = array<i32>} : memref<256x36xbf16, #tpu.memory_space<vmem>>, vector<16x4xbf16>,
    %c0_735 = arith.constant 0 : index
    %c14_736 = arith.constant 14 : index
    %c2_737 = arith.constant 2 : index
    %c0_738 = arith.constant 0 : index
    %384 = vector.load %arg3[%c0_735, %c14_736, %c2_737, %c0_738] : memref<1x18x18x4xbf16, #tpu.memory_space<vmem>>, vector<1x1x16x4xbf16>
    %385 = vector.shape_cast %384 : vector<1x1x16x4xbf16> to vector<16x4xbf16>
    %c224_739 = arith.constant 224 : index
    %c8_740 = arith.constant 8 : index
    %386 = vector.load %arg7[%c224_739, %c8_740] : memref<256x36xbf16, #tpu.memory_space<vmem>>, vector<16x4xbf16>
    tpu.vector_store %arg7[%c224_739, %c8_740], %385 {strides = array<i32>} : memref<256x36xbf16, #tpu.memory_space<vmem>>, vector<16x4xbf16>,
    %c0_741 = arith.constant 0 : index
    %c15_742 = arith.constant 15 : index
    %c0_743 = arith.constant 0 : index
    %c0_744 = arith.constant 0 : index
    %387 = vector.load %arg3[%c0_741, %c15_742, %c0_743, %c0_744] : memref<1x18x18x4xbf16, #tpu.memory_space<vmem>>, vector<1x1x16x4xbf16>
    %388 = vector.shape_cast %387 : vector<1x1x16x4xbf16> to vector<16x4xbf16>
    %c224_745 = arith.constant 224 : index
    %c12_746 = arith.constant 12 : index
    %389 = vector.load %arg7[%c224_745, %c12_746] : memref<256x36xbf16, #tpu.memory_space<vmem>>, vector<16x4xbf16>
    tpu.vector_store %arg7[%c224_745, %c12_746], %388 {strides = array<i32>} : memref<256x36xbf16, #tpu.memory_space<vmem>>, vector<16x4xbf16>,
    %c0_747 = arith.constant 0 : index
    %c15_748 = arith.constant 15 : index
    %c1_749 = arith.constant 1 : index
    %c0_750 = arith.constant 0 : index
    %390 = vector.load %arg3[%c0_747, %c15_748, %c1_749, %c0_750] : memref<1x18x18x4xbf16, #tpu.memory_space<vmem>>, vector<1x1x16x4xbf16>
    %391 = vector.shape_cast %390 : vector<1x1x16x4xbf16> to vector<16x4xbf16>
    %c224_751 = arith.constant 224 : index
    %c16_752 = arith.constant 16 : index
    %392 = vector.load %arg7[%c224_751, %c16_752] : memref<256x36xbf16, #tpu.memory_space<vmem>>, vector<16x4xbf16>
    tpu.vector_store %arg7[%c224_751, %c16_752], %391 {strides = array<i32>} : memref<256x36xbf16, #tpu.memory_space<vmem>>, vector<16x4xbf16>,
    %c0_753 = arith.constant 0 : index
    %c15_754 = arith.constant 15 : index
    %c2_755 = arith.constant 2 : index
    %c0_756 = arith.constant 0 : index
    %393 = vector.load %arg3[%c0_753, %c15_754, %c2_755, %c0_756] : memref<1x18x18x4xbf16, #tpu.memory_space<vmem>>, vector<1x1x16x4xbf16>
    %394 = vector.shape_cast %393 : vector<1x1x16x4xbf16> to vector<16x4xbf16>
    %c224_757 = arith.constant 224 : index
    %c20_758 = arith.constant 20 : index
    %395 = vector.load %arg7[%c224_757, %c20_758] : memref<256x36xbf16, #tpu.memory_space<vmem>>, vector<16x4xbf16>
    tpu.vector_store %arg7[%c224_757, %c20_758], %394 {strides = array<i32>} : memref<256x36xbf16, #tpu.memory_space<vmem>>, vector<16x4xbf16>,
    %c0_759 = arith.constant 0 : index
    %c16_760 = arith.constant 16 : index
    %c0_761 = arith.constant 0 : index
    %c0_762 = arith.constant 0 : index
    %396 = vector.load %arg3[%c0_759, %c16_760, %c0_761, %c0_762] : memref<1x18x18x4xbf16, #tpu.memory_space<vmem>>, vector<1x1x16x4xbf16>
    %397 = vector.shape_cast %396 : vector<1x1x16x4xbf16> to vector<16x4xbf16>
    %c224_763 = arith.constant 224 : index
    %c24_764 = arith.constant 24 : index
    %398 = vector.load %arg7[%c224_763, %c24_764] : memref<256x36xbf16, #tpu.memory_space<vmem>>, vector<16x4xbf16>
    tpu.vector_store %arg7[%c224_763, %c24_764], %397 {strides = array<i32>} : memref<256x36xbf16, #tpu.memory_space<vmem>>, vector<16x4xbf16>,
    %c0_765 = arith.constant 0 : index
    %c16_766 = arith.constant 16 : index
    %c1_767 = arith.constant 1 : index
    %c0_768 = arith.constant 0 : index
    %399 = vector.load %arg3[%c0_765, %c16_766, %c1_767, %c0_768] : memref<1x18x18x4xbf16, #tpu.memory_space<vmem>>, vector<1x1x16x4xbf16>
    %400 = vector.shape_cast %399 : vector<1x1x16x4xbf16> to vector<16x4xbf16>
    %c224_769 = arith.constant 224 : index
    %c28_770 = arith.constant 28 : index
    %401 = vector.load %arg7[%c224_769, %c28_770] : memref<256x36xbf16, #tpu.memory_space<vmem>>, vector<16x4xbf16>
    tpu.vector_store %arg7[%c224_769, %c28_770], %400 {strides = array<i32>} : memref<256x36xbf16, #tpu.memory_space<vmem>>, vector<16x4xbf16>,
    %c0_771 = arith.constant 0 : index
    %c16_772 = arith.constant 16 : index
    %c2_773 = arith.constant 2 : index
    %c0_774 = arith.constant 0 : index
    %402 = vector.load %arg3[%c0_771, %c16_772, %c2_773, %c0_774] : memref<1x18x18x4xbf16, #tpu.memory_space<vmem>>, vector<1x1x16x4xbf16>
    %403 = vector.shape_cast %402 : vector<1x1x16x4xbf16> to vector<16x4xbf16>
    %c224_775 = arith.constant 224 : index
    %c32_776 = arith.constant 32 : index
    %404 = vector.load %arg7[%c224_775, %c32_776] : memref<256x36xbf16, #tpu.memory_space<vmem>>, vector<16x4xbf16>
    tpu.vector_store %arg7[%c224_775, %c32_776], %403 {strides = array<i32>} : memref<256x36xbf16, #tpu.memory_space<vmem>>, vector<16x4xbf16>,
    %c0_777 = arith.constant 0 : index
    %c15_778 = arith.constant 15 : index
    %c0_779 = arith.constant 0 : index
    %c0_780 = arith.constant 0 : index
    %405 = vector.load %arg3[%c0_777, %c15_778, %c0_779, %c0_780] : memref<1x18x18x4xbf16, #tpu.memory_space<vmem>>, vector<1x1x16x4xbf16>
    %406 = vector.shape_cast %405 : vector<1x1x16x4xbf16> to vector<16x4xbf16>
    %c240 = arith.constant 240 : index
    %c0_781 = arith.constant 0 : index
    %407 = vector.load %arg7[%c240, %c0_781] : memref<256x36xbf16, #tpu.memory_space<vmem>>, vector<16x4xbf16>
    tpu.vector_store %arg7[%c240, %c0_781], %406 {strides = array<i32>} : memref<256x36xbf16, #tpu.memory_space<vmem>>, vector<16x4xbf16>,
    %c0_782 = arith.constant 0 : index
    %c15_783 = arith.constant 15 : index
    %c1_784 = arith.constant 1 : index
    %c0_785 = arith.constant 0 : index
    %408 = vector.load %arg3[%c0_782, %c15_783, %c1_784, %c0_785] : memref<1x18x18x4xbf16, #tpu.memory_space<vmem>>, vector<1x1x16x4xbf16>
    %409 = vector.shape_cast %408 : vector<1x1x16x4xbf16> to vector<16x4xbf16>
    %c240_786 = arith.constant 240 : index
    %c4_787 = arith.constant 4 : index
    %410 = vector.load %arg7[%c240_786, %c4_787] : memref<256x36xbf16, #tpu.memory_space<vmem>>, vector<16x4xbf16>
    tpu.vector_store %arg7[%c240_786, %c4_787], %409 {strides = array<i32>} : memref<256x36xbf16, #tpu.memory_space<vmem>>, vector<16x4xbf16>,
    %c0_788 = arith.constant 0 : index
    %c15_789 = arith.constant 15 : index
    %c2_790 = arith.constant 2 : index
    %c0_791 = arith.constant 0 : index
    %411 = vector.load %arg3[%c0_788, %c15_789, %c2_790, %c0_791] : memref<1x18x18x4xbf16, #tpu.memory_space<vmem>>, vector<1x1x16x4xbf16>
    %412 = vector.shape_cast %411 : vector<1x1x16x4xbf16> to vector<16x4xbf16>
    %c240_792 = arith.constant 240 : index
    %c8_793 = arith.constant 8 : index
    %413 = vector.load %arg7[%c240_792, %c8_793] : memref<256x36xbf16, #tpu.memory_space<vmem>>, vector<16x4xbf16>
    tpu.vector_store %arg7[%c240_792, %c8_793], %412 {strides = array<i32>} : memref<256x36xbf16, #tpu.memory_space<vmem>>, vector<16x4xbf16>,
    %c0_794 = arith.constant 0 : index
    %c16_795 = arith.constant 16 : index
    %c0_796 = arith.constant 0 : index
    %c0_797 = arith.constant 0 : index
    %414 = vector.load %arg3[%c0_794, %c16_795, %c0_796, %c0_797] : memref<1x18x18x4xbf16, #tpu.memory_space<vmem>>, vector<1x1x16x4xbf16>
    %415 = vector.shape_cast %414 : vector<1x1x16x4xbf16> to vector<16x4xbf16>
    %c240_798 = arith.constant 240 : index
    %c12_799 = arith.constant 12 : index
    %416 = vector.load %arg7[%c240_798, %c12_799] : memref<256x36xbf16, #tpu.memory_space<vmem>>, vector<16x4xbf16>
    tpu.vector_store %arg7[%c240_798, %c12_799], %415 {strides = array<i32>} : memref<256x36xbf16, #tpu.memory_space<vmem>>, vector<16x4xbf16>,
    %c0_800 = arith.constant 0 : index
    %c16_801 = arith.constant 16 : index
    %c1_802 = arith.constant 1 : index
    %c0_803 = arith.constant 0 : index
    %417 = vector.load %arg3[%c0_800, %c16_801, %c1_802, %c0_803] : memref<1x18x18x4xbf16, #tpu.memory_space<vmem>>, vector<1x1x16x4xbf16>
    %418 = vector.shape_cast %417 : vector<1x1x16x4xbf16> to vector<16x4xbf16>
    %c240_804 = arith.constant 240 : index
    %c16_805 = arith.constant 16 : index
    %419 = vector.load %arg7[%c240_804, %c16_805] : memref<256x36xbf16, #tpu.memory_space<vmem>>, vector<16x4xbf16>
    tpu.vector_store %arg7[%c240_804, %c16_805], %418 {strides = array<i32>} : memref<256x36xbf16, #tpu.memory_space<vmem>>, vector<16x4xbf16>,
    %c0_806 = arith.constant 0 : index
    %c16_807 = arith.constant 16 : index
    %c2_808 = arith.constant 2 : index
    %c0_809 = arith.constant 0 : index
    %420 = vector.load %arg3[%c0_806, %c16_807, %c2_808, %c0_809] : memref<1x18x18x4xbf16, #tpu.memory_space<vmem>>, vector<1x1x16x4xbf16>
    %421 = vector.shape_cast %420 : vector<1x1x16x4xbf16> to vector<16x4xbf16>
    %c240_810 = arith.constant 240 : index
    %c20_811 = arith.constant 20 : index
    %422 = vector.load %arg7[%c240_810, %c20_811] : memref<256x36xbf16, #tpu.memory_space<vmem>>, vector<16x4xbf16>
    tpu.vector_store %arg7[%c240_810, %c20_811], %421 {strides = array<i32>} : memref<256x36xbf16, #tpu.memory_space<vmem>>, vector<16x4xbf16>,
    %c0_812 = arith.constant 0 : index
    %c17 = arith.constant 17 : index
    %c0_813 = arith.constant 0 : index
    %c0_814 = arith.constant 0 : index
    %423 = vector.load %arg3[%c0_812, %c17, %c0_813, %c0_814] : memref<1x18x18x4xbf16, #tpu.memory_space<vmem>>, vector<1x1x16x4xbf16>
    %424 = vector.shape_cast %423 : vector<1x1x16x4xbf16> to vector<16x4xbf16>
    %c240_815 = arith.constant 240 : index
    %c24_816 = arith.constant 24 : index
    %425 = vector.load %arg7[%c240_815, %c24_816] : memref<256x36xbf16, #tpu.memory_space<vmem>>, vector<16x4xbf16>
    tpu.vector_store %arg7[%c240_815, %c24_816], %424 {strides = array<i32>} : memref<256x36xbf16, #tpu.memory_space<vmem>>, vector<16x4xbf16>,
    %c0_817 = arith.constant 0 : index
    %c17_818 = arith.constant 17 : index
    %c1_819 = arith.constant 1 : index
    %c0_820 = arith.constant 0 : index
    %426 = vector.load %arg3[%c0_817, %c17_818, %c1_819, %c0_820] : memref<1x18x18x4xbf16, #tpu.memory_space<vmem>>, vector<1x1x16x4xbf16>
    %427 = vector.shape_cast %426 : vector<1x1x16x4xbf16> to vector<16x4xbf16>
    %c240_821 = arith.constant 240 : index
    %c28_822 = arith.constant 28 : index
    %428 = vector.load %arg7[%c240_821, %c28_822] : memref<256x36xbf16, #tpu.memory_space<vmem>>, vector<16x4xbf16>
    tpu.vector_store %arg7[%c240_821, %c28_822], %427 {strides = array<i32>} : memref<256x36xbf16, #tpu.memory_space<vmem>>, vector<16x4xbf16>,
    %c0_823 = arith.constant 0 : index
    %c17_824 = arith.constant 17 : index
    %c2_825 = arith.constant 2 : index
    %c0_826 = arith.constant 0 : index
    %429 = vector.load %arg3[%c0_823, %c17_824, %c2_825, %c0_826] : memref<1x18x18x4xbf16, #tpu.memory_space<vmem>>, vector<1x1x16x4xbf16>
    %430 = vector.shape_cast %429 : vector<1x1x16x4xbf16> to vector<16x4xbf16>
    %c240_827 = arith.constant 240 : index
    %c32_828 = arith.constant 32 : index
    %431 = vector.load %arg7[%c240_827, %c32_828] : memref<256x36xbf16, #tpu.memory_space<vmem>>, vector<16x4xbf16>
    tpu.vector_store %arg7[%c240_827, %c32_828], %430 {strides = array<i32>} : memref<256x36xbf16, #tpu.memory_space<vmem>>, vector<16x4xbf16>,
    %c0_829 = arith.constant 0 : index
    %c0_830 = arith.constant 0 : index
    %432 = vector.load %arg7[%c0_829, %c0_830] : memref<256x36xbf16, #tpu.memory_space<vmem>>, vector<256x36xbf16>
    %c0_831 = arith.constant 0 : index
    %c0_832 = arith.constant 0 : index
    %433 = vector.load %arg4[%c0_831, %c0_832] : memref<36x128xbf16, #tpu.memory_space<vmem>>, vector<36x128xbf16>
    %cst = arith.constant dense<0.000000e+00> : vector<256x128xf32>
    %434 = tpu.matmul %432, %433, %cst {dimension_numbers = #tpu.dot_dimension_numbers<[1], [0], [0], [1], [0, 0, 1, 1], [], []>} : vector<256x36xbf16>, vector<36x128xbf16>, vector<256x128xf32> -> vector<256x128xf32>
    %c0_833 = arith.constant 0 : index
    %c0_834 = arith.constant 0 : index
    %435 = vector.load %arg5[%c0_833, %c0_834] : memref<2x128xf32, #tpu.memory_space<vmem>>, vector<1x128xf32>
    %436 = vector.broadcast %435 : vector<1x128xf32> to vector<256x128xf32>
    %437 = arith.mulf %434, %436 : vector<256x128xf32>
    %c1_835 = arith.constant 1 : index
    %c0_836 = arith.constant 0 : index
    %438 = vector.load %arg5[%c1_835, %c0_836] : memref<2x128xf32, #tpu.memory_space<vmem>>, vector<1x128xf32>
    %439 = vector.broadcast %438 : vector<1x128xf32> to vector<256x128xf32>
    %440 = arith.addf %437, %439 : vector<256x128xf32>
    %cst_837 = arith.constant 0.000000e+00 : f32
    %441 = vector.broadcast %cst_837 : f32 to vector<256x128xf32>
    %442 = arith.maximumf %440, %441 : vector<256x128xf32>
    %443 = arith.truncf %442 : vector<256x128xf32> to vector<256x128xbf16>
    %c0_838 = arith.constant 0 : index
    %c0_839 = arith.constant 0 : index
    %444 = vector.load %arg6[%c0_838, %c0_839] : memref<256x128xbf16, #tpu.memory_space<vmem>>, vector<256x128xbf16>
    tpu.vector_store %arg6[%c0_838, %c0_839], %443 {strides = array<i32>} : memref<256x128xbf16, #tpu.memory_space<vmem>>, vector<256x128xbf16>,
    return
  }
  func.func @transform_0(%arg0: i32, %arg1: i32, %arg2: i32) -> (i32, i32, i32, i32) {
    %c0_i32 = arith.constant 0 : i32
    %c0_i32_0 = arith.constant 0 : i32
    %c0_i32_1 = arith.constant 0 : i32
    %c0_i32_2 = arith.constant 0 : i32
    return %arg0, %c0_i32, %c0_i32_0, %c0_i32_1 : i32, i32, i32, i32
  }
  func.func @transform_1(%arg0: i32, %arg1: i32, %arg2: i32) -> (i32, i32) {
    %c0_i32 = arith.constant 0 : i32
    %c0_i32_0 = arith.constant 0 : i32
    return %c0_i32, %arg1 : i32, i32
  }
  func.func @transform_2(%arg0: i32, %arg1: i32, %arg2: i32) -> (i32, i32) {
    %c0_i32 = arith.constant 0 : i32
    %c0_i32_0 = arith.constant 0 : i32
    return %c0_i32, %arg1 : i32, i32
  }
  func.func @transform_3(%arg0: i32, %arg1: i32, %arg2: i32) -> (i32, i32) {
    %c1_i32 = arith.constant 1 : i32
    %0 = arith.muli %arg0, %c1_i32 : i32
    %1 = arith.addi %0, %arg2 : i32
    %c0_i32 = arith.constant 0 : i32
    return %1, %arg1 : i32, i32
  }
}

</mosaic_0001>

<bundles_post_ra>
// kernel: tpu_custom_call.1
= control target key start
LH: loop header
LB: loop body
LE: loop exit
PB: predicated region body
PF: predicated region fallthrough
CT: control target
= control target key end

     0   :  { %8 = vsyncpa [#allocation4], 0  ;;  %s5699_s0 = inlined_call_operand.vmem [shape: bf16[2,18,18,4], index: 0, kind: input, shape index: {}]   ;;  %s5700_s1 = inlined_call_operand.vmem [shape: bf16[36,128], index: 1, kind: input, shape index: {}]   ;;  %s5701_s2 = inlined_call_operand.vmem [shape: f32[2,128], index: 2, kind: input, shape index: {}]   ;;  %s5702_s3 = inlined_call_operand.hbm [shape: bf16[512,128], index: 3, kind: output, shape index: {}]  }
   0x1   :  { %10 = vsyncpa [#allocation4 + $0x1], 0  ;;  %s4845_s12 = smov 0   ;;  %s4847_s13 = smov 0  }
   0x2   :  { %s4849_s14 = smov 0   ;;  %s4851_s15 = smov 0  }
   0x3   :  { %s4853_s16 = smov 0   ;;  %s4855_s17 = smov 0  }
   0x4 LB: > { %s3551_s18 = sadd.s32 4294967295, %s4813_s17   ;;  %s3552_s19 = sadd.s32 4294967294, %s4813_s17   ;;  %s4813_s17 = sphi %s4855_s17, %s16_s17   ;;  %s4809_s16 = sphi %s4853_s16, %s5709_s16   ;;  %s4805_s15 = sphi %s4851_s15, %s5708_s15   ;;  %s4801_s14 = sphi %s4849_s14, %s5707_s14   ;;  %s4797_s13 = sphi %s4847_s13, %s5706_s13   ;;  %s4793_s12 = sphi %s4845_s12, %s5705_s12  }
   0x5   : > { %s35_s20 = sadd.s32 1, %s4809_s16  ;;  %s124_s21 = sadd.s32 1, %s4801_s14 }
   0x6   : > { %p37_p0 = scmp.ge.s32.totalorder %s35_s20, 2  ;;  %p134_p1 = scmp.ne.s32.totalorder %s4801_s14, %s4797_s13 }
   0x7   : > { %p135_p2 = scmp.eq.s32.totalorder %s3551_s18, 1  ;;  %p140_p3 = scmp.ne.s32.totalorder %s4797_s13, %s4793_s12 }
   0x8   : > { %s5711_s20 = smov (%p37_p0, %s35_s20), 0  ;;  %p141_p5 = scmp.eq.s32.totalorder %s3552_s19, 1 }
   0x9   : > { %p4885_p4 = por %p135_p2, %p134_p1  ;;  %s119_s23 = ssub.s32 %s4809_s16, %s5711_s20 }
   0xa   : > { %p3557_p6 = scmp.ge.s32.totalorder %s4813_s17, 1  ;;  %p122_p7 = scmp.eq.s32.totalorder %s119_s23, 0 }
   0xb   : > { %p4892_p8 = por %p141_p5, %p140_p3  ;;  %p181_p9 = scmp.lt.s32.totalorder %s4813_s17, 3 }
   0xc   : > { %s4898_s25 = scalar_select %p122_p7, %s4801_s14, %s124_s21  }
   0xd   : > { %p182_p10 = pnand %p3557_p6, %p181_p9 }
   0xe   : > { %p213_p11 = scmp.lt.s32.totalorder (!%p182_p10), %s4805_s15, 1  ;;  %vm279_vm0 = vcmask (!%p182_p10), 1046528   ;;  %s4815_s4 = smov (!%p182_p10), 12   ;;  %vm250_vm1 = vsmask.f32 (!%p182_p10), 7424  ;;  %vm237_vm2 = vcmask (!%p182_p10), 31744  }
   0xf   : > { %185 = sbr.rel (%p182_p10) target bundleno = 646 (0x286), region = 32  ;;  %s4816_s5 = smov (!%p182_p10), 8   ;;  %vm266_vm3 = vcmask (!%p182_p10), 64544   ;;  %vm286_vm4 = vcmask (!%p182_p10), 97344   ;;  %vm299_vm5 = vcmask (!%p182_p10), 130144   ;;  %vm327_vm6 = vcmask (!%p182_p10), 162944  }
  0x10   : > { %s4817_s6 = smov (!%p182_p10), 4   ;;  %s4818_s7 = smov (!%p182_p10), 16   ;;  %vm346_vm7 = vcmask (!%p182_p10), 195744   ;;  %vm359_vm8 = vcmask (!%p182_p10), 228544   ;;  %vm387_vm9 = vcmask (!%p182_p10), 261344   ;;  %vm406_vm10 = vcmask (!%p182_p10), 294144  }
  0x11   : > { %s4819_s8 = smov (!%p182_p10), 20   ;;  %s4820_s9 = smov (!%p182_p10), 24   ;;  %vm2949_vm11 = vcmask (!%p182_p10), 293888   ;;  %vm2998_vm12 = vcmask (!%p182_p10), 1041408  }
  0x12   : > { %s4821_s10 = smov (!%p182_p10), 28   ;;  %s4822_s11 = smov (!%p182_p10), 32  }
  0x13   : > { %s4823_s23 = smov (!%p182_p10), [#allocation3]  }
  0x16   : > { %s214_s26 = scalar_select %p213_p11, %s4805_s15, 1 }
  0x18   : > { %s4427_s27 = smul.u32 216, %s214_s26  ;;  %s4739_s26 = sshll.u32 %s4823_s23, 4  ;;  %s4740_s26 = int_to_ptr.vmem [resolvable:$false] %s4739_s26 }
  0x1a   : > { %s4905_s30 = scalar_lea.vmem %s5699_s0, %s4427_s27  ;;  %s4741_s27 = scalar_lea.vmem %s4740_s26, 4096 }
  0x1b   : > { %v4492_v0 = vld [vmem:[%s4905_s30 + $0xc] sm:$0xff]   ;;  %v4493_v1 = vld [vmem:[%s4905_s30] sm:$0xfe]   ;;  %v4494_v2 = vld [vmem:[%s4905_s30 + $0x8] ss:$0 sps:$4 sm:$0x11]  }
  0x1c   : > { %296 = vrot.lane.b32.xlu0 %v4492_v0, %s4815_s4  ;;  %v4495_v3 = vld [vmem:[%s4905_s30 + $0x6c] sm:$0xff]   ;;  %v280_v4 = vrot.slane %v4493_v1, 1  ;;  %v281_v5 = vrot.slane %v4494_v2, 1  ;;  %v4497_v7 = vld [vmem:[%s4905_s30 + $0x14] ss:$0 sps:$4 sm:$0x11]  }
  0x1d   : > { %v4496_v6 = vld [vmem:[%s4905_s30 + $0xc] sm:$0xfe]   ;;  %v4502_v8 = vld [vmem:[%s4905_s30] sm:$0xff]   ;;  %v456_v11 = vrot.slane %v4497_v7, 1  ;;  %v4512_v1 = vld [vmem:[%s4905_s30 + $0x18] sm:$0xff]  }
  0x1e   : > { %v282_v9 = vsel %vm279_vm0, %v280_v4, %v281_v5  ;;  %v455_v10 = vrot.slane %v4496_v6, 1  ;;  %v4498_v12 = vld [vmem:[%s4905_s30 + $0x60] sm:$0xfe]   ;;  %v4499_v13 = vld [vmem:[%s4905_s30 + $0x68] ss:$0 sps:$4 sm:$0x11]  }
  0x1f   : > { %283 = vrot.lane.b32.xlu1 %v282_v9, %s4816_s5  ;;  %v252_v14 = vshrl.u32 %v4502_v8, 16  ;;  %v1624_v16 = vrot.slane %v4498_v12, 1  ;;  %v4500_v17 = vld [vmem:[%s4905_s30 + $0x6c] sm:$0xfe]   ;;  %v254_v18 = vshll.u32 %v4502_v8, 16  ;;  %v1625_v19 = vrot.slane %v4499_v13, 1 }
  0x20   : > { %1638 = vrot.lane.b32.xlu0 %v4495_v3, %s4815_s4  ;;  %v457_v15 = vsel %vm279_vm0, %v455_v10, %v456_v11  ;;  %v4501_v20 = vld [vmem:[%s4905_s30 + $0x74] ss:$0 sps:$4 sm:$0x11]   ;;  %v1791_v21 = vrot.slane %v4500_v17, 1  ;;  %v4504_v26 = vld [vmem:[%s4905_s30 + $0xc] sm:$0xff]   ;;  %v4506_v35 = vld [vmem:[%s4905_s30 + $0x60] sm:$0xff]  }
  0x21   : > { %v256_v22 = vrot.slane %v254_v18, 1  ;;  %v1626_v23 = vsel %vm279_vm0, %v1624_v16, %v1625_v19  ;;  %v1792_v24 = vrot.slane %v4501_v20, 1  ;;  %v4503_v25 = vld [vmem:[%s4905_s30 + $0x8] ss:$0 sps:$4 sm:$0x11]   ;;  %v429_v31 = vshrl.u32 %v4504_v26, 16 }
  0x22   : > { %v259_v29 = vshll.u32 %v4503_v25, 16  ;;  %v4505_v30 = vld [vmem:[%s4905_s30 + $0x14] ss:$0 sps:$4 sm:$0x11]   ;;  %v431_v32 = vshll.u32 %v4504_v26, 16  ;;  %v4508_v38 = vld [vmem:[%s4905_s30 + $0x6c] sm:$0xff]  }
  0x23   : > { %458 = vrot.lane.b32.xlu1 %v457_v15, %s4816_s5  ;;  %v1793_v27 = vsel %vm279_vm0, %v1791_v21, %v1792_v24  ;;  %v257_v28 = vor.u32 %v256_v22, %v252_v14  ;;  %v436_v34 = vshll.u32 %v4505_v30, 16  ;;  %v4507_v36 = vld [vmem:[%s4905_s30 + $0x68] ss:$0 sps:$4 sm:$0x11]   ;;  %v1598_v41 = vshrl.u32 %v4506_v35, 16  ;;  %v4510_v43 = vld [vmem:[%s4905_s30 + $0xc] sm:$0xff]  }
  0x24   : > { %1627 = vrot.lane.b32.xlu0 %v1626_v23, %s4816_s5  ;;  %v261_v33 = vrot.slane %v259_v29, 1  ;;  %v433_v37 = vrot.slane %v431_v32, 1  ;;  %v1600_v42 = vshll.u32 %v4506_v35, 16  ;;  %v1605_v45 = vshll.u32 %v4507_v36, 16  ;;  %v4513_v60 = vld [vmem:[%s4905_s30 + $0x6c] sm:$0xff]   ;;  %v4518_v7 = vld [vmem:[%s4905_s30 + $0x18] sm:$0xff]  }
  0x25   : > { %v438_v40 = vrot.slane %v436_v34, 1  ;;  %v4509_v46 = vld [vmem:[%s4905_s30 + $0x74] ss:$0 sps:$4 sm:$0x11]   ;;  %v1765_v47 = vshrl.u32 %v4508_v38, 16  ;;  %v1767_v48 = vshll.u32 %v4508_v38, 16 }
  0x26   : > { %v262_v39 = vsel %vm250_vm1, %v257_v28, %v261_v33  ;;  %v434_v44 = vor.u32 %v433_v37, %v429_v31  ;;  %v1602_v49 = vrot.slane %v1600_v42, 1  ;;  %v313_v50 = vshrl.u32 %v4510_v43, 16  ;;  %v4511_v56 = vld [vmem:[%s4905_s30 + $0x14] ss:$0 sps:$4 sm:$0x11]   ;;  %v4515_v11 = vld [vmem:[%s4905_s30 + $0x78] sm:$0xff]  }
  0x27   : > { %1794 = vrot.lane.b32.xlu1 %v1793_v27, %s4816_s5  ;;  %v1607_v52 = vrot.slane %v1605_v45, 1  ;;  %v1769_v53 = vrot.slane %v1767_v48, 1  ;;  %v1772_v54 = vshll.u32 %v4509_v46, 16  ;;  %v315_v57 = vshll.u32 %v4510_v43, 16  ;;  %v4516_v12 = vld [vmem:[%s4905_s30 + $0xc] sm:$0xfe]  }
  0x28   : > { %263 = vrot.lane.b32.xlu0 %v262_v39, %s4817_s6  ;;  %v439_v51 = vsel %vm250_vm1, %v434_v44, %v438_v40  ;;  %v1603_v55 = vor.u32 %v1602_v49, %v1598_v41  ;;  %v320_v63 = vshll.u32 %v4511_v56, 16  ;;  %v4514_v2 = vld [vmem:[%s4905_s30 + $0x74] ss:$0 sps:$4 sm:$0x11]   ;;  %v1654_v3 = vshrl.u32 %v4513_v60, 16  ;;  %v4522_v22 = vld [vmem:[%s4905_s30 + $0x78] sm:$0xff]  }
  0x29   : > { %v1770_v58 = vor.u32 %v1769_v53, %v1765_v47  ;;  %v1774_v59 = vrot.slane %v1772_v54, 1  ;;  %v317_v62 = vrot.slane %v315_v57, 1  ;;  %v1656_v4 = vshll.u32 %v4513_v60, 16  ;;  %v4517_v15 = vld [vmem:[%s4905_s30 + $0x14] ss:$0 sps:$4 sm:$0x11]  }
  0x2a   : > { %v1608_v61 = vsel %vm250_vm1, %v1603_v55, %v1607_v52  ;;  %v322_v6 = vrot.slane %v320_v63, 1  ;;  %v1661_v9 = vshll.u32 %v4514_v2, 16  ;;  %v340_v16 = vrot.slane %v4516_v12, 1  ;;  %v4519_v17 = vld [vmem:[%s4905_s30 + $0x20] ss:$0 sps:$4 sm:$0x11]  }
  0x2b   : > { %440 = vrot.lane.b32.xlu1 %v439_v51, %s4817_s6  ;;  %v1775_v0 = vsel %vm250_vm1, %v1770_v58, %v1774_v59  ;;  %v318_v5 = vor.u32 %v317_v62, %v313_v50  ;;  %v1658_v8 = vrot.slane %v1656_v4, 1  ;;  %v341_v19 = vrot.slane %v4517_v15, 1  ;;  %v4520_v25 = vld [vmem:[%s4905_s30 + $0x6c] sm:$0xfe]   ;;  %v4530_v35 = vld [vmem:[%s4905_s30 + $0x18] sm:$0xff]  }
  0x2c   : > { %1609 = vrot.lane.b32.xlu0 %v1608_v61, %s4817_s6  ;;  %v1663_v14 = vrot.slane %v1661_v9, 1  ;;  %v485_v20 = vshrl.u32 %v4518_v7, 16  ;;  %v487_v21 = vshll.u32 %v4518_v7, 16  ;;  %v492_v23 = vshll.u32 %v4519_v17, 16  ;;  %v4524_v42 = vld [vmem:[%s4905_s30 + $0x18] sm:$0xff]   ;;  %v4542_v17 = vld [vmem:[%s4905_s30 + $0x84] sm:$0xff]  }
  0x2d   : > { %v323_v10 = vsel %vm250_vm1, %v318_v5, %v322_v6  ;;  %v1659_v13 = vor.u32 %v1658_v8, %v1654_v3  ;;  %v4521_v26 = vld [vmem:[%s4905_s30 + $0x74] ss:$0 sps:$4 sm:$0x11]   ;;  %v342_v27 = vsel %vm279_vm0, %v340_v16, %v341_v19  ;;  %v1821_v29 = vshrl.u32 %v4522_v22, 16  ;;  %v4525_v43 = vld [vmem:[%s4905_s30 + $0x18] sm:$0xfe]  }
  0x2e   : > { %v489_v24 = vrot.slane %v487_v21, 1  ;;  %v494_v28 = vrot.slane %v492_v23, 1  ;;  %v1680_v31 = vrot.slane %v4520_v25, 1  ;;  %v1681_v32 = vrot.slane %v4521_v26, 1  ;;  %v4533_v47 = vld [vmem:[%s4905_s30 + $0x78] sm:$0xff]   ;;  %v4532_v3 = vld [vmem:[%s4905_s30 + $0x24] sm:$0xff]  }
  0x2f   : > { %1776 = vrot.lane.b32.xlu1 %v1775_v0, %s4817_s6  ;;  %v1664_v18 = vsel %vm250_vm1, %v1659_v13, %v1663_v14  ;;  %v1823_v33 = vshll.u32 %v4522_v22, 16  ;;  %v4523_v34 = vld [vmem:[%s4905_s30 + $0x80] ss:$0 sps:$4 sm:$0x11]   ;;  %v373_v40 = vshrl.u32 %v4530_v35, 16  ;;  %v375_v45 = vshll.u32 %v4530_v35, 16 }
  0x30   : > { %324 = vrot.lane.b32.xlu0 %v323_v10, %s4818_s7  ;;  %v490_v30 = vor.u32 %v489_v24, %v485_v20  ;;  %v1682_v38 = vsel %vm279_vm0, %v1680_v31, %v1681_v32  ;;  %v1828_v39 = vshll.u32 %v4523_v34, 16  ;;  %v4526_v44 = vld [vmem:[%s4905_s30 + $0x20] ss:$0 sps:$4 sm:$0x11]   ;;  %v511_v48 = vrot.slane %v4525_v43, 1  ;;  %v4527_v52 = vld [vmem:[%s4905_s30 + $0x78] sm:$0xff]  }
  0x31   : > { %v1825_v37 = vrot.slane %v1823_v33, 1  ;;  %v512_v49 = vrot.slane %v4526_v44, 1  ;;  %v4528_v51 = vld [vmem:[%s4905_s30 + $0x78] sm:$0xfe]   ;;  %v377_v54 = vrot.slane %v375_v45, 1  ;;  %v1711_v59 = vshrl.u32 %v4533_v47, 16 }
  0x32   : > { %v495_v36 = vsel %vm250_vm1, %v490_v30, %v494_v28  ;;  %v1830_v46 = vrot.slane %v1828_v39, 1  ;;  %v4529_v53 = vld [vmem:[%s4905_s30 + $0x80] ss:$0 sps:$4 sm:$0x11]   ;;  %v1847_v56 = vrot.slane %v4528_v51, 1  ;;  %v1713_v62 = vshll.u32 %v4533_v47, 16 }
  0x33   : > { %469 = vrot.lane.b32.xlu1 %v4512_v1, %s4815_s4  ;;  %v1826_v41 = vor.u32 %v1825_v37, %v1821_v29  ;;  %v513_v55 = vsel %vm279_vm0, %v511_v48, %v512_v49  ;;  %v4531_v57 = vld [vmem:[%s4905_s30 + $0x20] ss:$0 sps:$4 sm:$0x11]   ;;  %v1848_v58 = vrot.slane %v4529_v53, 1  ;;  %v378_v60 = vor.u32 %v377_v54, %v373_v40  ;;  %v4538_v5 = vld [vmem:[%s4905_s30 + $0x24] sm:$0xff]   ;;  %v4546_v20 = vld [vmem:[%s4905_s30 + $0x18] sm:$0xff]  }
  0x34   : > { %1665 = vrot.lane.b32.xlu0 %v1664_v18, %s4818_s7  ;;  %v380_v61 = vshll.u32 %v4531_v57, 16  ;;  %v4534_v63 = vld [vmem:[%s4905_s30 + $0x80] ss:$0 sps:$4 sm:$0x11]   ;;  %v1715_v2 = vrot.slane %v1713_v62, 1  ;;  %v4535_v13 = vld [vmem:[%s4905_s30 + $0x84] sm:$0xff]  }
  0x35   : > { %v1831_v50 = vsel %vm250_vm1, %v1826_v41, %v1830_v46  ;;  %v1849_v0 = vsel %vm279_vm0, %v1847_v56, %v1848_v58  ;;  %v1718_v4 = vshll.u32 %v4534_v63, 16  ;;  %v4536_v8 = vld [vmem:[%s4905_s30 + $0x18] sm:$0xfe]   ;;  %v4537_v10 = vld [vmem:[%s4905_s30 + $0x20] ss:$0 sps:$4 sm:$0x11]  }
  0x36   : > { %v382_v1 = vrot.slane %v380_v61, 1  ;;  %v1716_v7 = vor.u32 %v1715_v2, %v1711_v59  ;;  %v4539_v12 = vld [vmem:[%s4905_s30 + $0x2c] ss:$0 sps:$4 sm:$0x11]   ;;  %v401_v14 = vrot.slane %v4537_v10, 1  ;;  %v542_v15 = vshrl.u32 %v4538_v5, 16 }
  0x37   : > { %1805 = vrot.lane.b32.xlu1 %v4515_v11, %s4815_s4  ;;  %v1720_v9 = vrot.slane %v1718_v4, 1  ;;  %v400_v11 = vrot.slane %v4536_v8, 1  ;;  %v544_v16 = vshll.u32 %v4538_v5, 16  ;;  %v549_v19 = vshll.u32 %v4539_v12, 16  ;;  %v4540_v22 = vld [vmem:[%s4905_s30 + $0x78] sm:$0xfe]  }
  0x38   : > { %343 = vrot.lane.b32.xlu0 %v342_v27, %s4819_s8  ;;  %v383_v6 = vsel %vm250_vm1, %v378_v60, %v382_v1  ;;  %v4541_v23 = vld [vmem:[%s4905_s30 + $0x80] ss:$0 sps:$4 sm:$0x11]   ;;  %v1878_v25 = vshrl.u32 %v4542_v17, 16  ;;  %v1737_v27 = vrot.slane %v4540_v22, 1  ;;  %v1880_v29 = vshll.u32 %v4542_v17, 16 }
  0x39   : > { %v1721_v18 = vsel %vm250_vm1, %v1716_v7, %v1720_v9  ;;  %v546_v21 = vrot.slane %v544_v16, 1  ;;  %v551_v24 = vrot.slane %v549_v19, 1  ;;  %v1738_v28 = vrot.slane %v4541_v23, 1  ;;  %v4543_v31 = vld [vmem:[%s4905_s30 + $0x8c] ss:$0 sps:$4 sm:$0x11]  }
  0x3a   : > { %v402_v30 = vsel %vm279_vm0, %v400_v11, %v401_v14  ;;  %v596_v32 = vshrl.u32 %v4546_v20, 16  ;;  %v4550_v33 = vld [vmem:[%s4905_s30 + $0x78] sm:$0xff]   ;;  %v1882_v34 = vrot.slane %v1880_v29, 1  ;;  %v598_v35 = vshll.u32 %v4546_v20, 16  ;;  %v4554_v54 = vld [vmem:[%s4905_s30 + $0x24] sm:$0xff]  }
  0x3b   : > { %496 = vrot.lane.b32.xlu1 %v495_v36, %s4818_s7  ;;  %v547_v26 = vor.u32 %v546_v21, %v542_v15  ;;  %v1885_v37 = vshll.u32 %v4543_v31, 16  ;;  %v4545_v39 = vld [vmem:[%s4905_s30 + $0x2c] ss:$0 sps:$4 sm:$0x11]   ;;  %v1739_v41 = vsel %vm279_vm0, %v1737_v27, %v1738_v28  ;;  %v1932_v47 = vshrl.u32 %v4550_v33, 16  ;;  %v4558_v9 = vld [vmem:[%s4905_s30 + $0x84] sm:$0xff]  }
  0x3c   : > { %1683 = vrot.lane.b32.xlu0 %v1682_v38, %s4819_s8  ;;  %v4544_v38 = vld [vmem:[%s4905_s30 + $0x24] sm:$0xfe]   ;;  %v1883_v40 = vor.u32 %v1882_v34, %v1878_v25  ;;  %v569_v44 = vrot.slane %v4545_v39, 1  ;;  %v4547_v45 = vld [vmem:[%s4905_s30 + $0x20] ss:$0 sps:$4 sm:$0x11]  }
  0x3d   : > { %v552_v36 = vsel %vm250_vm1, %v547_v26, %v551_v24  ;;  %v568_v43 = vrot.slane %v4544_v38, 1  ;;  %v600_v46 = vrot.slane %v598_v35, 1  ;;  %v603_v49 = vshll.u32 %v4547_v45, 16  ;;  %v4549_v53 = vld [vmem:[%s4905_s30 + $0x8c] ss:$0 sps:$4 sm:$0x11]  }
  0x3e   : > { %v1934_v51 = vshll.u32 %v4550_v33, 16  ;;  %v1905_v58 = vrot.slane %v4549_v53, 1  ;;  %v4551_v59 = vld [vmem:[%s4905_s30 + $0x80] ss:$0 sps:$4 sm:$0x11]   ;;  %v763_v61 = vshrl.u32 %v4554_v54, 16 }
  0x3f   : > { %1832 = vrot.lane.b32.xlu1 %v1831_v50, %s4818_s7  ;;  %v4548_v50 = vld [vmem:[%s4905_s30 + $0x84] sm:$0xfe]   ;;  %v605_v56 = vrot.slane %v603_v49, 1  ;;  %v4552_v1 = vld [vmem:[%s4905_s30 + $0x18] sm:$0xfe]   ;;  %v765_v8 = vshll.u32 %v4554_v54, 16 }
  0x40   : > { %356 = vrot.lane.b32.xlu0 %v4524_v42, %s4820_s9  ;;  %v1887_v42 = vrot.slane %v1885_v37, 1  ;;  %v1904_v57 = vrot.slane %v4548_v50, 1  ;;  %v1936_v60 = vrot.slane %v1934_v51, 1  ;;  %v4553_v2 = vld [vmem:[%s4905_s30 + $0x20] ss:$0 sps:$4 sm:$0x11]  }
  0x41   : > { %v622_v5 = vrot.slane %v4552_v1, 1  ;;  %v4555_v7 = vld [vmem:[%s4905_s30 + $0x2c] ss:$0 sps:$4 sm:$0x11]   ;;  %v4556_v12 = vld [vmem:[%s4905_s30 + $0x78] sm:$0xfe]  }
  0x42   : > { %v1888_v48 = vsel %vm250_vm1, %v1883_v40, %v1887_v42  ;;  %v1937_v63 = vor.u32 %v1936_v60, %v1932_v47  ;;  %v770_v11 = vshll.u32 %v4555_v7, 16  ;;  %v767_v14 = vrot.slane %v765_v8, 1  ;;  %v4557_v15 = vld [vmem:[%s4905_s30 + $0x80] ss:$0 sps:$4 sm:$0x11]   ;;  %v4560_v27 = vld [vmem:[%s4905_s30 + $0x24] sm:$0xff]  }
  0x43   : > { %514 = vrot.lane.b32.xlu1 %v513_v55, %s4819_s8  ;;  %v570_v55 = vsel %vm279_vm0, %v568_v43, %v569_v44  ;;  %v1958_v17 = vrot.slane %v4556_v12, 1  ;;  %v1959_v19 = vrot.slane %v4557_v15, 1  ;;  %v4559_v20 = vld [vmem:[%s4905_s30 + $0x8c] ss:$0 sps:$4 sm:$0x11]   ;;  %v2099_v21 = vshrl.u32 %v4558_v9, 16 }
  0x44   : > { %1695 = vrot.lane.b32.xlu0 %v4527_v52, %s4820_s9  ;;  %v601_v52 = vor.u32 %v600_v46, %v596_v32  ;;  %v772_v16 = vrot.slane %v770_v11, 1  ;;  %v2101_v22 = vshll.u32 %v4558_v9, 16  ;;  %v2106_v26 = vshll.u32 %v4559_v20, 16  ;;  %v4561_v28 = vld [vmem:[%s4905_s30 + $0x24] sm:$0xfe]   ;;  %v4571_v1 = vld [vmem:[%s4905_s30 + $0x90] sm:$0xff]  }
  0x45   : > { %v1960_v24 = vsel %vm279_vm0, %v1958_v17, %v1959_v19  ;;  %v4562_v29 = vld [vmem:[%s4905_s30 + $0x2c] ss:$0 sps:$4 sm:$0x11]   ;;  %v4566_v32 = vld [vmem:[%s4905_s30 + $0x24] sm:$0xff]   ;;  %v789_v33 = vrot.slane %v4561_v28, 1  ;;  %v4580_v28 = vld [vmem:[%s4905_s30 + $0x30] sm:$0xff]  }
  0x46   : > { %v606_v62 = vsel %vm250_vm1, %v601_v52, %v605_v56  ;;  %v2103_v25 = vrot.slane %v2101_v22, 1  ;;  %v2108_v31 = vrot.slane %v2106_v26, 1  ;;  %v790_v34 = vrot.slane %v4562_v29, 1  ;;  %v4563_v37 = vld [vmem:[%s4905_s30 + $0x84] sm:$0xff]   ;;  %v4568_v52 = vld [vmem:[%s4905_s30 + $0x30] sm:$0xff]  }
  0x47   : > { %1850 = vrot.lane.b32.xlu1 %v1849_v0, %s4819_s8  ;;  %v1939_v0 = vshll.u32 %v4551_v59, 16  ;;  %v4565_v38 = vld [vmem:[%s4905_s30 + $0x8c] ss:$0 sps:$4 sm:$0x11]   ;;  %v652_v39 = vshrl.u32 %v4566_v32, 16  ;;  %v654_v44 = vshll.u32 %v4566_v32, 16 }
  0x48   : > { %384 = vrot.lane.b32.xlu0 %v383_v6, %s4821_s10  ;;  %v623_v6 = vrot.slane %v4553_v2, 1  ;;  %v791_v40 = vsel %vm279_vm0, %v789_v33, %v790_v34  ;;  %v4567_v42 = vld [vmem:[%s4905_s30 + $0x2c] ss:$0 sps:$4 sm:$0x11]   ;;  %v2126_v43 = vrot.slane %v4565_v38, 1  ;;  %v4569_v47 = vld [vmem:[%s4905_s30 + $0x84] sm:$0xff]  }
  0x49   : > { %v1941_v4 = vrot.slane %v1939_v0, 1  ;;  %v659_v45 = vshll.u32 %v4567_v42, 16  ;;  %v656_v46 = vrot.slane %v654_v44, 1  ;;  %v4570_v50 = vld [vmem:[%s4905_s30 + $0x8c] ss:$0 sps:$4 sm:$0x11]  }
  0x4a   : > { %v1988_v53 = vshrl.u32 %v4569_v47, 16  ;;  %v1990_v54 = vshll.u32 %v4569_v47, 16  ;;  %v1995_v56 = vshll.u32 %v4570_v50, 16  ;;  %v4572_v60 = vld [vmem:[%s4905_s30 + $0x24] sm:$0xfe]   ;;  %v4586_v22 = vld [vmem:[%s4905_s30 + $0x30] sm:$0xff]  }
  0x4b   : > { %526 = vrot.lane.b32.xlu1 %v4532_v3, %s4820_s9  ;;  %v1906_v3 = vsel %vm279_vm0, %v1904_v57, %v1905_v58  ;;  %v1942_v10 = vsel %vm250_vm1, %v1937_v63, %v1941_v4  ;;  %v661_v49 = vrot.slane %v659_v45, 1  ;;  %v657_v51 = vor.u32 %v656_v46, %v652_v39  ;;  %v4578_v57 = vld [vmem:[%s4905_s30 + $0x90] sm:$0xff]   ;;  %v4576_v11 = vld [vmem:[%s4905_s30 + $0x84] sm:$0xfe]  }
  0x4c   : > { %1722 = vrot.lane.b32.xlu0 %v1721_v18, %s4821_s10  ;;  %v768_v18 = vor.u32 %v767_v14, %v763_v61  ;;  %v1992_v59 = vrot.slane %v1990_v54, 1  ;;  %v4573_v61 = vld [vmem:[%s4905_s30 + $0x2c] ss:$0 sps:$4 sm:$0x11]   ;;  %v678_v2 = vrot.slane %v4572_v60, 1  ;;  %v2157_v9 = vshll.u32 %v4578_v57, 16 }
  0x4d   : > { %v662_v58 = vsel %vm250_vm1, %v657_v51, %v661_v49  ;;  %v4577_v12 = vld [vmem:[%s4905_s30 + $0x8c] ss:$0 sps:$4 sm:$0x11]   ;;  %v4584_v32 = vld [vmem:[%s4905_s30 + $0x90] sm:$0xfe]   ;;  %v711_v33 = vshll.u32 %v4586_v22, 16 }
  0x4e   : > { %v773_v23 = vsel %vm250_vm1, %v768_v18, %v772_v16  ;;  %v1993_v0 = vor.u32 %v1992_v59, %v1988_v53  ;;  %v2014_v16 = vrot.slane %v4576_v11, 1  ;;  %v2015_v17 = vrot.slane %v4577_v12, 1  ;;  %v4579_v18 = vld [vmem:[%s4905_s30 + $0x98] ss:$0 sps:$4 sm:$0x11]   ;;  %v4583_v38 = vld [vmem:[%s4905_s30 + $0x90] sm:$0xff]  }
  0x4f   : > { %1862 = vrot.lane.b32.xlu1 %v4535_v13, %s4820_s9  ;;  %v624_v13 = vsel %vm279_vm0, %v622_v5, %v623_v6  ;;  %v4575_v5 = vld [vmem:[%s4905_s30 + $0x38] ss:$0 sps:$4 sm:$0x11]   ;;  %v2155_v6 = vshrl.u32 %v4578_v57, 16  ;;  %v2159_v19 = vrot.slane %v2157_v9, 1  ;;  %v4594_v49 = vld [vmem:[%s4905_s30 + $0x3c] sm:$0xff]  }
  0x50   : > { %403 = vrot.lane.b32.xlu0 %v402_v30, %s4822_s11  ;;  %v2104_v30 = vor.u32 %v2103_v25, %v2099_v21  ;;  %v2162_v21 = vshll.u32 %v4579_v18, 16  ;;  %v2016_v25 = vsel %vm279_vm0, %v2014_v16, %v2015_v17  ;;  %v4585_v34 = vld [vmem:[%s4905_s30 + $0x98] ss:$0 sps:$4 sm:$0x11]   ;;  %v4592_v54 = vld [vmem:[%s4905_s30 + $0x30] sm:$0xfe]  }
  0x51   : > { %v2182_v39 = vrot.slane %v4585_v34, 1  ;;  %v4590_v45 = vld [vmem:[%s4905_s30 + $0x98] ss:$0 sps:$4 sm:$0x11]   ;;  %v4588_v57 = vld [vmem:[%s4905_s30 + $0x3c] sm:$0xff]   ;;  %v735_v60 = vrot.slane %v4592_v54, 1 }
  0x52   : > { %v2109_v35 = vsel %vm250_vm1, %v2104_v30, %v2108_v31  ;;  %v2164_v26 = vrot.slane %v2162_v21, 1  ;;  %v2052_v51 = vshll.u32 %v4590_v45, 16  ;;  %v4597_v9 = vld [vmem:[%s4905_s30 + $0x98] ss:$0 sps:$4 sm:$0x11]  }
  0x53   : > { %553 = vrot.lane.b32.xlu1 %v552_v36, %s4821_s10  ;;  %v4564_v36 = vld [vmem:[%s4905_s30 + $0x84] sm:$0xfe]   ;;  %v4599_v12 = vld [vmem:[%s4905_s30 + $0xa4] ss:$0 sps:$4 sm:$0x11]  }
  0x54   : > { %1740 = vrot.lane.b32.xlu0 %v1739_v41, %s4822_s11  ;;  %v2125_v41 = vrot.slane %v4564_v36, 1  ;;  %v2181_v36 = vrot.slane %v4584_v32, 1  ;;  %v4600_v21 = vld [vmem:[%s4905_s30 + $0x3c] sm:$0xfe]  }
  0x55   : > { %v4604_v32 = vld [vmem:[%s4905_s30 + $0x38] ss:$0 sps:$4 sm:$0x11]  }
  0x56   : > { %v2183_v50 = vsel %vm279_vm0, %v2181_v36, %v2182_v39  ;;  %v4606_v39 = vld [vmem:[%s4905_s30 + $0xa4] ss:$0 sps:$4 sm:$0x11]  }
  0x57   : > { %1889 = vrot.lane.b32.xlu1 %v1888_v48, %s4821_s10  ;;  %v2127_v48 = vsel %vm279_vm0, %v2125_v41, %v2126_v43  ;;  %v4589_v43 = vld [vmem:[%s4905_s30 + $0x90] sm:$0xff]  }
  0x58   : > { %571 = vrot.lane.b32.xlu0 %v570_v55, %s4822_s11  ;;  %v4574_v55 = vld [vmem:[%s4905_s30 + $0x30] sm:$0xff]   ;;  %v2045_v47 = vshrl.u32 %v4589_v43, 16 }
  0x59   : > { %v819_v63 = vshrl.u32 %v4574_v55, 16  ;;  %v821_v4 = vshll.u32 %v4574_v55, 16  ;;  %v4593_v55 = vld [vmem:[%s4905_s30 + $0x38] ss:$0 sps:$4 sm:$0x11]  }
  0x5b   : > { %607 = vrot.lane.b32.xlu1 %v606_v62, %s4817_s6  ;;  %v1997_v62 = vrot.slane %v1995_v56, 1  ;;  %v823_v8 = vrot.slane %v821_v4, 1 }
  0x5c   : > { %1907 = vrot.lane.b32.xlu0 %v1906_v3, %s4822_s11  ;;  %v679_v3 = vrot.slane %v4573_v61, 1  ;;  %v876_v61 = vshrl.u32 %v4594_v49, 16 }
  0x5d   : > { %v1998_v7 = vsel %vm250_vm1, %v1993_v0, %v1997_v62  ;;  %v878_v62 = vshll.u32 %v4594_v49, 16  ;;  %v4609_v49 = vld [vmem:[%s4905_s30 + $0x90] sm:$0xff]  }
  0x5e   : > { %v680_v14 = vsel %vm279_vm0, %v678_v2, %v679_v3  ;;  %v4595_v2 = vld [vmem:[%s4905_s30 + $0x44] ss:$0 sps:$4 sm:$0x11]   ;;  %v4591_v3 = vld [vmem:[%s4905_s30 + $0x9c] sm:$0xff]   ;;  %v2266_v54 = vshrl.u32 %v4609_v49, 16 }
  0x5f   : > { %1943 = vrot.lane.b32.xlu1 %v1942_v10, %s4817_s6  ;;  %v826_v10 = vshll.u32 %v4575_v5, 16  ;;  %v880_v4 = vrot.slane %v878_v62, 1 }
  0x60   : > { %625 = vrot.lane.b32.xlu0 %v624_v13, %s4816_s5  ;;  %v824_v13 = vor.u32 %v823_v8, %v819_v63  ;;  %v4602_v63 = vld [vmem:[%s4905_s30] sm:$0xff]   ;;  %v4596_v8 = vld [vmem:[%s4905_s30 + $0x90] sm:$0xfe]  }
  0x61   : > { %v828_v15 = vrot.slane %v826_v10, 1  ;;  %238 = vst.msk [vmem:[#allocation2] sm:$0xff] %vm237_vm2, %v4602_v63  ;;  %v881_v10 = vor.u32 %v880_v4, %v876_v61  ;;  %v2071_v16 = vrot.slane %v4596_v8, 1  ;;  %v4615_v4 = vld [vmem:[%s4905_s30 + $0x44] ss:$0 sps:$4 sm:$0x11]  }
  0x63   : > { %774 = vrot.lane.b32.xlu1 %v773_v23, %s4817_s6  ;;  %v829_v20 = vsel %vm250_vm1, %v824_v13, %v828_v15  ;;  %v2160_v23 = vor.u32 %v2159_v19, %v2155_v6  ;;  %v2072_v19 = vrot.slane %v4597_v9, 1 }
  0x64   : > { %1961 = vrot.lane.b32.xlu0 %v1960_v24, %s4816_s5  ;;  %v4581_v24 = vld [vmem:[%s4905_s30 + $0x30] sm:$0xfe]  }
  0x65   : > { %v845_v29 = vrot.slane %v4581_v24, 1  ;;  %v2165_v30 = vsel %vm250_vm1, %v2160_v23, %v2164_v26  ;;  %v4603_v23 = vld [vmem:[%s4905_s30 + $0x30] sm:$0xff]  }
  0x67   : > { %2110 = vrot.lane.b32.xlu1 %v2109_v35, %s4817_s6  ;;  %v709_v35 = vshrl.u32 %v4586_v22, 16  ;;  %v4601_v22 = vld [vmem:[%s4905_s30 + $0x44] ss:$0 sps:$4 sm:$0x11]  }
  0x68   : > { %636 = vrot.lane.b32.xlu0 %v4560_v27, %s4815_s4  ;;  %v4582_v27 = vld [vmem:[%s4905_s30 + $0x38] ss:$0 sps:$4 sm:$0x11]  }
  0x69   : > { %v846_v31 = vrot.slane %v4582_v27, 1  ;;  %v902_v27 = vrot.slane %v4600_v21, 1 }
  0x6b   : > { %792 = vrot.lane.b32.xlu1 %v791_v40, %s4816_s5  ;;  %v4587_v40 = vld [vmem:[%s4905_s30 + $0x38] ss:$0 sps:$4 sm:$0x11]   ;;  %v847_v41 = vsel %vm279_vm0, %v845_v29, %v846_v31  ;;  %v903_v29 = vrot.slane %v4601_v22, 1  ;;  %v2073_v31 = vsel %vm279_vm0, %v2071_v16, %v2072_v19 }
  0x6c   : > { %1972 = vrot.lane.b32.xlu0 %v4563_v37, %s4815_s4  ;;  %v713_v37 = vrot.slane %v711_v33, 1  ;;  %v716_v42 = vshll.u32 %v4587_v40, 16  ;;  %v932_v33 = vshll.u32 %v4603_v23, 16  ;;  %v4607_v40 = vld [vmem:[%s4905_s30 + $0xc] sm:$0xff]  }
  0x6d   : > { %416 = vst.msk [vmem:[#allocation2 + $0x8] sm:$0xff] %vm237_vm2, %v4607_v40  ;;  %v4619_v22 = vld [vmem:[%s4905_s30 + $0xa4] ss:$0 sps:$4 sm:$0x11]  }
  0x6e   : > { %v714_v44 = vor.u32 %v713_v37, %v709_v35  ;;  %v718_v46 = vrot.slane %v716_v42, 1  ;;  %v4605_v35 = vld [vmem:[%s4905_s30 + $0x9c] sm:$0xfe]   ;;  %v934_v37 = vrot.slane %v932_v33, 1 }
  0x6f   : > { %2128 = vrot.lane.b32.xlu1 %v2127_v48, %s4816_s5  ;;  %v2047_v48 = vshll.u32 %v4589_v43, 16  ;;  %v4608_v42 = vld [vmem:[%s4905_s30 + $0x60] sm:$0xff]   ;;  %v904_v43 = vsel %vm279_vm0, %v902_v27, %v903_v29 }
  0x70   : > { %663 = vrot.lane.b32.xlu0 %v662_v58, %s4818_s7  ;;  %v719_v56 = vsel %vm250_vm1, %v714_v44, %v718_v46  ;;  %v2054_v58 = vrot.slane %v2052_v51, 1  ;;  %1585 = vst.msk [vmem:[#allocation2 + $0x40] sm:$0xff] %vm237_vm2, %v4608_v42  ;;  %v4620_v27 = vld [vmem:[%s4905_s30 + $0x3c] sm:$0xff]   ;;  %v4625_v40 = vld [vmem:[%s4905_s30 + $0xa4] ss:$0 sps:$4 sm:$0x11]  }
  0x71   : > { %v2049_v53 = vrot.slane %v2047_v48, 1  ;;  %v4621_v29 = vld [vmem:[%s4905_s30 + $0x3c] sm:$0xfe]  }
  0x72   : > { %v4623_v33 = vld [vmem:[%s4905_s30 + $0x9c] sm:$0xff]  }
  0x73   : > { %803 = vrot.lane.b32.xlu1 %v4568_v52, %s4815_s4  ;;  %v4598_v52 = vld [vmem:[%s4905_s30 + $0x9c] sm:$0xff]   ;;  %v2050_v59 = vor.u32 %v2049_v53, %v2045_v47  ;;  %v2239_v47 = vrot.slane %v4606_v39, 1 }
  0x74   : > { %1999 = vrot.lane.b32.xlu0 %v1998_v7, %s4818_s7  ;;  %v2214_v5 = vshll.u32 %v4598_v52, 16  ;;  %v883_v7 = vshll.u32 %v4595_v2, 16  ;;  %v2212_v13 = vshrl.u32 %v4598_v52, 16  ;;  %v4611_v52 = vld [vmem:[%s4905_s30 + $0x30] sm:$0xfe]  }
  0x75   : > { %v2055_v6 = vsel %vm250_vm1, %v2050_v59, %v2054_v58  ;;  %v956_v58 = vrot.slane %v4611_v52, 1  ;;  %v4613_v59 = vld [vmem:[%s4905_s30 + $0x6c] sm:$0xff]   ;;  %v4624_v39 = vld [vmem:[%s4905_s30 + $0x9c] sm:$0xfe]  }
  0x76   : > { %v885_v11 = vrot.slane %v883_v7, 1  ;;  %v2216_v17 = vrot.slane %v2214_v5, 1  ;;  %1752 = vst.msk [vmem:[#allocation2 + $0x48] sm:$0xff] %vm237_vm2, %v4613_v59  ;;  %v4618_v5 = vld [vmem:[%s4905_s30 + $0x9c] sm:$0xff]  }
  0x77   : > { %2139 = vrot.lane.b32.xlu1 %v4571_v1, %s4815_s4  ;;  %v736_v1 = vrot.slane %v4593_v55, 1  ;;  %v2268_v55 = vshll.u32 %v4609_v49, 16  ;;  %v2435_v19 = vshll.u32 %v4618_v5, 16 }
  0x78   : > { %681 = vrot.lane.b32.xlu0 %v680_v14, %s4819_s8  ;;  %v886_v24 = vsel %vm250_vm1, %v881_v10, %v885_v11  ;;  %v1104_v11 = vshll.u32 %v4615_v4, 16 }
  0x79   : > { %v737_v18 = vsel %vm279_vm0, %v735_v60, %v736_v1  ;;  %v2270_v61 = vrot.slane %v2268_v55, 1  ;;  %v4614_v1 = vld [vmem:[%s4905_s30 + $0x3c] sm:$0xff]   ;;  %v4630_v55 = vld [vmem:[%s4905_s30 + $0xa4] ss:$0 sps:$4 sm:$0x11]  }
  0x7a   : > { %v1097_v7 = vshrl.u32 %v4614_v1, 16  ;;  %v1099_v8 = vshll.u32 %v4614_v1, 16  ;;  %v1106_v16 = vrot.slane %v1104_v11, 1 }
  0x7b   : > { %830 = vrot.lane.b32.xlu1 %v829_v20, %s4818_s7  ;;  %v2219_v20 = vshll.u32 %v4599_v12, 16  ;;  %v2271_v2 = vor.u32 %v2270_v61, %v2266_v54  ;;  %v4616_v12 = vld [vmem:[%s4905_s30 + $0x90] sm:$0xfe]   ;;  %v2329_v61 = vshll.u32 %v4630_v55, 16 }
  0x7c   : > { %2017 = vrot.lane.b32.xlu0 %v2016_v25, %s4819_s8  ;;  %v2217_v25 = vor.u32 %v2216_v17, %v2212_v13  ;;  %v1101_v13 = vrot.slane %v1099_v8, 1  ;;  %v2292_v17 = vrot.slane %v4616_v12, 1  ;;  %v4631_v8 = vld [vmem:[%s4905_s30 + $0xa8] sm:$0xff]  }
  0x7d   : > { %v2221_v26 = vrot.slane %v2219_v20, 1 }
  0x7e   : > { %v1102_v21 = vor.u32 %v1101_v13, %v1097_v7 }
  0x7f   : > { %2166 = vrot.lane.b32.xlu1 %v2165_v30, %s4818_s7  ;;  %v930_v30 = vshrl.u32 %v4603_v23, 16  ;;  %v2222_v36 = vsel %vm250_vm1, %v2217_v25, %v2221_v26  ;;  %v2437_v25 = vrot.slane %v2435_v19, 1  ;;  %v2440_v26 = vshll.u32 %v4619_v22, 16  ;;  %v4636_v19 = vld [vmem:[%s4905_s30 + $0x9c] sm:$0xfe]  }
  0x80   : > { %693 = vrot.lane.b32.xlu0 %v4580_v28, %s4820_s9 }
  0x81   : > { %v935_v45 = vor.u32 %v934_v37, %v930_v30  ;;  %v4622_v30 = vld [vmem:[%s4905_s30 + $0x44] ss:$0 sps:$4 sm:$0x11]  }
  0x82   : > { %v1124_v37 = vrot.slane %v4622_v30, 1 }
  0x83   : > { %848 = vrot.lane.b32.xlu1 %v847_v41, %s4819_s8  ;;  %v2238_v41 = vrot.slane %v4605_v35, 1 }
  0x84   : > { %2029 = vrot.lane.b32.xlu0 %v4583_v38, %s4820_s9  ;;  %v937_v38 = vshll.u32 %v4604_v32, 16  ;;  %v2442_v32 = vrot.slane %v2440_v26, 1  ;;  %v4639_v26 = vld [vmem:[%s4905_s30 + $0xb0] ss:$0 sps:$4 sm:$0x11]  }
  0x85   : > { %v2240_v53 = vsel %vm279_vm0, %v2238_v41, %v2239_v47  ;;  %v2460_v47 = vrot.slane %v4625_v40, 1 }
  0x86   : > { %v939_v46 = vrot.slane %v937_v38, 1 }
  0x87   : > { %2184 = vrot.lane.b32.xlu1 %v2183_v50, %s4819_s8  ;;  %v4610_v50 = vld [vmem:[%s4905_s30 + $0x98] ss:$0 sps:$4 sm:$0x11]  }
  0x88   : > { %720 = vrot.lane.b32.xlu0 %v719_v56, %s4821_s10  ;;  %v940_v48 = vsel %vm250_vm1, %v935_v45, %v939_v46  ;;  %v2273_v56 = vshll.u32 %v4610_v50, 16  ;;  %v4627_v45 = vld [vmem:[%s4905_s30 + $0x44] ss:$0 sps:$4 sm:$0x11]  }
  0x89   : > { %v993_v49 = vshll.u32 %v4627_v45, 16  ;;  %v4649_v45 = vld [vmem:[%s5700_s1 + $0x8] sm:$0xff]  }
  0x8a   : > { %v2275_v62 = vrot.slane %v2273_v56, 1 }
  0x8b   : > { %860 = vrot.lane.b32.xlu1 %v4588_v57, %s4820_s9  ;;  %v4612_v57 = vld [vmem:[%s4905_s30 + $0x38] ss:$0 sps:$4 sm:$0x11]   ;;  %v995_v54 = vrot.slane %v993_v49, 1 }
  0x8c   : > { %2056 = vrot.lane.b32.xlu0 %v2055_v6, %s4821_s10  ;;  %v957_v63 = vrot.slane %v4612_v57, 1  ;;  %v2276_v9 = vsel %vm250_vm1, %v2271_v2, %v2275_v62  ;;  %v4628_v57 = vld [vmem:[%s4905_s30 + $0x48] sm:$0xff]   ;;  %v4632_v2 = vld [vmem:[%s4905_s30 + $0x3c] sm:$0xfe]  }
  0x8d   : > { %v4634_v62 = vld [vmem:[%s4905_s30 + $0x48] sm:$0xff]  }
  0x8e   : > { %v5106_v0 = vpop.permute.xlu0 %296  ;;  %v1155_v11 = vshll.u32 %v4634_v62, 16 }
  0x8f   : > { %2196 = vrot.lane.b32.xlu1 %v4591_v3, %s4820_s9  ;;  %v958_v3 = vsel %vm279_vm0, %v956_v58, %v957_v63 }
  0x90   : > { %738 = vrot.lane.b32.xlu0 %v737_v18, %s4822_s11 }
  0x91   : > { %v284_v14 = vpop.permute.xlu1 %283 }
  0x92   : > { %v5118_v15 = vpop.permute.xlu0 %1638 }
  0x93   : > { %887 = vrot.lane.b32.xlu1 %v886_v24, %s4821_s10 }
  0x94   : > { %2074 = vrot.lane.b32.xlu0 %v2073_v31, %s4822_s11 }
  0x95   : > { %v459_v28 = vpop.permute.xlu1 %458 }
  0x96   : > { %v1628_v34 = vpop.permute.xlu0 %1627 }
  0x97   : > { %2223 = vrot.lane.b32.xlu1 %v2222_v36, %s4821_s10  ;;  %v1123_v36 = vrot.slane %v4621_v29, 1 }
  0x98   : > { %905 = vrot.lane.b32.xlu0 %v904_v43, %s4822_s11 }
  0x99   : > { %v1795_v44 = vpop.permute.xlu1 %1794  ;;  %v1125_v43 = vsel %vm279_vm0, %v1123_v36, %v1124_v37 }
  0x9a   : > { %v264_v51 = vpop.permute.xlu0 %263 }
  0x9b   : > { %267 = vst.msk [vmem:[#allocation2] sm:$0xff] %vm266_vm3, %v264_v51  ;;  %941 = vrot.lane.b32.xlu1 %v940_v48, %s4817_s6  ;;  %v4629_v51 = vld [vmem:[%s4905_s30 + $0x9c] sm:$0xff]  }
  0x9c   : > { %287 = vst.msk [vmem:[#allocation2] sm:$0xff] %vm286_vm4, %v284_v14  ;;  %2241 = vrot.lane.b32.xlu0 %v2240_v53, %s4822_s11  ;;  %v2433_v14 = vshrl.u32 %v4618_v5, 16  ;;  %v2322_v58 = vshrl.u32 %v4629_v51, 16  ;;  %v2324_v59 = vshll.u32 %v4629_v51, 16  ;;  %v2331_v5 = vrot.slane %v2329_v61, 1  ;;  %v4651_v61 = vld [vmem:[%s4905_s30 + $0xa8] sm:$0xff]  }
  0x9d   : > { %v441_v60 = vpop.permute.xlu1 %440  ;;  %300 = vst.msk [vmem:[#allocation2] sm:$0xff] %vm299_vm5, %v5106_v0  ;;  %v4617_v0 = vld [vmem:[%s4905_s30 + $0x98] ss:$0 sps:$4 sm:$0x11]  }
  0x9e   : > { %443 = vst.msk [vmem:[#allocation2 + $0x8] sm:$0xff] %vm266_vm3, %v441_v60  ;;  %v1610_v6 = vpop.permute.xlu0 %1609  ;;  %v2293_v18 = vrot.slane %v4617_v0, 1  ;;  %v2326_v1 = vrot.slane %v2324_v59, 1  ;;  %v4635_v0 = vld [vmem:[%s4905_s30 + $0x50] ss:$0 sps:$4 sm:$0x11]  }
  0x9f   : > { %461 = vst.msk [vmem:[#allocation2 + $0x8] sm:$0xff] %vm286_vm4, %v459_v28  ;;  %2277 = vrot.lane.b32.xlu1 %v2276_v9, %s4817_s6  ;;  %v2438_v28 = vor.u32 %v2437_v25, %v2433_v14  ;;  %v1012_v9 = vrot.slane %v4632_v2, 1  ;;  %v1157_v14 = vrot.slane %v1155_v11, 1  ;;  %v2348_v25 = vrot.slane %v4636_v19, 1  ;;  %v4653_v2 = vld [vmem:[%s4905_s30 + $0x18] sm:$0xff]  }
  0xa0   : > { %1612 = vst.msk [vmem:[#allocation2 + $0x40] sm:$0xff] %vm266_vm3, %v1610_v6  ;;  %959 = vrot.lane.b32.xlu0 %v958_v3, %s4816_s5  ;;  %v2294_v23 = vsel %vm279_vm0, %v2292_v17, %v2293_v18  ;;  %v4633_v3 = vld [vmem:[%s4905_s30 + $0x44] ss:$0 sps:$4 sm:$0x11]   ;;  %v1153_v6 = vshrl.u32 %v4634_v62, 16  ;;  %v2327_v7 = vor.u32 %v2326_v1, %v2322_v58  ;;  %v1160_v18 = vshll.u32 %v4635_v0, 16 }
  0xa1   : > { %v1777_v10 = vpop.permute.xlu1 %1776  ;;  %1630 = vst.msk [vmem:[#allocation2 + $0x40] sm:$0xff] %vm286_vm4, %v1628_v34  ;;  %v4626_v34 = vld [vmem:[%s4905_s30 + $0x3c] sm:$0xff]   ;;  %v2443_v38 = vsel %vm250_vm1, %v2438_v28, %v2442_v32  ;;  %v4648_v51 = vld [vmem:[%s4905_s30 + $0x50] ss:$0 sps:$4 sm:$0x11]  }
  0xa2   : > { %1779 = vst.msk [vmem:[#allocation2 + $0x48] sm:$0xff] %vm266_vm3, %v1777_v10  ;;  %v325_v20 = vpop.permute.xlu0 %324  ;;  %v986_v41 = vshrl.u32 %v4626_v34, 16  ;;  %v988_v48 = vshll.u32 %v4626_v34, 16  ;;  %v1013_v10 = vrot.slane %v4633_v3, 1  ;;  %v2332_v13 = vsel %vm250_vm1, %v2327_v7, %v2331_v5  ;;  %v4641_v34 = vld [vmem:[%s4905_s30 + $0x48] sm:$0xfe]  }
  0xa3   : > { %1797 = vst.msk [vmem:[#allocation2 + $0x48] sm:$0xff] %vm286_vm4, %v1795_v44  ;;  %v2459_v44 = vrot.slane %v4624_v39, 1  ;;  %v1158_v22 = vor.u32 %v1157_v14, %v1153_v6  ;;  %v4642_v39 = vld [vmem:[%s4905_s30 + $0x50] ss:$0 sps:$4 sm:$0x11]   ;;  %v1050_v59 = vshll.u32 %v4648_v51, 16 }
  0xa4   : > { %1641 = vst.msk [vmem:[#allocation2 + $0x40] sm:$0xff] %vm299_vm5, %v5118_v15  ;;  %v1107_v15 = vsel %vm250_vm1, %v1102_v21, %v1106_v16  ;;  %2295 = vrot.lane.b32.xlu0 %v2294_v23, %s4816_s5  ;;  %v990_v50 = vrot.slane %v988_v48, 1  ;;  %v4638_v16 = vld [vmem:[%s4905_s30 + $0xa8] sm:$0xff]   ;;  %v1014_v21 = vsel %vm279_vm0, %v1012_v9, %v1013_v10  ;;  %v4646_v48 = vld [vmem:[%s4905_s30 + $0xb0] ss:$0 sps:$4 sm:$0x11]  }
  0xa5   : > { %328 = vst.msk [vmem:[#allocation2] sm:$0xff] %vm327_vm6, %v325_v20  ;;  %v470_v24 = vpop.permute.xlu1 %469  ;;  %1108 = vrot.lane.b32.xlu1 %v1107_v15, %s4817_s6  ;;  %v2461_v53 = vsel %vm279_vm0, %v2459_v44, %v2460_v47  ;;  %v4637_v20 = vld [vmem:[%s4905_s30 + $0xa4] ss:$0 sps:$4 sm:$0x11]   ;;  %v2491_v28 = vshll.u32 %v4638_v16, 16  ;;  %v1180_v44 = vrot.slane %v4642_v39, 1 }
  0xa6   : > { %472 = vst.msk [vmem:[#allocation2 + $0x8] sm:$0xff] %vm299_vm5, %v470_v24  ;;  %v1666_v31 = vpop.permute.xlu0 %1665  ;;  %v991_v56 = vor.u32 %v990_v50, %v986_v41  ;;  %v1162_v24 = vrot.slane %v1160_v18, 1  ;;  %v2349_v15 = vrot.slane %v4637_v20, 1  ;;  %v1179_v41 = vrot.slane %v4641_v34, 1  ;;  %v4645_v47 = vld [vmem:[%s4905_s30 + $0xa8] sm:$0xfe]  }
  0xa7   : > { %1668 = vst.msk [vmem:[#allocation2 + $0x40] sm:$0xff] %vm327_vm6, %v1666_v31  ;;  %v2496_v31 = vshll.u32 %v4639_v26, 16  ;;  %v4643_v50 = vld [vmem:[%s4905_s30 + $0xa8] sm:$0xff]   ;;  %v4652_v62 = vld [vmem:[%s4905_s30 + $0xb0] ss:$0 sps:$4 sm:$0x11]  }
  0xa8   : > { %970 = vrot.lane.b32.xlu0 %v4620_v27, %s4815_s4  ;;  %v996_v63 = vsel %vm250_vm1, %v991_v56, %v995_v54  ;;  %v2489_v27 = vshrl.u32 %v4638_v16, 16  ;;  %v1163_v30 = vsel %vm250_vm1, %v1158_v22, %v1162_v24  ;;  %v2350_v32 = vsel %vm279_vm0, %v2348_v25, %v2349_v15  ;;  %v4650_v10 = vld [vmem:[%s4905_s30 + $0x54] sm:$0xff]   ;;  %583 = vst.msk [vmem:[#allocation2 + $0x10] sm:$0xff] %vm237_vm2, %v4653_v2  ;;  %v4656_v16 = vld [vmem:[%s4905_s30 + $0x48] sm:$0xfe]  }
  0xa9   : > { %v1806_v35 = vpop.permute.xlu1 %1805  ;;  %2444 = vrot.lane.b32.xlu1 %v2443_v38, %s4817_s6  ;;  %v2498_v37 = vrot.slane %v2496_v31, 1  ;;  %v4640_v38 = vld [vmem:[%s4905_s30 + $0x48] sm:$0xff]   ;;  %v1181_v55 = vsel %vm279_vm0, %v1179_v41, %v1180_v44  ;;  %v2515_v56 = vrot.slane %v4645_v47, 1  ;;  %v1052_v1 = vrot.slane %v1050_v59, 1  ;;  %v4658_v14 = vld [vmem:[%s4905_s30 + $0x78] sm:$0xff]  }
  0xaa   : > { %1808 = vst.msk [vmem:[#allocation2 + $0x48] sm:$0xff] %vm299_vm5, %v1806_v35  ;;  %v344_v42 = vpop.permute.xlu0 %343  ;;  %v4644_v35 = vld [vmem:[%s5700_s1] sm:$0xff]   ;;  %v2379_v5 = vshrl.u32 %v4651_v61, 16  ;;  %v2381_v6 = vshll.u32 %v4651_v61, 16  ;;  %v2386_v7 = vshll.u32 %v4652_v62, 16  ;;  %v1069_v22 = vrot.slane %v4656_v16, 1 }
  0xab   : > { %347 = vst.msk [vmem:[#allocation2] sm:$0xff] %vm346_vm7, %v344_v42  ;;  %4381 = vmatprep.subr.bf16.mxu0 %v4644_v35  ;;  %v4647_v42 = vld [vmem:[%s4905_s30 + $0x48] sm:$0xff]   ;;  %4419 = vmatprep.subr.bf16.mxu1 %v4644_v35  ;;  %v4657_v20 = vld [vmem:[%s4905_s30 + $0x50] ss:$0 sps:$4 sm:$0x11]  }
  0xac   : > { %2306 = vrot.lane.b32.xlu0 %v4623_v33, %s4815_s4  ;;  %v2493_v33 = vrot.slane %v2491_v28, 1  ;;  %4382 = vmatpush3.bf16.msra.mxu0 %v4644_v35  ;;  %v2388_v0 = vrot.slane %v2386_v7, 1  ;;  %1919 = vst.msk [vmem:[#allocation2 + $0x50] sm:$0xff] %vm237_vm2, %v4658_v14  ;;  %v1070_v15 = vrot.slane %v4657_v20, 1  ;;  %v4663_v26 = vld [vmem:[%s4905_s30 + $0x24] sm:$0xff]  }
  0xad   : > { %v497_v46 = vpop.permute.xlu1 %496  ;;  %1126 = vrot.lane.b32.xlu1 %v1125_v43, %s4816_s5  ;;  %4383 = vmatprep.subr.bf16.mxu0 %v4649_v45  ;;  %750 = vst.msk [vmem:[#allocation2 + $0x18] sm:$0xff] %vm237_vm2, %v4663_v26  ;;  %v4665_v47 = vld [vmem:[%s4905_s30 + $0xbc] ss:$0 sps:$4 sm:$0x11]   ;;  %v4666_v51 = vld [vmem:[%s4905_s30 + $0x54] sm:$0xfe]  }
  0xae   : > { %499 = vst.msk [vmem:[#allocation2 + $0x8] sm:$0xff] %vm327_vm6, %v497_v46  ;;  %v1684_v52 = vpop.permute.xlu0 %1683  ;;  %v2494_v40 = vor.u32 %v2493_v33, %v2489_v27  ;;  %4422 = vmatpush3.bf16.msra.mxu1 %v4644_v35  ;;  %v4660_v27 = vld [vmem:[%s4905_s30 + $0x5c] ss:$0 sps:$4 sm:$0x11]   ;;  %v1071_v33 = vsel %vm279_vm0, %v1069_v22, %v1070_v15 }
  0xaf   : > { %1686 = vst.msk [vmem:[#allocation2 + $0x40] sm:$0xff] %vm346_vm7, %v1684_v52  ;;  %v1043_v52 = vshrl.u32 %v4647_v42, 16  ;;  %4420 = vmatprep.subr.bf16.mxu1 %v4649_v45  ;;  %v1217_v35 = vshll.u32 %v4660_v27, 16 }
  0xb0   : > { %997 = vrot.lane.b32.xlu0 %v996_v63, %s4818_s7  ;;  %v2499_v46 = vsel %vm250_vm1, %v2494_v40, %v2498_v37  ;;  %4384 = vmatpush3.bf16.msra.mxu0 %v4649_v45 }
  0xb1   : > { %v1833_v60 = vpop.permute.xlu1 %1832  ;;  %2462 = vrot.lane.b32.xlu1 %v2461_v53, %s4816_s5  ;;  %v1045_v53 = vshll.u32 %v4647_v42, 16  ;;  %v1219_v41 = vrot.slane %v1217_v35, 1  ;;  %v4678_v35 = vld [vmem:[%s4905_s30 + $0x5c] ss:$0 sps:$4 sm:$0x11]  }
  0xb2   : > { %1835 = vst.msk [vmem:[#allocation2 + $0x48] sm:$0xff] %vm327_vm6, %v1833_v60  ;;  %v357_v4 = vpop.permute.xlu0 %356  ;;  %4423 = vmatpush3.bf16.msra.mxu1 %v4649_v45 }
  0xb3   : > { %360 = vst.msk [vmem:[#allocation2] sm:$0xff] %vm359_vm8, %v357_v4  ;;  %v1047_v58 = vrot.slane %v1045_v53, 1  ;;  %v2553_v53 = vshll.u32 %v4665_v47, 16 }
  0xb4   : > { %2333 = vrot.lane.b32.xlu0 %v2332_v13, %s4818_s7 }
  0xb5   : > { %v515_v12 = vpop.permute.xlu1 %514  ;;  %1137 = vrot.lane.b32.xlu1 %v4628_v57, %s4815_s4  ;;  %v2516_v57 = vrot.slane %v4646_v48, 1  ;;  %v1048_v63 = vor.u32 %v1047_v58, %v1043_v52  ;;  %v1236_v58 = vrot.slane %v4666_v51, 1  ;;  %v4682_v51 = vld [vmem:[%s4905_s30 + $0xbc] ss:$0 sps:$4 sm:$0x11]  }
  0xb6   : > { %517 = vst.msk [vmem:[#allocation2 + $0x8] sm:$0xff] %vm346_vm7, %v515_v12  ;;  %v1696_v17 = vpop.permute.xlu0 %1695  ;;  %v2383_v12 = vrot.slane %v2381_v6, 1 }
  0xb7   : > { %1698 = vst.msk [vmem:[#allocation2 + $0x40] sm:$0xff] %vm359_vm8, %v1696_v17  ;;  %v2517_v4 = vsel %vm279_vm0, %v2515_v56, %v2516_v57  ;;  %v1053_v9 = vsel %vm250_vm1, %v1048_v63, %v1052_v1  ;;  %v4669_v63 = vld [vmem:[%s4905_s30 + $0x48] sm:$0xff]   ;;  %v4670_v1 = vld [vmem:[%s4905_s30 + $0x50] ss:$0 sps:$4 sm:$0x11]  }
  0xb8   : > { %1015 = vrot.lane.b32.xlu0 %v1014_v21, %s4819_s8  ;;  %v2384_v18 = vor.u32 %v2383_v12, %v2379_v5  ;;  %v4655_v21 = vld [vmem:[%s4905_s30 + $0xb4] sm:$0xff]   ;;  %v1264_v5 = vshrl.u32 %v4669_v63, 16  ;;  %v1266_v6 = vshll.u32 %v4669_v63, 16  ;;  %v1271_v7 = vshll.u32 %v4670_v1, 16 }
  0xb9   : > { %v1851_v23 = vpop.permute.xlu1 %1850  ;;  %2473 = vrot.lane.b32.xlu1 %v4631_v8, %s4815_s4  ;;  %v4654_v8 = vld [vmem:[%s5700_s1 + $0x10] ss:$0 sps:$4 sm:$0x33]  }
  0xba   : > { %1853 = vst.msk [vmem:[#allocation2 + $0x48] sm:$0xff] %vm346_vm7, %v1851_v23  ;;  %v385_v29 = vpop.permute.xlu0 %384  ;;  %4425 = vmatprep.subr.msk.bf16.mxu0 %vm2998_vm12, %v4654_v8  ;;  %v3000_v13 = vsel %vm2998_vm12, %v4654_v8, 0  ;;  %4426 = vmatprep.subr.msk.bf16.mxu1 %vm2998_vm12, %v4654_v8  ;;  %v4659_v23 = vld [vmem:[%s4905_s30 + $0x54] sm:$0xff]   ;;  %v2389_v24 = vsel %vm250_vm1, %v2384_v18, %v2388_v0  ;;  %v1268_v12 = vrot.slane %v1266_v6, 1  ;;  %v1273_v0 = vrot.slane %v1271_v7, 1 }
  0xbb   : > { %388 = vst.msk [vmem:[#allocation2] sm:$0xff] %vm387_vm9, %v385_v29  ;;  %4386 = vmatpush3.bf16.msra.mxu0 %v3000_v13  ;;  %4424 = vmatpush3.bf16.msra.mxu1 %v3000_v13  ;;  %v1210_v28 = vshrl.u32 %v4659_v23, 16  ;;  %v1212_v29 = vshll.u32 %v4659_v23, 16  ;;  %v4671_v8 = vld [vmem:[%s4905_s30 + $0xb4] sm:$0xfe]  }
  0xbc   : > { %2351 = vrot.lane.b32.xlu0 %v2350_v32, %s4819_s8  ;;  %v2572_v13 = vrot.slane %v4671_v8, 1  ;;  %v4674_v18 = vld [vmem:[%s4905_s30 + $0xb0] ss:$0 sps:$4 sm:$0x11]   ;;  %v4687_v6 = vld [vmem:[%s4905_s30 + $0xb4] sm:$0xfe]  }
  0xbd   : > { %v527_v36 = vpop.permute.xlu1 %526  ;;  %1164 = vrot.lane.b32.xlu1 %v1163_v30, %s4818_s7  ;;  %v4664_v30 = vld [vmem:[%s4905_s30 + $0xb4] sm:$0xff]   ;;  %v1214_v34 = vrot.slane %v1212_v29, 1  ;;  %v4688_v7 = vld [vmem:[%s4905_s30 + $0xbc] ss:$0 sps:$4 sm:$0x11]  }
  0xbe   : > { %529 = vst.msk [vmem:[#allocation2 + $0x8] sm:$0xff] %vm359_vm8, %v527_v36  ;;  %v1723_v43 = vpop.permute.xlu0 %1722  ;;  %v4661_v36 = vld [vmem:[%s4905_s30 + $0xa8] sm:$0xfe]   ;;  %v2546_v39 = vshrl.u32 %v4664_v30, 16  ;;  %v2548_v48 = vshll.u32 %v4664_v30, 16 }
  0xbf   : > { %1725 = vst.msk [vmem:[#allocation2 + $0x40] sm:$0xff] %vm387_vm9, %v1723_v43  ;;  %v1215_v40 = vor.u32 %v1214_v34, %v1210_v28  ;;  %v2405_v42 = vrot.slane %v4661_v36, 1  ;;  %v4676_v28 = vld [vmem:[%s4905_s30 + $0x50] ss:$0 sps:$4 sm:$0x11]  }
  0xc0   : > { %1027 = vrot.lane.b32.xlu0 %v4640_v38, %s4820_s9  ;;  %v4662_v38 = vld [vmem:[%s4905_s30 + $0xb0] ss:$0 sps:$4 sm:$0x11]   ;;  %v2550_v52 = vrot.slane %v2548_v48, 1 }
  0xc1   : > { %v1863_v49 = vpop.permute.xlu1 %1862  ;;  %2500 = vrot.lane.b32.xlu1 %v2499_v46, %s4818_s7  ;;  %v2406_v45 = vrot.slane %v4662_v38, 1  ;;  %v1220_v46 = vsel %vm250_vm1, %v1215_v40, %v1219_v41  ;;  %v1438_v41 = vshll.u32 %v4678_v35, 16  ;;  %v4696_v35 = vld [vmem:[%s4905_s30 + $0x5c] ss:$0 sps:$4 sm:$0x11]  }
  0xc2   : > { %1865 = vst.msk [vmem:[#allocation2 + $0x48] sm:$0xff] %vm359_vm8, %v1863_v49  ;;  %v404_v54 = vpop.permute.xlu0 %403  ;;  %v2551_v59 = vor.u32 %v2550_v52, %v2546_v39 }
  0xc3   : > { %407 = vst.msk [vmem:[#allocation2] sm:$0xff] %vm406_vm10, %v404_v54  ;;  %v2407_v49 = vsel %vm279_vm0, %v2405_v42, %v2406_v45  ;;  %v4667_v54 = vld [vmem:[%s4905_s30 + $0x5c] ss:$0 sps:$4 sm:$0x11]   ;;  %v4679_v42 = vld [vmem:[%s4905_s30 + $0xa8] sm:$0xfe]  }
  0xc4   : > { %2363 = vrot.lane.b32.xlu0 %v4643_v50, %s4820_s9  ;;  %v1237_v61 = vrot.slane %v4667_v54, 1  ;;  %v1440_v47 = vrot.slane %v1438_v41, 1  ;;  %v2626_v48 = vrot.slane %v4679_v42, 1  ;;  %v4698_v42 = vld [vmem:[%s4905_s30 + $0x68] ss:$0 sps:$4 sm:$0x11]  }
  0xc5   : > { %v554_v60 = vpop.permute.xlu1 %553  ;;  %1182 = vrot.lane.b32.xlu1 %v1181_v55, %s4819_s8  ;;  %v4668_v55 = vld [vmem:[%s4905_s30 + $0x84] sm:$0xff]  }
  0xc6   : > { %556 = vst.msk [vmem:[#allocation2 + $0x8] sm:$0xff] %vm387_vm9, %v554_v60  ;;  %v1741_v3 = vpop.permute.xlu0 %1740  ;;  %v2555_v60 = vrot.slane %v2553_v53, 1  ;;  %v4683_v53 = vld [vmem:[%s4905_s30 + $0x54] sm:$0xff]  }
  0xc7   : > { %1743 = vst.msk [vmem:[#allocation2 + $0x40] sm:$0xff] %vm406_vm10, %v1741_v3  ;;  %v1238_v3 = vsel %vm279_vm0, %v1236_v58, %v1237_v61  ;;  %v2774_v58 = vshll.u32 %v4682_v51, 16  ;;  %v4685_v61 = vld [vmem:[%s4905_s30 + $0x5c] ss:$0 sps:$4 sm:$0x11]  }
  0xc8   : > { %1054 = vrot.lane.b32.xlu0 %v1053_v9, %s4821_s10  ;;  %2086 = vst.msk [vmem:[#allocation2 + $0x58] sm:$0xff] %vm237_vm2, %v4668_v55  ;;  %v2556_v2 = vsel %vm250_vm1, %v2551_v59, %v2555_v60  ;;  %v4673_v9 = vld [vmem:[%s4905_s30 + $0xa8] sm:$0xff]   ;;  %v4684_v59 = vld [vmem:[%s4905_s30 + $0x54] sm:$0xfe]   ;;  %v1458_v1 = vrot.slane %v4685_v61, 1 }
  0xc9   : > { %v1890_v11 = vpop.permute.xlu1 %1889  ;;  %2518 = vrot.lane.b32.xlu1 %v2517_v4, %s4819_s8  ;;  %v2600_v16 = vshrl.u32 %v4673_v9, 16  ;;  %v1457_v63 = vrot.slane %v4684_v59, 1 }
  0xca   : > { %1892 = vst.msk [vmem:[#allocation2 + $0x48] sm:$0xff] %vm387_vm9, %v1890_v11  ;;  %v572_v17 = vpop.permute.xlu0 %571  ;;  %v2913_v19 = vld [vmem:[#allocation2] sm:$0xff] }
  0xcb   : > { %574 = vst.msk [vmem:[#allocation2 + $0x8] sm:$0xff] %vm406_vm10, %v572_v17  ;;  %4387 = vmatprep.mubr.msk.bf16.mxu0 %vm2949_vm11, %v2913_v19  ;;  %v4677_v11 = vld [vmem:[%s4905_s30 + $0x54] sm:$0xff]   ;;  %v1269_v19 = vor.u32 %v1268_v12, %v1264_v5  ;;  %v4690_v12 = vld [vmem:[%s4905_s30 + $0x5c] ss:$0 sps:$4 sm:$0x11]  }
  0xcc   : > { %2390 = vrot.lane.b32.xlu0 %v2389_v24, %s4821_s10  ;;  %v1431_v22 = vshrl.u32 %v4677_v11, 16  ;;  %v2607_v24 = vshll.u32 %v4674_v18, 16  ;;  %v1433_v15 = vshll.u32 %v4677_v11, 16  ;;  %v4686_v5 = vld [vmem:[%s4905_s30 + $0xb4] sm:$0xff]   ;;  %v2794_v11 = vrot.slane %v4688_v7, 1  ;;  %v4703_v7 = vld [vmem:[%s4905_s30 + $0x60] sm:$0xff]  }
  0xcd   : > { %v608_v25 = vpop.permute.xlu1 %607  ;;  %1194 = vrot.lane.b32.xlu1 %v4650_v10, %s4820_s9  ;;  %v4672_v10 = vld [vmem:[%s4905_s30 + $0xbc] ss:$0 sps:$4 sm:$0x11]   ;;  %v1274_v26 = vsel %vm250_vm1, %v1269_v19, %v1273_v0 }
  0xce   : > { %610 = vst.msk [vmem:[#allocation2 + $0x10] sm:$0xff] %vm266_vm3, %v608_v25  ;;  %v1908_v31 = vpop.permute.xlu0 %1907  ;;  %v2921_v32 = vld [vmem:[#allocation2 + $0x40] sm:$0xff]  ;;  %v2573_v17 = vrot.slane %v4672_v10, 1  ;;  %v4675_v25 = vld [vmem:[%s4905_s30 + $0x48] sm:$0xfe]   ;;  %v2609_v30 = vrot.slane %v2607_v24, 1 }
  0xcf   : > { %1910 = vst.msk [vmem:[#allocation2 + $0x48] sm:$0xff] %vm406_vm10, %v1908_v31  ;;  %4403 = vmatprep.mubr.msk.bf16.mxu1 %vm2949_vm11, %v2921_v32  ;;  %v1290_v31 = vrot.slane %v4675_v25, 1  ;;  %v1435_v36 = vrot.slane %v1433_v15, 1  ;;  %v2793_v10 = vrot.slane %v4687_v6, 1  ;;  %v4697_v25 = vld [vmem:[%s4905_s30 + $0x60] sm:$0xff]  }
  0xd0   : > { %1072 = vrot.lane.b32.xlu0 %v1071_v33, %s4822_s11  ;;  %v2574_v23 = vsel %vm279_vm0, %v2572_v13, %v2573_v17  ;;  %v1291_v33 = vrot.slane %v4676_v28, 1  ;;  %v1327_v17 = vshll.u32 %v4690_v12, 16 }
  0xd1   : > { %v1944_v37 = vpop.permute.xlu1 %1943  ;;  %2530 = vrot.lane.b32.xlu1 %v4655_v21, %s4820_s9  ;;  %v2602_v21 = vshll.u32 %v4673_v9, 16  ;;  %v1436_v40 = vor.u32 %v1435_v36, %v1431_v22  ;;  %v1459_v9 = vsel %vm279_vm0, %v1457_v63, %v1458_v1  ;;  %v4701_v36 = vld [vmem:[%s4905_s30 + $0xc0] sm:$0xff]  }
  0xd2   : > { %1946 = vst.msk [vmem:[#allocation2 + $0x50] sm:$0xff] %vm266_vm3, %v1944_v37  ;;  %v626_v43 = vpop.permute.xlu0 %625  ;;  %v2914_v44 = vld [vmem:[#allocation2 + $0x8] sm:$0xff]  ;;  %v1292_v39 = vsel %vm279_vm0, %v1290_v31, %v1291_v33  ;;  %v1329_v22 = vrot.slane %v1327_v17, 1  ;;  %v2823_v51 = vshrl.u32 %v4701_v36, 16  ;;  %v4709_v63 = vld [vmem:[%s4905_s30 + $0x60] sm:$0xff]  }
  0xd3   : > { %628 = vst.msk [vmem:[#allocation2 + $0x10] sm:$0xff] %vm286_vm4, %v626_v43  ;;  %4388 = vmatmul.mubr.msk.bf16.vlgmr.msra.gmra.mrb[0].mxu0 %vm2949_vm11, %v2914_v44  ;;  %v2604_v27 = vrot.slane %v2602_v21, 1  ;;  %v4681_v37 = vld [vmem:[%s4905_s30 + $0xb4] sm:$0xff]   ;;  %v4680_v43 = vld [vmem:[%s4905_s30 + $0xb0] ss:$0 sps:$4 sm:$0x11]   ;;  %v1441_v54 = vsel %vm250_vm1, %v1436_v40, %v1440_v47  ;;  %v2795_v21 = vsel %vm279_vm0, %v2793_v10, %v2794_v11 }
  0xd4   : > { %2408 = vrot.lane.b32.xlu0 %v2407_v49, %s4822_s11  ;;  %v2767_v45 = vshrl.u32 %v4681_v37, 16  ;;  %v2627_v49 = vrot.slane %v4680_v43, 1  ;;  %v1347_v40 = vrot.slane %v4696_v35, 1  ;;  %v1489_v43 = vshll.u32 %v4697_v25, 16  ;;  %v4706_v17 = vld [vmem:[%s4905_s30 + $0xc0] sm:$0xff]  }
  0xd5   : > { %v775_v50 = vpop.permute.xlu1 %774  ;;  %1221 = vrot.lane.b32.xlu1 %v1220_v46, %s4821_s10  ;;  %v2605_v32 = vor.u32 %v2604_v27, %v2600_v16  ;;  %v2769_v46 = vshll.u32 %v4681_v37, 16  ;;  %v4692_v16 = vld [vmem:[%s4905_s30 + $0xb4] sm:$0xff]   ;;  %v1494_v47 = vshll.u32 %v4698_v42, 16  ;;  %v4719_v42 = vld [vmem:[%s4905_s30 + $0x6c] sm:$0xff]  }
  0xd6   : > { %777 = vst.msk [vmem:[#allocation2 + $0x18] sm:$0xff] %vm266_vm3, %v775_v50  ;;  %v1962_v56 = vpop.permute.xlu0 %1961  ;;  %v2922_v57 = vld [vmem:[#allocation2 + $0x48] sm:$0xff]  ;;  %v2628_v55 = vsel %vm279_vm0, %v2626_v48, %v2627_v49  ;;  %v2658_v24 = vshll.u32 %v4692_v16, 16 }
  0xd7   : > { %1964 = vst.msk [vmem:[#allocation2 + $0x50] sm:$0xff] %vm286_vm4, %v1962_v56  ;;  %4404 = vmatmul.mubr.msk.bf16.vlgmr.msra.gmra.mrb[0].mxu1 %vm2949_vm11, %v2922_v57  ;;  %v2610_v38 = vsel %vm250_vm1, %v2605_v32, %v2609_v30  ;;  %v2771_v52 = vrot.slane %v2769_v46, 1  ;;  %v1487_v30 = vshrl.u32 %v4697_v25, 16  ;;  %v1491_v46 = vrot.slane %v1489_v43, 1  ;;  %v4699_v48 = vld [vmem:[%s4905_s30 + $0xb4] sm:$0xfe]  }
  0xd8   : > { %1239 = vrot.lane.b32.xlu0 %v1238_v3, %s4822_s11  ;;  %v4689_v3 = vld [vmem:[%s4905_s30 + $0x54] sm:$0xff]   ;;  %v4712_v25 = vld [vmem:[%s4905_s30 + $0xc0] sm:$0xff]  }
  0xd9   : > { %v2111_v62 = vpop.permute.xlu1 %2110  ;;  %2557 = vrot.lane.b32.xlu1 %v2556_v2, %s4821_s10  ;;  %v2772_v57 = vor.u32 %v2771_v52, %v2767_v45  ;;  %v1320_v0 = vshrl.u32 %v4689_v3, 16  ;;  %v1322_v13 = vshll.u32 %v4689_v3, 16  ;;  %v1492_v52 = vor.u32 %v1491_v46, %v1487_v30  ;;  %v4723_v46 = vld [vmem:[%s4905_s30 + $0x3c] sm:$0xff]  }
  0xda   : > { %2113 = vst.msk [vmem:[#allocation2 + $0x58] sm:$0xff] %vm266_vm3, %v2111_v62  ;;  %v637_v4 = vpop.permute.xlu0 %636  ;;  %v2776_v62 = vrot.slane %v2774_v58, 1  ;;  %v4702_v58 = vld [vmem:[%s4905_s30 + $0xc8] ss:$0 sps:$4 sm:$0x11]   ;;  %v2713_v30 = vshrl.u32 %v4712_v25, 16 }
  0xdb   : > { %639 = vst.msk [vmem:[#allocation2 + $0x10] sm:$0xff] %vm299_vm5, %v637_v4  ;;  %v1324_v18 = vrot.slane %v1322_v13, 1 }
  0xdc   : > { %2575 = vrot.lane.b32.xlu0 %v2574_v23, %s4822_s11  ;;  %v2777_v4 = vsel %vm250_vm1, %v2772_v57, %v2776_v62  ;;  %v2656_v23 = vshrl.u32 %v4692_v16, 16  ;;  %v2830_v62 = vshll.u32 %v4702_v58, 16  ;;  %v1379_v16 = vshll.u32 %v4709_v63, 16  ;;  %1084 = vst.msk [vmem:[#allocation2 + $0x28] sm:$0xff] %vm237_vm2, %v4723_v46 }
  0xdd   : > { %v793_v14 = vpop.permute.xlu1 %792  ;;  %1275 = vrot.lane.b32.xlu1 %v1274_v26, %s4817_s6  ;;  %v1325_v15 = vor.u32 %v1324_v18, %v1320_v0  ;;  %v4691_v26 = vld [vmem:[%s4905_s30 + $0x60] sm:$0xff]  }
  0xde   : > { %795 = vst.msk [vmem:[#allocation2 + $0x18] sm:$0xff] %vm286_vm4, %v793_v14  ;;  %v1973_v20 = vpop.permute.xlu0 %1972  ;;  %v2832_v6 = vrot.slane %v2830_v62, 1  ;;  %v4707_v0 = vld [vmem:[%s4905_s30 + $0xc0] sm:$0xfe]   ;;  %v4724_v62 = vld [vmem:[%s4905_s30 + $0xcc] sm:$0xff]  }
  0xdf   : > { %1975 = vst.msk [vmem:[#allocation2 + $0x50] sm:$0xff] %vm299_vm5, %v1973_v20  ;;  %v4693_v20 = vld [vmem:[%s4905_s30 + $0xbc] ss:$0 sps:$4 sm:$0x11]   ;;  %v1330_v31 = vsel %vm250_vm1, %v1325_v15, %v1329_v22  ;;  %v2849_v18 = vrot.slane %v4707_v0, 1  ;;  %v1381_v22 = vrot.slane %v1379_v16, 1 }
  0xe0   : > { %1293 = vrot.lane.b32.xlu0 %v1292_v39, %s4816_s5  ;;  %v2663_v27 = vshll.u32 %v4693_v20, 16 }
  0xe1   : > { %v2129_v29 = vpop.permute.xlu1 %2128  ;;  %2611 = vrot.lane.b32.xlu1 %v2610_v38, %s4817_s6  ;;  %v4694_v38 = vld [vmem:[%s4905_s30 + $0xc0] sm:$0xff]  }
  0xe2   : > { %2131 = vst.msk [vmem:[#allocation2 + $0x58] sm:$0xff] %vm286_vm4, %v2129_v29  ;;  %v664_v34 = vpop.permute.xlu0 %663  ;;  %v2660_v29 = vrot.slane %v2658_v24, 1  ;;  %v2665_v32 = vrot.slane %v2663_v27, 1  ;;  %v4713_v27 = vld [vmem:[%s4905_s30 + $0xc8] ss:$0 sps:$4 sm:$0x11]  }
  0xe3   : > { %666 = vst.msk [vmem:[#allocation2 + $0x10] sm:$0xff] %vm327_vm6, %v664_v34  ;;  %v4695_v34 = vld [vmem:[%s4905_s30 + $0x54] sm:$0xfe]  }
  0xe4   : > { %2629 = vrot.lane.b32.xlu0 %v2628_v55, %s4816_s5  ;;  %v2661_v37 = vor.u32 %v2660_v29, %v2656_v23  ;;  %v1346_v39 = vrot.slane %v4695_v34, 1 }
  0xe5   : > { %v804_v44 = vpop.permute.xlu1 %803  ;;  %1442 = vrot.lane.b32.xlu1 %v1441_v54, %s4817_s6  ;;  %v2682_v54 = vrot.slane %v4699_v48, 1 }
  0xe6   : > { %806 = vst.msk [vmem:[#allocation2 + $0x18] sm:$0xff] %vm299_vm5, %v804_v44  ;;  %v2000_v50 = vpop.permute.xlu0 %1999  ;;  %v2666_v44 = vsel %vm250_vm1, %v2661_v37, %v2665_v32  ;;  %v1348_v49 = vsel %vm279_vm0, %v1346_v39, %v1347_v40  ;;  %v4718_v37 = vld [vmem:[%s4905_s30 + $0x90] sm:$0xff]  }
  0xe7   : > { %2002 = vst.msk [vmem:[#allocation2 + $0x50] sm:$0xff] %vm327_vm6, %v2000_v50  ;;  %v4700_v50 = vld [vmem:[%s4905_s30 + $0xbc] ss:$0 sps:$4 sm:$0x11]   ;;  %v4711_v39 = vld [vmem:[%s4905_s30 + $0x6c] sm:$0xff]  }
  0xe8   : > { %1304 = vrot.lane.b32.xlu0 %v4683_v53, %s4815_s4  ;;  %v1496_v53 = vrot.slane %v1494_v47, 1  ;;  %v2683_v57 = vrot.slane %v4700_v50, 1  ;;  %2253 = vst.msk [vmem:[#allocation2 + $0x60] sm:$0xff] %vm237_vm2, %v4718_v37 }
  0xe9   : > { %v2140_v56 = vpop.permute.xlu1 %2139  ;;  %2778 = vrot.lane.b32.xlu1 %v2777_v4, %s4817_s6  ;;  %v4704_v4 = vld [vmem:[%s4905_s30 + $0x60] sm:$0xfe]  }
  0xea   : > { %2142 = vst.msk [vmem:[#allocation2 + $0x58] sm:$0xff] %vm299_vm5, %v2140_v56  ;;  %v682_v60 = vpop.permute.xlu0 %681  ;;  %v2825_v56 = vshll.u32 %v4701_v36, 16  ;;  %v1497_v61 = vsel %vm250_vm1, %v1492_v52, %v1496_v53  ;;  %v2684_v1 = vsel %vm279_vm0, %v2682_v54, %v2683_v57  ;;  %v1513_v10 = vrot.slane %v4704_v4, 1  ;;  %v4715_v53 = vld [vmem:[%s4905_s30 + $0xcc] sm:$0xff]  }
  0xeb   : > { %684 = vst.msk [vmem:[#allocation2 + $0x10] sm:$0xff] %vm346_vm7, %v682_v60  ;;  %v4720_v54 = vld [vmem:[%s4905_s30 + $0x74] ss:$0 sps:$4 sm:$0x11]  }
  0xec   : > { %2640 = vrot.lane.b32.xlu0 %v4686_v5, %s4815_s4  ;;  %v2827_v60 = vrot.slane %v2825_v56, 1  ;;  %v4705_v5 = vld [vmem:[%s4905_s30 + $0x68] ss:$0 sps:$4 sm:$0x11]  }
  0xed   : > { %v831_v2 = vpop.permute.xlu1 %830  ;;  %1460 = vrot.lane.b32.xlu1 %v1459_v9, %s4816_s5  ;;  %v1514_v11 = vrot.slane %v4705_v5, 1 }
  0xee   : > { %833 = vst.msk [vmem:[#allocation2 + $0x18] sm:$0xff] %vm327_vm6, %v831_v2  ;;  %v2018_v8 = vpop.permute.xlu0 %2017  ;;  %v2828_v2 = vor.u32 %v2827_v60, %v2823_v51 }
  0xef   : > { %2020 = vst.msk [vmem:[#allocation2 + $0x50] sm:$0xff] %vm346_vm7, %v2018_v8  ;;  %v1377_v8 = vshrl.u32 %v4709_v63, 16  ;;  %v1515_v23 = vsel %vm279_vm0, %v1513_v10, %v1514_v11  ;;  %v4722_v63 = vld [vmem:[%s4905_s30 + $0xc8] ss:$0 sps:$4 sm:$0x11]   ;;  %v2882_v10 = vshll.u32 %v4724_v62, 16 }
  0xf0   : > { %1331 = vrot.lane.b32.xlu0 %v1330_v31, %s4818_s7  ;;  %v2833_v12 = vsel %vm250_vm1, %v2828_v2, %v2832_v6  ;;  %v2715_v31 = vshll.u32 %v4712_v25, 16  ;;  %v2740_v6 = vrot.slane %v4722_v63, 1 }
  0xf1   : > { %v2167_v14 = vpop.permute.xlu1 %2166  ;;  %2796 = vrot.lane.b32.xlu1 %v2795_v21, %s4816_s5  ;;  %v1382_v15 = vor.u32 %v1381_v22, %v1377_v8  ;;  %v2884_v16 = vrot.slane %v2882_v10, 1  ;;  %s210_s5 = sand.u32 1, %s4797_s13  }
  0xf2   : > { %2169 = vst.msk [vmem:[#allocation2 + $0x58] sm:$0xff] %vm327_vm6, %v2167_v14  ;;  %v694_v19 = vpop.permute.xlu0 %693  ;;  %v4708_v14 = vld [vmem:[%s4905_s30 + $0xc8] ss:$0 sps:$4 sm:$0x11]   ;;  %v2717_v36 = vrot.slane %v2715_v31, 1 }
  0xf3   : > { %696 = vst.msk [vmem:[#allocation2 + $0x10] sm:$0xff] %vm359_vm8, %v694_v19  ;;  %v4710_v19 = vld [vmem:[%s4905_s30 + $0x68] ss:$0 sps:$4 sm:$0x11]   ;;  %v2850_v21 = vrot.slane %v4708_v14, 1 }
  0xf4   : > { %2667 = vrot.lane.b32.xlu0 %v2666_v44, %s4818_s7  ;;  %v1384_v24 = vshll.u32 %v4710_v19, 16  ;;  %v2718_v43 = vor.u32 %v2717_v36, %v2713_v30  ;;  %v4716_v44 = vld [vmem:[%s4905_s30 + $0x60] sm:$0xfe]   ;;  %v4727_v19 = vld [vmem:[%s4905_s30 + $0x74] ss:$0 sps:$4 sm:$0x11]  }
  0xf5   : > { %v849_v28 = vpop.permute.xlu1 %848  ;;  %1471 = vrot.lane.b32.xlu1 %v4691_v26, %s4815_s4  ;;  %v2851_v35 = vsel %vm279_vm0, %v2849_v18, %v2850_v21  ;;  %v1403_v50 = vrot.slane %v4716_v44, 1  ;;  %v4726_v18 = vld [vmem:[%s4905_s30 + $0x6c] sm:$0xfe]   ;;  %v1571_v25 = vrot.slane %v4727_v19, 1  ;;  %v4734_v30 = vld [vmem:[%s4905_s30 + $0xb4] sm:$0xff]  }
  0xf6   : > { %851 = vst.msk [vmem:[#allocation2 + $0x18] sm:$0xff] %vm346_vm7, %v849_v28  ;;  %v2030_v33 = vpop.permute.xlu0 %2029  ;;  %v4714_v28 = vld [vmem:[%s4905_s30 + $0x30] sm:$0xff]   ;;  %v1386_v29 = vrot.slane %v1384_v24, 1 }
  0xf7   : > { %2032 = vst.msk [vmem:[#allocation2 + $0x50] sm:$0xff] %vm359_vm8, %v2030_v33  ;;  %v2720_v33 = vshll.u32 %v4713_v27, 16  ;;  %v4733_v27 = vld [vmem:[%s4905_s30 + $0x54] sm:$0xff]  }
  0xf8   : > { %1349 = vrot.lane.b32.xlu0 %v1348_v49, %s4819_s8  ;;  %917 = vst.msk [vmem:[#allocation2 + $0x20] sm:$0xff] %vm237_vm2, %v4714_v28  ;;  %v1544_v49 = vshrl.u32 %v4719_v42, 16  ;;  %1418 = vst.msk [vmem:[#allocation2 + $0x38] sm:$0xff] %vm237_vm2, %v4733_v27 }
  0xf9   : > { %v2185_v41 = vpop.permute.xlu1 %2184  ;;  %2807 = vrot.lane.b32.xlu1 %v4694_v38, %s4815_s4  ;;  %v1387_v38 = vsel %vm250_vm1, %v1382_v15, %v1386_v29  ;;  %v2722_v40 = vrot.slane %v2720_v33, 1  ;;  %v4730_v29 = vld [vmem:[%s4905_s30 + $0xd4] ss:$0 sps:$4 sm:$0x11]   ;;  %2754 = vst.msk [vmem:[#allocation2 + $0x78] sm:$0xff] %vm237_vm2, %v4734_v30 }
  0xfa   : > { %2187 = vst.msk [vmem:[#allocation2 + $0x58] sm:$0xff] %vm346_vm7, %v2185_v41  ;;  %v721_v45 = vpop.permute.xlu0 %720  ;;  %v2907_v33 = vrot.slane %v4730_v29, 1 }
  0xfb   : > { %723 = vst.msk [vmem:[#allocation2 + $0x10] sm:$0xff] %vm387_vm9, %v721_v45  ;;  %v4717_v45 = vld [vmem:[%s4905_s30 + $0x68] ss:$0 sps:$4 sm:$0x11]   ;;  %v2723_v52 = vsel %vm250_vm1, %v2718_v43, %v2722_v40 }
  0xfc   : > { %2685 = vrot.lane.b32.xlu0 %v2684_v1, %s4819_s8  ;;  %v1404_v51 = vrot.slane %v4717_v45, 1  ;;  %v4728_v1 = vld [vmem:[%s4905_s30 + $0x9c] sm:$0xff]  }
  0xfd   : > { %v861_v55 = vpop.permute.xlu1 %860  ;;  %1498 = vrot.lane.b32.xlu1 %v1497_v61, %s4818_s7  ;;  %v4721_v61 = vld [vmem:[%s4905_s30 + $0xc0] sm:$0xfe]   ;;  %2420 = vst.msk [vmem:[#allocation2 + $0x68] sm:$0xff] %vm237_vm2, %v4728_v1 }
  0xfe   : > { %863 = vst.msk [vmem:[#allocation2 + $0x18] sm:$0xff] %vm359_vm8, %v861_v55  ;;  %v2057_v59 = vpop.permute.xlu0 %2056  ;;  %v1546_v55 = vshll.u32 %v4719_v42, 16  ;;  %v1405_v2 = vsel %vm279_vm0, %v1403_v50, %v1404_v51  ;;  %v2739_v5 = vrot.slane %v4721_v61, 1 }
  0xff   : > { %2059 = vst.msk [vmem:[#allocation2 + $0x50] sm:$0xff] %vm387_vm9, %v2057_v59  ;;  %v1551_v59 = vshll.u32 %v4720_v54, 16 }
 0x100   : > { %1361 = vrot.lane.b32.xlu0 %v4703_v7, %s4820_s9  ;;  %v1548_v58 = vrot.slane %v1546_v55, 1  ;;  %v2880_v7 = vshrl.u32 %v4724_v62, 16  ;;  %v2741_v14 = vsel %vm279_vm0, %v2739_v5, %v2740_v6 }
 0x101   : > { %v2197_v3 = vpop.permute.xlu1 %2196  ;;  %2834 = vrot.lane.b32.xlu1 %v2833_v12, %s4818_s7  ;;  %v1553_v4 = vrot.slane %v1551_v59, 1  ;;  %v4731_v12 = vld [vmem:[%s4905_s30 + $0x48] sm:$0xff]   ;;  %s3558_s7 = sshll.u32 %s210_s5, 7 }
 0x102   : > { %2199 = vst.msk [vmem:[#allocation2 + $0x58] sm:$0xff] %vm359_vm8, %v2197_v3  ;;  %v739_v9 = vpop.permute.xlu0 %738  ;;  %v1549_v3 = vor.u32 %v1548_v58, %v1544_v49  ;;  %v2885_v21 = vor.u32 %v2884_v16, %v2880_v7 }
 0x103   : > { %741 = vst.msk [vmem:[#allocation2 + $0x10] sm:$0xff] %vm406_vm10, %v739_v9  ;;  %v4725_v9 = vld [vmem:[%s4905_s30 + $0xd4] ss:$0 sps:$4 sm:$0x11]  }
 0x104   : > { %2697 = vrot.lane.b32.xlu0 %v4706_v17, %s4820_s9  ;;  %v1554_v0 = vsel %vm250_vm1, %v1549_v3, %v1553_v4  ;;  %v2887_v17 = vshll.u32 %v4725_v9, 16  ;;  %1251 = vst.msk [vmem:[#allocation2 + $0x30] sm:$0xff] %vm237_vm2, %v4731_v12 }
 0x105   : > { %v888_v13 = vpop.permute.xlu1 %887  ;;  %1516 = vrot.lane.b32.xlu1 %v1515_v23, %s4819_s8  ;;  %v1570_v23 = vrot.slane %v4726_v18, 1 }
 0x106   : > { %890 = vst.msk [vmem:[#allocation2 + $0x18] sm:$0xff] %vm387_vm9, %v888_v13  ;;  %v2075_v20 = vpop.permute.xlu0 %2074  ;;  %v2889_v22 = vrot.slane %v2887_v17, 1 }
 0x107   : > { %2077 = vst.msk [vmem:[#allocation2 + $0x50] sm:$0xff] %vm406_vm10, %v2075_v20  ;;  %v4732_v20 = vld [vmem:[%s4905_s30 + $0xa8] sm:$0xff]   ;;  %v1572_v31 = vsel %vm279_vm0, %v1570_v23, %v1571_v25 }
 0x108   : > { %1388 = vrot.lane.b32.xlu0 %v1387_v38, %s4821_s10  ;;  %2587 = vst.msk [vmem:[#allocation2 + $0x70] sm:$0xff] %vm237_vm2, %v4732_v20  ;;  %v2890_v28 = vsel %vm250_vm1, %v2885_v21, %v2889_v22 }
 0x109   : > { %v2224_v26 = vpop.permute.xlu1 %2223  ;;  %2852 = vrot.lane.b32.xlu1 %v2851_v35, %s4819_s8  ;;  %s5575_s8 = scalar_lea.vmem [#allocation3], %s3558_s7 }
 0x10a   : > { %2226 = vst.msk [vmem:[#allocation2 + $0x58] sm:$0xff] %vm387_vm9, %v2224_v26  ;;  %v906_v32 = vpop.permute.xlu0 %905  ;;  %v2915_v34 = vld [vmem:[#allocation2 + $0x10] sm:$0xff]  ;;  %v4729_v26 = vld [vmem:[%s4905_s30 + $0xcc] sm:$0xfe]  }
 0x10b   : > { %908 = vst.msk [vmem:[#allocation2 + $0x18] sm:$0xff] %vm406_vm10, %v906_v32  ;;  %4391 = vmatprep.mubr.msk.bf16.mxu0 %vm2949_vm11, %v2915_v34  ;;  %v2906_v32 = vrot.slane %v4729_v26, 1 }
 0x10c   : > { %2724 = vrot.lane.b32.xlu0 %v2723_v52, %s4821_s10 }
 0x10d   : > { %v942_v41 = vpop.permute.xlu1 %941  ;;  %1528 = vrot.lane.b32.xlu1 %v4711_v39, %s4820_s9  ;;  %v2908_v36 = vsel %vm279_vm0, %v2906_v32, %v2907_v33 }
 0x10e   : > { %944 = vst.msk [vmem:[#allocation2 + $0x20] sm:$0xff] %vm266_vm3, %v942_v41  ;;  %v2242_v47 = vpop.permute.xlu0 %2241  ;;  %v2923_v48 = vld [vmem:[#allocation2 + $0x50] sm:$0xff] }
 0x10f   : > { %2244 = vst.msk [vmem:[#allocation2 + $0x58] sm:$0xff] %vm406_vm10, %v2242_v47  ;;  %4407 = vmatprep.mubr.msk.bf16.mxu1 %vm2949_vm11, %v2923_v48 }
 0x110   : > { %1406 = vrot.lane.b32.xlu0 %v1405_v2, %s4822_s11 }
 0x111   : > { %v2278_v56 = vpop.permute.xlu1 %2277  ;;  %2864 = vrot.lane.b32.xlu1 %v4715_v53, %s4820_s9  ;;  %s4266_s9 = sshll.u32 %s4805_s15, 11  ;;  %s5652_s15 = scalar_lea.sflag [#allocation4], %s210_s5 }
 0x112   : > { %v960_v57 = vpop.permute.xlu0 %959  ;;  %v2916_v60 = vld [vmem:[#allocation2 + $0x18] sm:$0xff]  ;;  %2280 = vst.msk [vmem:[#allocation2 + $0x60] sm:$0xff] %vm266_vm3, %v2278_v56  ;;  %s5644_s19 = scalar_lea.hbm %s5702_s3, %s4266_s9 }
 0x113   : > { %962 = vst.msk [vmem:[#allocation2 + $0x20] sm:$0xff] %vm286_vm4, %v960_v57  ;;  %4392 = vmatmul.mubr.msk.bf16.gmra.mrb[4].mxu0 %vm2949_vm11, %v2916_v60 }
 0x114   : > { %2742 = vrot.lane.b32.xlu0 %v2741_v14, %s4822_s11 }
 0x115   : > { %1555 = vrot.lane.b32.xlu1 %v1554_v0, %s4821_s10 }
 0x116   : > { %v2296_v8 = vpop.permute.xlu0 %2295  ;;  %v2924_v11 = vld [vmem:[#allocation2 + $0x58] sm:$0xff] }
 0x117   : > { %v1109_v13 = vpop.permute.xlu1 %1108  ;;  %2298 = vst.msk [vmem:[#allocation2 + $0x60] sm:$0xff] %vm286_vm4, %v2296_v8  ;;  %4408 = vmatmul.mubr.msk.bf16.gmra.mrb[4].mxu1 %vm2949_vm11, %v2924_v11 }
 0x118   : > { %1111 = vst.msk [vmem:[#allocation2 + $0x28] sm:$0xff] %vm266_vm3, %v1109_v13  ;;  %1573 = vrot.lane.b32.xlu0 %v1572_v31, %s4822_s11 }
 0x119   : > { %2891 = vrot.lane.b32.xlu1 %v2890_v28, %s4821_s10  ;;  %s3445_s10 = sshll.u32 %s5575_s8, 4  ;;  %s5646_s10 = int_to_ptr.vmem [resolvable:$true] %s3445_s10 }
 0x11a   : > { %v971_v24 = vpop.permute.xlu0 %970  ;;  %s4735_s21 = scalar_lea.vmem %s5646_s10, 2048  ;;  %p4742_p1 = scmp.lt.s32.totalorder %s5646_s10, %s4740_s26 }
 0x11b   : > { %v2445_v15 = vpop.permute.xlu1 %2444  ;;  %973 = vst.msk [vmem:[#allocation2 + $0x20] sm:$0xff] %vm299_vm5, %v971_v24  ;;  %p4736_p12 = scmp.ne.s32.totalorder %s5646_s10, %s4735_s21  ;;  %p4743_p2 = scmp.lt.s32.totalorder %s4741_s27, %s4735_s21 }
 0x11c   : > { %2447 = vst.msk [vmem:[#allocation2 + $0x68] sm:$0xff] %vm266_vm3, %v2445_v15 }
 0x11d   : > { %2909 = vrot.lane.b32.xlu1 %v2908_v36, %s4822_s11  ;;  %v5549_v36 = vld [vmem:[%s5701_s2] ss:$0 sm:$0xff]  ;;  %p4737_p13 = pnand %p4736_p12, %p4885_p4  ;;  %p4744_p3 = por %p4743_p2, %p4742_p1 }
 0x11e   : > { %v2307_v34 = vpop.permute.xlu0 %2306 }
 0x11f   : > { %v1127_v35 = vpop.permute.xlu1 %1126  ;;  %2309 = vst.msk [vmem:[#allocation2 + $0x60] sm:$0xff] %vm299_vm5, %v2307_v34  ;;  %p4738_p0 = pneg %p4737_p13 }
 0x120   : > { %1129 = vst.msk [vmem:[#allocation2 + $0x28] sm:$0xff] %vm286_vm4, %v1127_v35 }
 0x121   : > { %p4745_p5 = pnand %p4744_p3, %p4738_p0 }
 0x122   : > { %v998_v38 = vpop.permute.xlu0 %997 }
 0x123   : > { %v2463_v37 = vpop.permute.xlu1 %2462  ;;  %1000 = vst.msk [vmem:[#allocation2 + $0x20] sm:$0xff] %vm327_vm6, %v998_v38  ;;  %v5554_v38 = vld [vmem:[%s5701_s2 + $0x1] ss:$0 sm:$0xff] }
 0x124   : > { %2465 = vst.msk [vmem:[#allocation2 + $0x68] sm:$0xff] %vm286_vm4, %v2463_v37 }
 0x126   : > { %v2334_v40 = vpop.permute.xlu0 %2333 }
 0x127   : > { %v1138_v39 = vpop.permute.xlu1 %1137  ;;  %2336 = vst.msk [vmem:[#allocation2 + $0x60] sm:$0xff] %vm327_vm6, %v2334_v40 }
 0x128   : > { %1140 = vst.msk [vmem:[#allocation2 + $0x28] sm:$0xff] %vm299_vm5, %v1138_v39 }
 0x12a   : > { %v1016_v42 = vpop.permute.xlu0 %1015 }
 0x12b   : > { %v2474_v41 = vpop.permute.xlu1 %2473  ;;  %1018 = vst.msk [vmem:[#allocation2 + $0x20] sm:$0xff] %vm346_vm7, %v1016_v42 }
 0x12c   : > { %2476 = vst.msk [vmem:[#allocation2 + $0x68] sm:$0xff] %vm299_vm5, %v2474_v41 }
 0x12e   : > { %v2352_v44 = vpop.permute.xlu0 %2351 }
 0x12f   : > { %v1165_v43 = vpop.permute.xlu1 %1164  ;;  %2354 = vst.msk [vmem:[#allocation2 + $0x60] sm:$0xff] %vm346_vm7, %v2352_v44 }
 0x130   : > { %1167 = vst.msk [vmem:[#allocation2 + $0x28] sm:$0xff] %vm327_vm6, %v1165_v43 }
 0x132   : > { %v1028_v46 = vpop.permute.xlu0 %1027 }
 0x133   : > { %v2501_v45 = vpop.permute.xlu1 %2500  ;;  %1030 = vst.msk [vmem:[#allocation2 + $0x20] sm:$0xff] %vm359_vm8, %v1028_v46 }
 0x134   : > { %2503 = vst.msk [vmem:[#allocation2 + $0x68] sm:$0xff] %vm327_vm6, %v2501_v45 }
 0x136   : > { %v2364_v48 = vpop.permute.xlu0 %2363 }
 0x137   : > { %v1183_v47 = vpop.permute.xlu1 %1182  ;;  %2366 = vst.msk [vmem:[#allocation2 + $0x60] sm:$0xff] %vm359_vm8, %v2364_v48 }
 0x138   : > { %1185 = vst.msk [vmem:[#allocation2 + $0x28] sm:$0xff] %vm346_vm7, %v1183_v47 }
 0x13a   : > { %v1055_v50 = vpop.permute.xlu0 %1054 }
 0x13b   : > { %v2519_v49 = vpop.permute.xlu1 %2518  ;;  %1057 = vst.msk [vmem:[#allocation2 + $0x20] sm:$0xff] %vm387_vm9, %v1055_v50 }
 0x13c   : > { %2521 = vst.msk [vmem:[#allocation2 + $0x68] sm:$0xff] %vm346_vm7, %v2519_v49 }
 0x13e   : > { %v2391_v52 = vpop.permute.xlu0 %2390 }
 0x13f   : > { %v1195_v51 = vpop.permute.xlu1 %1194  ;;  %2393 = vst.msk [vmem:[#allocation2 + $0x60] sm:$0xff] %vm387_vm9, %v2391_v52 }
 0x140   : > { %1197 = vst.msk [vmem:[#allocation2 + $0x28] sm:$0xff] %vm359_vm8, %v1195_v51 }
 0x142   : > { %v1073_v54 = vpop.permute.xlu0 %1072 }
 0x143   : > { %v2531_v53 = vpop.permute.xlu1 %2530  ;;  %1075 = vst.msk [vmem:[#allocation2 + $0x20] sm:$0xff] %vm406_vm10, %v1073_v54 }
 0x144   : > { %2533 = vst.msk [vmem:[#allocation2 + $0x68] sm:$0xff] %vm359_vm8, %v2531_v53 }
 0x146   : > { %v2409_v56 = vpop.permute.xlu0 %2408 }
 0x147   : > { %v1222_v55 = vpop.permute.xlu1 %1221  ;;  %2411 = vst.msk [vmem:[#allocation2 + $0x60] sm:$0xff] %vm406_vm10, %v2409_v56 }
 0x148   : > { %1224 = vst.msk [vmem:[#allocation2 + $0x28] sm:$0xff] %vm387_vm9, %v1222_v55 }
 0x14a   : > { %v1240_v58 = vpop.permute.xlu0 %1239  ;;  %v2917_v59 = vld [vmem:[#allocation2 + $0x20] sm:$0xff] }
 0x14b   : > { %v2558_v57 = vpop.permute.xlu1 %2557  ;;  %1242 = vst.msk [vmem:[#allocation2 + $0x28] sm:$0xff] %vm406_vm10, %v1240_v58  ;;  %4395 = vmatprep.mubr.msk.bf16.mxu0 %vm2949_vm11, %v2917_v59 }
 0x14c   : > { %2560 = vst.msk [vmem:[#allocation2 + $0x68] sm:$0xff] %vm387_vm9, %v2558_v57 }
 0x14e   : > { %v2925_v60 = vld [vmem:[#allocation2 + $0x60] sm:$0xff]  ;;  %v2576_v61 = vpop.permute.xlu0 %2575 }
 0x14f   : > { %4411 = vmatprep.mubr.msk.bf16.mxu1 %vm2949_vm11, %v2925_v60  ;;  %v1276_v62 = vpop.permute.xlu1 %1275  ;;  %2578 = vst.msk [vmem:[#allocation2 + $0x68] sm:$0xff] %vm406_vm10, %v2576_v61 }
 0x150   : > { %1278 = vst.msk [vmem:[#allocation2 + $0x30] sm:$0xff] %vm266_vm3, %v1276_v62 }
 0x152   : > { %v2918_v63 = vld [vmem:[#allocation2 + $0x28] sm:$0xff]  ;;  %v1294_v2 = vpop.permute.xlu0 %1293 }
 0x153   : > { %4396 = vmatmul.mubr.msk.bf16.gmra.mrb[8].mxu0 %vm2949_vm11, %v2918_v63  ;;  %v2612_v1 = vpop.permute.xlu1 %2611  ;;  %1296 = vst.msk [vmem:[#allocation2 + $0x30] sm:$0xff] %vm286_vm4, %v1294_v2 }
 0x154   : > { %2614 = vst.msk [vmem:[#allocation2 + $0x70] sm:$0xff] %vm266_vm3, %v2612_v1 }
 0x156   : > { %v2926_v3 = vld [vmem:[#allocation2 + $0x68] sm:$0xff]  ;;  %v2630_v5 = vpop.permute.xlu0 %2629 }
 0x157   : > { %v1443_v4 = vpop.permute.xlu1 %1442  ;;  %4412 = vmatmul.mubr.msk.bf16.gmra.mrb[8].mxu1 %vm2949_vm11, %v2926_v3  ;;  %2632 = vst.msk [vmem:[#allocation2 + $0x70] sm:$0xff] %vm286_vm4, %v2630_v5 }
 0x158   : > { %1445 = vst.msk [vmem:[#allocation2 + $0x38] sm:$0xff] %vm266_vm3, %v1443_v4 }
 0x15a   : > { %v1305_v6 = vpop.permute.xlu0 %1304 }
 0x15b   : > { %v2779_v7 = vpop.permute.xlu1 %2778  ;;  %1307 = vst.msk [vmem:[#allocation2 + $0x30] sm:$0xff] %vm299_vm5, %v1305_v6 }
 0x15c   : > { %2781 = vst.msk [vmem:[#allocation2 + $0x78] sm:$0xff] %vm266_vm3, %v2779_v7 }
 0x15e   : > { %v2641_v8 = vpop.permute.xlu0 %2640 }
 0x15f   : > { %v1461_v9 = vpop.permute.xlu1 %1460  ;;  %2643 = vst.msk [vmem:[#allocation2 + $0x70] sm:$0xff] %vm299_vm5, %v2641_v8 }
 0x160   : > { %1463 = vst.msk [vmem:[#allocation2 + $0x38] sm:$0xff] %vm286_vm4, %v1461_v9 }
 0x162   : > { %v1332_v11 = vpop.permute.xlu0 %1331 }
 0x163   : > { %v2797_v10 = vpop.permute.xlu1 %2796  ;;  %1334 = vst.msk [vmem:[#allocation2 + $0x30] sm:$0xff] %vm327_vm6, %v1332_v11 }
 0x164   : > { %2799 = vst.msk [vmem:[#allocation2 + $0x78] sm:$0xff] %vm286_vm4, %v2797_v10 }
 0x166   : > { %v2668_v0 = vpop.permute.xlu0 %2667 }
 0x167   : > { %v1472_v12 = vpop.permute.xlu1 %1471  ;;  %2670 = vst.msk [vmem:[#allocation2 + $0x70] sm:$0xff] %vm327_vm6, %v2668_v0 }
 0x168   : > { %1474 = vst.msk [vmem:[#allocation2 + $0x38] sm:$0xff] %vm299_vm5, %v1472_v12 }
 0x16a   : > { %v1350_v14 = vpop.permute.xlu0 %1349 }
 0x16b   : > { %v2808_v13 = vpop.permute.xlu1 %2807  ;;  %1352 = vst.msk [vmem:[#allocation2 + $0x30] sm:$0xff] %vm346_vm7, %v1350_v14 }
 0x16c   : > { %2810 = vst.msk [vmem:[#allocation2 + $0x78] sm:$0xff] %vm299_vm5, %v2808_v13 }
 0x16e   : > { %v2686_v17 = vpop.permute.xlu0 %2685 }
 0x16f   : > { %v1499_v16 = vpop.permute.xlu1 %1498  ;;  %2688 = vst.msk [vmem:[#allocation2 + $0x70] sm:$0xff] %vm346_vm7, %v2686_v17 }
 0x170   : > { %1501 = vst.msk [vmem:[#allocation2 + $0x38] sm:$0xff] %vm327_vm6, %v1499_v16 }
 0x172   : > { %v1362_v19 = vpop.permute.xlu0 %1361 }
 0x173   : > { %v2835_v18 = vpop.permute.xlu1 %2834  ;;  %1364 = vst.msk [vmem:[#allocation2 + $0x30] sm:$0xff] %vm359_vm8, %v1362_v19 }
 0x174   : > { %2837 = vst.msk [vmem:[#allocation2 + $0x78] sm:$0xff] %vm327_vm6, %v2835_v18 }
 0x176   : > { %v2698_v21 = vpop.permute.xlu0 %2697 }
 0x177   : > { %v1517_v20 = vpop.permute.xlu1 %1516  ;;  %2700 = vst.msk [vmem:[#allocation2 + $0x70] sm:$0xff] %vm359_vm8, %v2698_v21 }
 0x178   : > { %1519 = vst.msk [vmem:[#allocation2 + $0x38] sm:$0xff] %vm346_vm7, %v1517_v20 }
 0x17a   : > { %v1389_v23 = vpop.permute.xlu0 %1388 }
 0x17b   : > { %v2853_v22 = vpop.permute.xlu1 %2852  ;;  %1391 = vst.msk [vmem:[#allocation2 + $0x30] sm:$0xff] %vm387_vm9, %v1389_v23 }
 0x17c   : > { %2855 = vst.msk [vmem:[#allocation2 + $0x78] sm:$0xff] %vm346_vm7, %v2853_v22 }
 0x17e   : > { %v2725_v25 = vpop.permute.xlu0 %2724 }
 0x17f   : > { %v1529_v24 = vpop.permute.xlu1 %1528  ;;  %2727 = vst.msk [vmem:[#allocation2 + $0x70] sm:$0xff] %vm387_vm9, %v2725_v25 }
 0x180   : > { %1531 = vst.msk [vmem:[#allocation2 + $0x38] sm:$0xff] %vm359_vm8, %v1529_v24 }
 0x182   : > { %v1407_v26 = vpop.permute.xlu0 %1406 }
 0x183   : > { %v2865_v15 = vpop.permute.xlu1 %2864  ;;  %1409 = vst.msk [vmem:[#allocation2 + $0x30] sm:$0xff] %vm406_vm10, %v1407_v26 }
 0x184   : > { %2867 = vst.msk [vmem:[#allocation2 + $0x78] sm:$0xff] %vm359_vm8, %v2865_v15 }
 0x186   : > { %v2743_v28 = vpop.permute.xlu0 %2742 }
 0x187   : > { %v1556_v27 = vpop.permute.xlu1 %1555  ;;  %2745 = vst.msk [vmem:[#allocation2 + $0x70] sm:$0xff] %vm406_vm10, %v2743_v28 }
 0x188   : > { %1558 = vst.msk [vmem:[#allocation2 + $0x38] sm:$0xff] %vm387_vm9, %v1556_v27 }
 0x18a   : > { %v1574_v30 = vpop.permute.xlu0 %1573  ;;  %v2919_v31 = vld [vmem:[#allocation2 + $0x30] sm:$0xff] }
 0x18b   : > { %v2892_v29 = vpop.permute.xlu1 %2891  ;;  %1576 = vst.msk [vmem:[#allocation2 + $0x38] sm:$0xff] %vm406_vm10, %v1574_v30  ;;  %4399 = vmatprep.mubr.msk.bf16.mxu0 %vm2949_vm11, %v2919_v31 }
 0x18c   : > { %2894 = vst.msk [vmem:[#allocation2 + $0x78] sm:$0xff] %vm387_vm9, %v2892_v29 }
 0x18e   : > { %v2927_v33 = vld [vmem:[#allocation2 + $0x70] sm:$0xff] }
 0x18f   : > { %v2910_v32 = vpop.permute.xlu1 %2909  ;;  %4415 = vmatprep.mubr.msk.bf16.mxu1 %vm2949_vm11, %v2927_v33 }
 0x190   : > { %2912 = vst.msk [vmem:[#allocation2 + $0x78] sm:$0xff] %vm406_vm10, %v2910_v32 }
 0x192   : > { %v2920_v34 = vld [vmem:[#allocation2 + $0x38] sm:$0xff] }
 0x193   : > { %4400 = vmatmul.mubr.msk.bf16.gmra.mrb[12].mxu0 %vm2949_vm11, %v2920_v34 }
 0x197   : > { %v2928_v35 = vld [vmem:[#allocation2 + $0x78] sm:$0xff] }
 0x198   : > { %4416 = vmatmul.mubr.msk.bf16.gmra.mrb[12].mxu1 %vm2949_vm11, %v2928_v35 }
 0x1a6   : > { %v4389_v37 = vpop.f32.mrb[0].mxu0 }
 0x1a7   : > { %v3170_v39 = vmul.f32 %v4389_v37, %v5549_v36  ;;  %v3036_v40 = vpop.f32.mrb[1].mxu0 }
 0x1a8   : > { %v3168_v41 = vmul.f32 %v5549_v36, %v3036_v40  ;;  %v4390_v42 = vpop.f32.mrb[2].mxu0 }
 0x1a9   : > { %v3207_v43 = vadd.f32 %v5554_v38, %v3170_v39  ;;  %v3171_v44 = vmul.f32 %v4390_v42, %v5549_v36  ;;  %v3039_v45 = vpop.f32.mrb[3].mxu0 }
 0x1aa   : > { %v3205_v46 = vadd.f32 %v5554_v38, %v3168_v41  ;;  %v3169_v47 = vmul.f32 %v5549_v36, %v3039_v45  ;;  %v4405_v48 = vpop.f32.mrb[0].mxu1 }
 0x1ab   : > { %v3239_v49 = vmax.f32 %v3207_v43, 0.0  ;;  %v3208_v50 = vadd.f32 %v5554_v38, %v3171_v44  ;;  %v3186_v51 = vmul.f32 %v4405_v48, %v5549_v36  ;;  %v3100_v52 = vpop.f32.mrb[1].mxu1 }
 0x1ac   : > { %v3237_v53 = vmax.f32 %v3205_v46, 0.0  ;;  %v3206_v54 = vadd.f32 %v5554_v38, %v3169_v47  ;;  %v3184_v55 = vmul.f32 %v5549_v36, %v3100_v52  ;;  %v4406_v56 = vpop.f32.mrb[2].mxu1 }
 0x1ad   : > { %v3240_v57 = vmax.f32 %v3208_v50, 0.0  ;;  %v3223_v58 = vadd.f32 %v5554_v38, %v3186_v51  ;;  %v3187_v59 = vmul.f32 %v4406_v56, %v5549_v36  ;;  %v3103_v60 = vpop.f32.mrb[3].mxu1 }
 0x1ae   : > { %v3238_v61 = vmax.f32 %v3206_v54, 0.0  ;;  %v3221_v62 = vadd.f32 %v5554_v38, %v3184_v55  ;;  %v3185_v63 = vmul.f32 %v5549_v36, %v3103_v60 }
 0x1af   : > { %v4275_v1 = vpack.c.bf16 %v3240_v57, %v3239_v49  ;;  %v3255_v2 = vmax.f32 %v3223_v58, 0.0  ;;  %v3224_v3 = vadd.f32 %v5554_v38, %v3187_v59 }
 0x1b0   : > { %v4270_v4 = vpack.c.bf16 %v3238_v61, %v3237_v53  ;;  %v3253_v5 = vmax.f32 %v3221_v62, 0.0  ;;  %v3222_v6 = vadd.f32 %v5554_v38, %v3185_v63 }
 0x1b1   : > { %4347 = vst [vmem:[%s5575_s8 + $0x8] sm:$0xff] %v4275_v1   ;;  %v3256_v7 = vmax.f32 %v3224_v3, 0.0 }
 0x1b2   : > { %4271 = vst [vmem:[%s5575_s8] sm:$0xff] %v4270_v4   ;;  %v3254_v8 = vmax.f32 %v3222_v6, 0.0 }
 0x1b3   : > { %v4315_v9 = vpack.c.bf16 %v3256_v7, %v3255_v2 }
 0x1b4   : > { %v4310_v10 = vpack.c.bf16 %v3254_v8, %v3253_v5 }
 0x1b5   : > { %4355 = vst [vmem:[%s5575_s8 + $0x48] sm:$0xff] %v4315_v9  }
 0x1b6   : > { %4354 = vst [vmem:[%s5575_s8 + $0x40] sm:$0xff] %v4310_v10  }
 0x1e6   : > { %v4393_v11 = vpop.f32.mrb[4].mxu0 }
 0x1e7   : > { %v3174_v12 = vmul.f32 %v4393_v11, %v5549_v36  ;;  %v3052_v0 = vpop.f32.mrb[5].mxu0 }
 0x1e8   : > { %v3172_v13 = vmul.f32 %v5549_v36, %v3052_v0  ;;  %v4394_v14 = vpop.f32.mrb[6].mxu0 }
 0x1e9   : > { %v3211_v16 = vadd.f32 %v5554_v38, %v3174_v12  ;;  %v3175_v17 = vmul.f32 %v4394_v14, %v5549_v36  ;;  %v3055_v18 = vpop.f32.mrb[7].mxu0 }
 0x1ea   : > { %v3209_v19 = vadd.f32 %v5554_v38, %v3172_v13  ;;  %v3173_v20 = vmul.f32 %v5549_v36, %v3055_v18  ;;  %v4409_v21 = vpop.f32.mrb[4].mxu1 }
 0x1eb   : > { %v3243_v22 = vmax.f32 %v3211_v16, 0.0  ;;  %v3212_v23 = vadd.f32 %v5554_v38, %v3175_v17  ;;  %v3190_v24 = vmul.f32 %v4409_v21, %v5549_v36  ;;  %v3116_v25 = vpop.f32.mrb[5].mxu1 }
 0x1ec   : > { %v3241_v15 = vmax.f32 %v3209_v19, 0.0  ;;  %v3210_v26 = vadd.f32 %v5554_v38, %v3173_v20  ;;  %v3188_v27 = vmul.f32 %v5549_v36, %v3116_v25  ;;  %v4410_v28 = vpop.f32.mrb[6].mxu1 }
 0x1ed   : > { %v3244_v29 = vmax.f32 %v3212_v23, 0.0  ;;  %v3227_v30 = vadd.f32 %v5554_v38, %v3190_v24  ;;  %v3191_v31 = vmul.f32 %v4410_v28, %v5549_v36  ;;  %v3119_v32 = vpop.f32.mrb[7].mxu1 }
 0x1ee   : > { %v3242_v33 = vmax.f32 %v3210_v26, 0.0  ;;  %v3225_v34 = vadd.f32 %v5554_v38, %v3188_v27  ;;  %v3189_v35 = vmul.f32 %v5549_v36, %v3119_v32 }
 0x1ef   : > { %v4285_v37 = vpack.c.bf16 %v3244_v29, %v3243_v22  ;;  %v3259_v39 = vmax.f32 %v3227_v30, 0.0  ;;  %v3228_v40 = vadd.f32 %v5554_v38, %v3191_v31 }
 0x1f0   : > { %v4280_v41 = vpack.c.bf16 %v3242_v33, %v3241_v15  ;;  %v3257_v42 = vmax.f32 %v3225_v34, 0.0  ;;  %v3226_v43 = vadd.f32 %v5554_v38, %v3189_v35 }
 0x1f1   : > { %4349 = vst [vmem:[%s5575_s8 + $0x18] sm:$0xff] %v4285_v37   ;;  %v3260_v44 = vmax.f32 %v3228_v40, 0.0 }
 0x1f2   : > { %4348 = vst [vmem:[%s5575_s8 + $0x10] sm:$0xff] %v4280_v41   ;;  %v3258_v45 = vmax.f32 %v3226_v43, 0.0 }
 0x1f3   : > { %v4325_v46 = vpack.c.bf16 %v3260_v44, %v3259_v39 }
 0x1f4   : > { %v4320_v47 = vpack.c.bf16 %v3258_v45, %v3257_v42 }
 0x1f5   : > { %4357 = vst [vmem:[%s5575_s8 + $0x58] sm:$0xff] %v4325_v46  }
 0x1f6   : > { %4356 = vst [vmem:[%s5575_s8 + $0x50] sm:$0xff] %v4320_v47  }
 0x226   : > { %v4397_v48 = vpop.f32.mrb[8].mxu0 }
 0x227   : > { %v3178_v49 = vmul.f32 %v4397_v48, %v5549_v36  ;;  %v3068_v50 = vpop.f32.mrb[9].mxu0 }
 0x228   : > { %v3176_v51 = vmul.f32 %v5549_v36, %v3068_v50  ;;  %v4398_v52 = vpop.f32.mrb[10].mxu0 }
 0x229   : > { %v3215_v53 = vadd.f32 %v5554_v38, %v3178_v49  ;;  %v3179_v54 = vmul.f32 %v4398_v52, %v5549_v36  ;;  %v3071_v55 = vpop.f32.mrb[11].mxu0 }
 0x22a   : > { %v3213_v56 = vadd.f32 %v5554_v38, %v3176_v51  ;;  %v3177_v57 = vmul.f32 %v5549_v36, %v3071_v55  ;;  %v4413_v62 = vpop.f32.mrb[8].mxu1 }
 0x22b   : > { %v3247_v58 = vmax.f32 %v3215_v53, 0.0  ;;  %v3216_v59 = vadd.f32 %v5554_v38, %v3179_v54  ;;  %v3194_v1 = vmul.f32 %v4413_v62, %v5549_v36  ;;  %v3132_v2 = vpop.f32.mrb[9].mxu1 }
 0x22c   : > { %v3245_v60 = vmax.f32 %v3213_v56, 0.0  ;;  %v3214_v61 = vadd.f32 %v5554_v38, %v3177_v57  ;;  %v3192_v4 = vmul.f32 %v5549_v36, %v3132_v2  ;;  %v4414_v5 = vpop.f32.mrb[10].mxu1 }
 0x22d   : > { %v3248_v63 = vmax.f32 %v3216_v59, 0.0  ;;  %v3231_v7 = vadd.f32 %v5554_v38, %v3194_v1  ;;  %v3195_v8 = vmul.f32 %v4414_v5, %v5549_v36  ;;  %v3135_v9 = vpop.f32.mrb[11].mxu1 }
 0x22e   : > { %v3246_v3 = vmax.f32 %v3214_v61, 0.0  ;;  %v3229_v11 = vadd.f32 %v5554_v38, %v3192_v4  ;;  %v3193_v12 = vmul.f32 %v5549_v36, %v3135_v9 }
 0x22f   : > { %v4295_v6 = vpack.c.bf16 %v3248_v63, %v3247_v58  ;;  %v3263_v0 = vmax.f32 %v3231_v7, 0.0  ;;  %v3232_v13 = vadd.f32 %v5554_v38, %v3195_v8 }
 0x230   : > { %v4290_v10 = vpack.c.bf16 %v3246_v3, %v3245_v60  ;;  %v3261_v14 = vmax.f32 %v3229_v11, 0.0  ;;  %v3230_v16 = vadd.f32 %v5554_v38, %v3193_v12 }
 0x231   : > { %4351 = vst [vmem:[%s5575_s8 + $0x28] sm:$0xff] %v4295_v6   ;;  %v3264_v17 = vmax.f32 %v3232_v13, 0.0 }
 0x232   : > { %4350 = vst [vmem:[%s5575_s8 + $0x20] sm:$0xff] %v4290_v10   ;;  %v3262_v18 = vmax.f32 %v3230_v16, 0.0 }
 0x233   : > { %v4335_v19 = vpack.c.bf16 %v3264_v17, %v3263_v0 }
 0x234   : > { %v4330_v20 = vpack.c.bf16 %v3262_v18, %v3261_v14 }
 0x235   : > { %4359 = vst [vmem:[%s5575_s8 + $0x68] sm:$0xff] %v4335_v19  }
 0x236   : > { %4358 = vst [vmem:[%s5575_s8 + $0x60] sm:$0xff] %v4330_v20  }
 0x266   : > { %v4401_v21 = vpop.f32.mrb[12].mxu0 }
 0x267   : > { %v3182_v22 = vmul.f32 %v4401_v21, %v5549_v36  ;;  %v3084_v23 = vpop.f32.mrb[13].mxu0 }
 0x268   : > { %v3180_v24 = vmul.f32 %v5549_v36, %v3084_v23  ;;  %v4402_v25 = vpop.f32.mrb[14].mxu0 }
 0x269   : > { %v3219_v15 = vadd.f32 %v5554_v38, %v3182_v22  ;;  %v3183_v26 = vmul.f32 %v4402_v25, %v5549_v36  ;;  %v3087_v27 = vpop.f32.mrb[15].mxu0 }
 0x26a   : > { %v3217_v29 = vadd.f32 %v5554_v38, %v3180_v24  ;;  %v3181_v30 = vmul.f32 %v5549_v36, %v3087_v27 }
 0x26b   : > { %v4417_v28 = vpop.f32.mrb[12].mxu1  ;;  %v3251_v33 = vmax.f32 %v3219_v15, 0.0  ;;  %v3220_v34 = vadd.f32 %v5554_v38, %v3183_v26 }
 0x26c   : > { %v3198_v31 = vmul.f32 %v4417_v28, %v5549_v36  ;;  %v3148_v32 = vpop.f32.mrb[13].mxu1  ;;  %v3249_v39 = vmax.f32 %v3217_v29, 0.0  ;;  %v3218_v40 = vadd.f32 %v5554_v38, %v3181_v30 }
 0x26d   : > { %v3196_v35 = vmul.f32 %v5549_v36, %v3148_v32  ;;  %v4418_v37 = vpop.f32.mrb[14].mxu1  ;;  %v3252_v44 = vmax.f32 %v3220_v34, 0.0 }
 0x26e   : > { %v3235_v41 = vadd.f32 %v5554_v38, %v3198_v31  ;;  %v3199_v42 = vmul.f32 %v4418_v37, %v5549_v36  ;;  %v3151_v43 = vpop.f32.mrb[15].mxu1  ;;  %v3250_v47 = vmax.f32 %v3218_v40, 0.0 }
 0x26f   : > { %v3233_v45 = vadd.f32 %v5554_v38, %v3196_v35  ;;  %v3197_v46 = vmul.f32 %v5549_v36, %v3151_v43  ;;  %v4305_v49 = vpack.c.bf16 %v3252_v44, %v3251_v33 }
 0x270   : > { %v3236_v48 = vadd.f32 %v5554_v38, %v3199_v42  ;;  %v4300_v51 = vpack.c.bf16 %v3250_v47, %v3249_v39  ;;  %v3267_v52 = vmax.f32 %v3235_v41, 0.0 }
 0x271   : > { %v3234_v50 = vadd.f32 %v5554_v38, %v3197_v46  ;;  %4353 = vst [vmem:[%s5575_s8 + $0x38] sm:$0xff] %v4305_v49   ;;  %v3265_v54 = vmax.f32 %v3233_v45, 0.0 }
 0x272   : > { %v3268_v53 = vmax.f32 %v3236_v48, 0.0  ;;  %4352 = vst [vmem:[%s5575_s8 + $0x30] sm:$0xff] %v4300_v51  }
 0x273   : > { %v3266_v55 = vmax.f32 %v3234_v50, 0.0 }
 0x274   : > { %v4345_v36 = vpack.c.bf16 %v3268_v53, %v3267_v52 }
 0x275   : > { %v4340_v56 = vpack.c.bf16 %v3266_v55, %v3265_v54 }
 0x276   : > { %4361 = vst [vmem:[%s5575_s8 + $0x78] sm:$0xff] %v4345_v36  }
 0x277   : > { %4360 = vst [vmem:[%s5575_s8 + $0x70] sm:$0xff] %v4340_v56  }
 0x278   : > { %4748 = shalt.err (!%p4745_p5)
}
 0x279   : > { %s4749_s28 = scalar_lea.hbm %s5644_s19, 2048  ;;  %s4753_s4 = scalar_lea.hbm %s5702_s3, 4096 }
 0x27a   : > { %p4750_p6 = scmp.ne.s32.totalorder %s5644_s19, %s4749_s28  ;;  %p4754_p10 = scmp.lt.u32.totalorder %s5644_s19, %s5702_s3 }
 0x27b   : > { %p4755_p11 = scmp.lt.u32.totalorder %s4753_s4, %s4749_s28  ;;  %p4757_p13 = scmp.lt.u32.totalorder %s4749_s28, %s5644_s19 }
 0x27c   : > { %p4751_p7 = pnand %p4750_p6, %p4885_p4 }
 0x27d   : > { %p4756_p12 = por %p4755_p11, %p4754_p10 }
 0x27e   : > { %p4752_p9 = pneg %p4751_p7 }
 0x27f   : > { %p4758_p0 = por %p4757_p13, %p4756_p12 }
 0x281   : > { %p4759_p1 = pnand %p4758_p0, %p4752_p9 }
 0x283   : > { %4762 = shalt.err (!%p4759_p1)
}
 0x284   : > { %s4824_s8 = smov 64  }
 0x285   : > { %4428 = dma.vmem_to_hbm [thread:$0]  (%p4885_p4), %s5646_s10, 2048, %s5644_s19, %s5652_s15, %s4824_s8, %s4824_s8, %s4817_s6  }
 0x286 PF: > { %p4434_p2 = scmp.ge.s32.totalorder %s4813_s17, 2  ;;  %s3460_s9 = sand.u32 1, %s4793_s12  }
 0x287   : > { %s3461_s11 = scalar_lea.sflag [#allocation4], %s3460_s9 }
 0x288   : > { %p4431_p3 = pnand %p4434_p2, %p4892_p8 }
 0x28a   : > { %4788 = dma.done.wait (!%p4431_p3), %s3461_s11, 2048  }
 0x28b   : > { %4790 = vsyncadd (!%p4431_p3), %s3461_s11, 4294965248  ;;  %s16_s17 = sadd.s32 1, %s4813_s17   ;;  %s5705_s12 = smov %s4797_s13 }
 0x28c   : > { %p13_p5 = scmp.ge.s32.totalorder %s16_s17, 4   ;;  %s5706_s13 = smov %s4801_s14 }
 0x28d   : > { %s5707_s14 = smov %s4898_s25  ;;  %s5708_s15 = smov %s4809_s16 }
 0x28e   : > { %s5709_s16 = smov %s5711_s20  ;;  %15 = sbr.rel (!%p13_p5) target bundleno = 4 (0x4), region = 90 }
 0x295   :  { %3466 = vsyncpa [#allocation4], 1 }
 0x296   :  { %3468 = vsyncpa [#allocation4 + $0x1], 1 }

</bundles_post_ra>
